<compile_context>
chip_gen: v7x
topology: tpu7x:2x2x1
jax: 0.10.0
libtpu: 0.0.40
codegen_flags: <defaults>
</compile_context>

<pallas_src>
import functools
import math

import jax
import jax.numpy as jnp
from jax.experimental import pallas as pl
from jax.experimental.pallas import tpu as pltpu

N_ATOMS = 51
N_ACTIONS = 6
ATOMS_PAD = 128      # lane-dense padding of the atom axis (multiple of 128)
CONV_PAD = 128       # lane-dense padding of conv output channels
CONV3_CH = 64        # real conv3 output channels
HID = 512            # NoisyLinear hidden width


def _conv_spatial(h, w):
    """Spatial sizes after the 8/4, 4/2, 3/1 conv stack (valid padding)."""
    h1, w1 = (h - 8) // 4 + 1, (w - 8) // 4 + 1
    h2, w2 = (h1 - 4) // 2 + 1, (w1 - 4) // 2 + 1
    h3, w3 = (h2 - 3) // 1 + 1, (w2 - 3) // 1 + 1
    return (h1, w1), (h2, w2), (h3, w3)


# ----------------------------------------------------------------------------
# Conv-as-matmul kernel (bf16 MXU, f32 epilogue, bf16 activation out)
# ----------------------------------------------------------------------------
def _matmul_kernel(x_ref, w_ref, b_ref, o_ref, *, relu):
    """(tm, K) bf16 @ (K, N) bf16 + (1, N) f32 -> (tm, N) bf16, optional ReLU."""
    y = jnp.dot(x_ref[...], w_ref[...], preferred_element_type=jnp.float32) + b_ref[...]
    if relu:
        y = jnp.maximum(y, 0.0)
    o_ref[...] = y.astype(o_ref.dtype)


def _pick_tm(M, tm_max):
    """Largest 16-multiple divisor of M (<= tm_max); prefer >= 2 grid steps.

    Divisor => no M padding and no `out[:M]` slice copy afterwards.
    """
    if M % 16 != 0:
        return M                              # single full-extent block (legal)
    tm = 16
    for cand in range(16, min(tm_max, M) + 1, 16):
        if M % cand == 0:
            tm = cand
    if tm == M and M >= 32 and (M // 2) % 16 == 0:
        tm = M // 2                           # >=2 steps: pipelining + v7x 2nd TC
    return tm


def pallas_linear(x, w, b, *, relu=True, tm_max=512):
    """Row-tiled, software-pipelined conv matmul.

    x: (M, K) bf16, w: (K, N) bf16 (N a multiple of 128), b: (1, N) f32.
    Returns (M, N) bf16. tm_max=512 is the v7x-safe setting; raise on v5e/v6e
    (128 MiB VMEM) for training-sized batches.
    """
    M, K = x.shape
    Kw, N = w.shape
    assert K == Kw, (K, Kw)
    tm = _pick_tm(M, tm_max)

    return pl.pallas_call(
        functools.partial(_matmul_kernel, relu=relu),
        out_shape=jax.ShapeDtypeStruct((M, N), jnp.bfloat16),
        grid=(M // tm,),
        in_specs=[
            pl.BlockSpec((tm, K), lambda i: (i, 0)),
            pl.BlockSpec((K, N), lambda i: (0, 0)),
            pl.BlockSpec((1, N), lambda i: (0, 0)),
        ],
        out_specs=pl.BlockSpec((tm, N), lambda i: (i, 0)),
        compiler_params=pltpu.CompilerParams(
            dimension_semantics=("parallel",),          # shards across v7x's 2 TCs
            vmem_limit_bytes=32 * 1024 * 1024,          # safe vs v7x's 64 MiB VMEM
        ),
        cost_estimate=pl.CostEstimate(
            flops=2 * M * K * N,
            transcendentals=0,
            bytes_accessed=M * K * 2 + K * N * 2 + N * 4 + M * N * 2,
        ),
    )(x, w, b)


# ----------------------------------------------------------------------------
# Fused (conv3 +) dueling distributional head
# ----------------------------------------------------------------------------
def _head_kernel(*refs, fuse_conv3):
    """[conv3 -> ReLU ->] [val|adv] NoisyLinear -> ReLU -> stage2 -> combine."""
    if fuse_conv3:
        x_ref, w3_ref, b3_ref, w1_ref, b1_ref, w2_ref, b2_ref, o_ref = refs
    else:
        x_ref, w1_ref, b1_ref, w2_ref, b2_ref, o_ref = refs

    x = x_ref[...]                                               # bf16
    if fuse_conv3:
        y0 = jnp.dot(x, w3_ref[...], preferred_element_type=jnp.float32) + b3_ref[...]
        x = jnp.maximum(y0, 0.0).astype(jnp.bfloat16)            # (B, CONV_PAD)

    h = jnp.dot(x, w1_ref[...], preferred_element_type=jnp.float32) + b1_ref[...]
    h = jnp.maximum(h, 0.0).astype(jnp.bfloat16)                 # (B, 2*HID), VMEM only

    # single second-stage dot against block-diagonal [val_w2 0; 0 adv_w2]
    y = jnp.dot(h, w2_ref[...], preferred_element_type=jnp.float32) + b2_ref[...]
    v = y[:, 0:ATOMS_PAD]                                        # (B, ATOMS_PAD)

    a_sum = y[:, ATOMS_PAD:2 * ATOMS_PAD]
    for k in range(1, N_ACTIONS):
        a_sum = a_sum + y[:, (k + 1) * ATOMS_PAD:(k + 2) * ATOMS_PAD]
    corr = v - a_sum * (1.0 / N_ACTIONS)                         # val - mean(adv)

    # per-action full-lane stores (no (B, A*ATOMS_PAD) concat temp)
    for k in range(N_ACTIONS):
        o_ref[:, k * ATOMS_PAD:(k + 1) * ATOMS_PAD] = (
            y[:, (k + 1) * ATOMS_PAD:(k + 2) * ATOMS_PAD] + corr)


def pallas_head(x, params, *, fuse_conv3):
    """x: (B, 3*3*CONV_PAD) conv3 patches (fused) or (B, n_pos*CONV_PAD) conv_out."""
    B = x.shape[0]
    args = [x]
    if fuse_conv3:
        args += [params["w3"], params["b3"]]
    args += [params["head_w1"], params["head_b1"], params["head_w2"], params["head_b2"]]

    # TODO(synk): for Atari-sized heads (F ~ 3136) grid the first dot over F as
    #             an "arbitrary" reduction axis so the head weight DMA overlaps
    #             the MXU instead of being serialized before compute.
    out = pl.pallas_call(
        functools.partial(_head_kernel, fuse_conv3=fuse_conv3),
        out_shape=jax.ShapeDtypeStruct((B, N_ACTIONS * ATOMS_PAD), jnp.float32),
        in_specs=[pl.BlockSpec(memory_space=pltpu.MemorySpace.VMEM)] * len(args),
        out_specs=pl.BlockSpec(memory_space=pltpu.MemorySpace.VMEM),
        compiler_params=pltpu.CompilerParams(vmem_limit_bytes=32 * 1024 * 1024),
    )(*args)
    # strip atom lane padding outside the kernel (free row-major reinterpret).
    return out.reshape(B, N_ACTIONS, ATOMS_PAD)[:, :, :N_ATOMS]


# ----------------------------------------------------------------------------
# Plain-JAX glue: NHWC im2col (128-lane-aligned chunks; no transposes between layers)
# TODO(synk): fuse patch extraction into the conv kernel as a k*k-tap reduction
#             grid axis so patches never hit HBM.
# ----------------------------------------------------------------------------
def im2col_nhwc(x, k, s):
    """x: (B, H, W, C) NHWC -> patches (B*Ho*Wo, k*k*C)."""
    B, H, W, C = x.shape
    Ho = (H - k) // s + 1
    Wo = (W - k) // s + 1
    cols = [x[:, i:i + s * Ho:s, j:j + s * Wo:s, :]           # (B, Ho, Wo, C)
            for i in range(k) for j in range(k)]
    p = jnp.concatenate(cols, axis=-1)                        # (B, Ho, Wo, k*k*C)
    return p.reshape(B * Ho * Wo, k * k * C), Ho, Wo


# ----------------------------------------------------------------------------
# Parameters (NoisyLinear effective weights mu + sigma*eps folded in at init)
# ----------------------------------------------------------------------------
def init_params(key, in_ch, H, W):
    (_, _), (_, _), (h3, w3) = _conv_spatial(H, W)
    n_pos = h3 * w3
    conv_out_size = CONV3_CH * n_pos                  # real (unpadded) feature count
    ks = jax.random.split(key, 14)

    def rand(k, shape, fan_in):
        return jax.random.normal(k, shape, jnp.float32) / math.sqrt(fan_in)

    def conv_wb(kw, kb, kk, cin_real, cin_pad, cout_real, scale=1.0):
        # rows ordered (kh*kw, cin_pad) to match im2col_nhwc; zero rows absorb
        # the previous layer's 128-channel lane padding (K = k*k*cin_pad), zero
        # cols pad cout -> CONV_PAD so output stores are full-lane vst.
        w = rand(kw, (kk, cin_real, cout_real), kk * cin_real) * scale
        w = jnp.pad(w, ((0, 0), (0, cin_pad - cin_real), (0, CONV_PAD - cout_real)))
        b = rand(kb, (cout_real,), kk * cin_real)
        b = jnp.pad(b, (0, CONV_PAD - cout_real)).reshape(1, CONV_PAD)
        return w.reshape(kk * cin_pad, CONV_PAD).astype(jnp.bfloat16), b

    # conv stack; 1/256 input normalization folded into conv1's weights.
    w1, b1 = conv_wb(ks[0], ks[1], 8 * 8, in_ch, in_ch, 32, scale=1.0 / 256.0)
    w2, b2 = conv_wb(ks[2], ks[3], 4 * 4, 32, CONV_PAD, 64)
    w3, b3 = conv_wb(ks[4], ks[5], 3 * 3, 64, CONV_PAD, 64)

    # head stage 1: [val_w1 | adv_w1], rows indexed (pos, c_pad) to match the
    # NHWC/CONV_PAD activation layout (zero rows under the channel padding).
    hv = rand(ks[6], (n_pos, CONV3_CH, HID), conv_out_size)
    ha = rand(ks[7], (n_pos, CONV3_CH, HID), conv_out_size)
    h1 = jnp.concatenate([hv, ha], axis=-1)                          # (n_pos, 64, 2*HID)
    h1 = jnp.pad(h1, ((0, 0), (0, CONV_PAD - CONV3_CH), (0, 0)))
    head_w1 = h1.reshape(n_pos * CONV_PAD, 2 * HID).astype(jnp.bfloat16)
    head_b1 = jnp.concatenate([rand(ks[8], (HID,), conv_out_size),
                               rand(ks[9], (HID,), conv_out_size)]).reshape(1, 2 * HID)

    # head stage 2: block-diagonal [val_w2 0; 0 adv_w2] -> one MXU dot yields
    # [val | adv] at 128-aligned lane offsets (atoms lane-padded 51 -> 128).
    vw = jnp.pad(rand(ks[10], (HID, N_ATOMS), HID), ((0, 0), (0, ATOMS_PAD - N_ATOMS)))
    aw = jnp.pad(rand(ks[12], (HID, N_ACTIONS, N_ATOMS), HID),
                 ((0, 0), (0, 0), (0, ATOMS_PAD - N_ATOMS))
                 ).reshape(HID, N_ACTIONS * ATOMS_PAD)
    top = jnp.concatenate([vw, jnp.zeros((HID, N_ACTIONS * ATOMS_PAD), jnp.float32)], axis=1)
    bot = jnp.concatenate([jnp.zeros((HID, ATOMS_PAD), jnp.float32), aw], axis=1)
    head_w2 = jnp.concatenate([top, bot], axis=0).astype(jnp.bfloat16)   # (2*HID, 896)

    vb = jnp.pad(rand(ks[11], (N_ATOMS,), HID), (0, ATOMS_PAD - N_ATOMS))
    ab = jnp.pad(rand(ks[13], (N_ACTIONS, N_ATOMS), HID),
                 ((0, 0), (0, ATOMS_PAD - N_ATOMS))).reshape(N_ACTIONS * ATOMS_PAD)
    head_b2 = jnp.concatenate([vb, ab]).reshape(1, (1 + N_ACTIONS) * ATOMS_PAD)

    return {
        "w1": w1, "b1": b1, "w2": w2, "b2": b2, "w3": w3, "b3": b3,
        "head_w1": head_w1, "head_b1": head_b1,
        "head_w2": head_w2, "head_b2": head_b2,
    }


# ----------------------------------------------------------------------------
# Forward
# ----------------------------------------------------------------------------
def forward(params, x):
    """x: (B, C, H, W) uint8 -> (B, n_actions, n_atoms) f32 category logits."""
    B = x.shape[0]
    # one NCHW -> NHWC transpose up-front; bf16 is exact for 0..255 and the
    # 1/256 scale is already folded into conv1's weights.
    fx = x.transpose(0, 2, 3, 1).astype(jnp.bfloat16)

    p, H1, W1 = im2col_nhwc(fx, 8, 4)
    h = pallas_linear(p, params["w1"], params["b1"], relu=True)      # (M1, 128) bf16
    h = h.reshape(B, H1, W1, CONV_PAD)                                # keep lane padding

    p, H2, W2 = im2col_nhwc(h, 4, 2)
    h = pallas_linear(p, params["w2"], params["b2"], relu=True)
    h = h.reshape(B, H2, W2, CONV_PAD)

    p, H3, W3 = im2col_nhwc(h, 3, 1)                                  # (B*H3*W3, 3*3*128)
    if H3 * W3 == 1:
        # conv3 output == conv_out: fuse conv3 + whole dueling head in one call.
        return pallas_head(p, params, fuse_conv3=True)

    # general path (e.g. Atari 84x84): separate conv3, then the fused head.
    h = pallas_linear(p, params["w3"], params["b3"], relu=True)
    conv_out = h.reshape(B, H3 * W3 * CONV_PAD)                       # bf16, padded channels
    return pallas_head(conv_out, params, fuse_conv3=False)


if __name__ == "__main__":
    key = jax.random.PRNGKey(0)
    k_x, k_p = jax.random.split(key)

    # Small input consistent with the conv stack: (B=2, C=4, H=W=36)
    # conv spatial sizes: 36 -> 8 -> 3 -> 1  =>  conv3 output is 1x1x64 (fused head path).
    B, C, H, W = 2, 4, 36, 36
    x = jax.random.randint(k_x, (B, C, H, W), 0, 256, dtype=jnp.int32).astype(jnp.uint8)

    params = init_params(k_p, C, H, W)

    out = jax.jit(forward)(params, x)
    out = jax.block_until_ready(out)
    assert out.shape == (B, N_ACTIONS, N_ATOMS), out.shape
    assert out.dtype == jnp.float32
    assert bool(jnp.all(jnp.isfinite(out)))
    print("KERNEL_OK")
</pallas_src>

<mosaic_0001>
module attributes {stable_mosaic.version = 11 : i64} {
  func.func @_matmul_kernel(%arg0: i32, %arg1: memref<64x256xbf16, #tpu.memory_space<vmem>>, %arg2: memref<256x128xbf16, #tpu.memory_space<vmem>>, %arg3: memref<1x128xf32, #tpu.memory_space<vmem>>, %arg4: memref<64x128xbf16, #tpu.memory_space<vmem>>) attributes {dimension_semantics = [#tpu.dimension_semantics<parallel>], iteration_bounds = array<i64: 2>, scalar_prefetch = 0 : i64, scratch_operands = 0 : i64, tpu.core_type = #tpu.core_type<tc>, window_params = [{transform_indices = @transform_0, window_bounds = array<i64: 64, 256>}, {pipeline_mode = #tpu.pipeline_mode<synchronous>, transform_indices = @transform_1, window_bounds = array<i64: 256, 128>}, {pipeline_mode = #tpu.pipeline_mode<synchronous>, transform_indices = @transform_2, window_bounds = array<i64: 1, 128>}, {transform_indices = @transform_3, window_bounds = array<i64: 64, 128>}]} {
    %c0 = arith.constant 0 : index
    %c0_0 = arith.constant 0 : index
    %0 = vector.load %arg1[%c0, %c0_0] : memref<64x256xbf16, #tpu.memory_space<vmem>>, vector<64x256xbf16>
    %c0_1 = arith.constant 0 : index
    %c0_2 = arith.constant 0 : index
    %1 = vector.load %arg2[%c0_1, %c0_2] : memref<256x128xbf16, #tpu.memory_space<vmem>>, vector<256x128xbf16>
    %cst = arith.constant dense<0.000000e+00> : vector<64x128xf32>
    %2 = tpu.matmul %0, %1, %cst {dimension_numbers = #tpu.dot_dimension_numbers<[1], [0], [0], [1], [0, 0, 1, 1], [], []>} : vector<64x256xbf16>, vector<256x128xbf16>, vector<64x128xf32> -> vector<64x128xf32>
    %c0_3 = arith.constant 0 : index
    %c0_4 = arith.constant 0 : index
    %3 = vector.load %arg3[%c0_3, %c0_4] : memref<1x128xf32, #tpu.memory_space<vmem>>, vector<1x128xf32>
    %4 = vector.broadcast %3 : vector<1x128xf32> to vector<64x128xf32>
    %5 = arith.addf %2, %4 : vector<64x128xf32>
    %cst_5 = arith.constant 0.000000e+00 : f32
    %6 = vector.broadcast %cst_5 : f32 to vector<64x128xf32>
    %7 = arith.maximumf %5, %6 : vector<64x128xf32>
    %8 = arith.truncf %7 : vector<64x128xf32> to vector<64x128xbf16>
    %c0_6 = arith.constant 0 : index
    %c0_7 = arith.constant 0 : index
    %9 = vector.load %arg4[%c0_6, %c0_7] : memref<64x128xbf16, #tpu.memory_space<vmem>>, vector<64x128xbf16>
    tpu.vector_store %arg4[%c0_6, %c0_7], %8 {strides = array<i32>} : memref<64x128xbf16, #tpu.memory_space<vmem>>, vector<64x128xbf16>,
    return
  }
  func.func @transform_0(%arg0: i32) -> (i32, i32) {
    %c0_i32 = arith.constant 0 : i32
    %c0_i32_0 = arith.constant 0 : i32
    return %arg0, %c0_i32 : i32, i32
  }
  func.func @transform_1(%arg0: i32) -> (i32, i32) {
    %c0_i32 = arith.constant 0 : i32
    %c0_i32_0 = arith.constant 0 : i32
    %c0_i32_1 = arith.constant 0 : i32
    return %c0_i32, %c0_i32_0 : i32, i32
  }
  func.func @transform_2(%arg0: i32) -> (i32, i32) {
    %c0_i32 = arith.constant 0 : i32
    %c0_i32_0 = arith.constant 0 : i32
    %c0_i32_1 = arith.constant 0 : i32
    return %c0_i32, %c0_i32_0 : i32, i32
  }
  func.func @transform_3(%arg0: i32) -> (i32, i32) {
    %c0_i32 = arith.constant 0 : i32
    %c0_i32_0 = arith.constant 0 : i32
    return %arg0, %c0_i32 : i32, i32
  }
}

module attributes {stable_mosaic.version = 11 : i64} {
  func.func @_matmul_kernel(%arg0: i32, %arg1: memref<18x2048xbf16, #tpu.memory_space<vmem>>, %arg2: memref<2048x128xbf16, #tpu.memory_space<vmem>>, %arg3: memref<1x128xf32, #tpu.memory_space<vmem>>, %arg4: memref<18x128xbf16, #tpu.memory_space<vmem>>) attributes {dimension_semantics = [#tpu.dimension_semantics<parallel>], iteration_bounds = array<i64: 1>, scalar_prefetch = 0 : i64, scratch_operands = 0 : i64, tpu.core_type = #tpu.core_type<tc>, window_params = [{transform_indices = @transform_0, window_bounds = array<i64: 18, 2048>}, {pipeline_mode = #tpu.pipeline_mode<synchronous>, transform_indices = @transform_1, window_bounds = array<i64: 2048, 128>}, {pipeline_mode = #tpu.pipeline_mode<synchronous>, transform_indices = @transform_2, window_bounds = array<i64: 1, 128>}, {transform_indices = @transform_3, window_bounds = array<i64: 18, 128>}]} {
    %c0 = arith.constant 0 : index
    %c0_0 = arith.constant 0 : index
    %0 = vector.load %arg1[%c0, %c0_0] : memref<18x2048xbf16, #tpu.memory_space<vmem>>, vector<18x2048xbf16>
    %c0_1 = arith.constant 0 : index
    %c0_2 = arith.constant 0 : index
    %1 = vector.load %arg2[%c0_1, %c0_2] : memref<2048x128xbf16, #tpu.memory_space<vmem>>, vector<2048x128xbf16>
    %cst = arith.constant dense<0.000000e+00> : vector<18x128xf32>
    %2 = tpu.matmul %0, %1, %cst {dimension_numbers = #tpu.dot_dimension_numbers<[1], [0], [0], [1], [0, 0, 1, 1], [], []>} : vector<18x2048xbf16>, vector<2048x128xbf16>, vector<18x128xf32> -> vector<18x128xf32>
    %c0_3 = arith.constant 0 : index
    %c0_4 = arith.constant 0 : index
    %3 = vector.load %arg3[%c0_3, %c0_4] : memref<1x128xf32, #tpu.memory_space<vmem>>, vector<1x128xf32>
    %4 = vector.broadcast %3 : vector<1x128xf32> to vector<18x128xf32>
    %5 = arith.addf %2, %4 : vector<18x128xf32>
    %cst_5 = arith.constant 0.000000e+00 : f32
    %6 = vector.broadcast %cst_5 : f32 to vector<18x128xf32>
    %7 = arith.maximumf %5, %6 : vector<18x128xf32>
    %8 = arith.truncf %7 : vector<18x128xf32> to vector<18x128xbf16>
    %c0_6 = arith.constant 0 : index
    %c0_7 = arith.constant 0 : index
    %9 = vector.load %arg4[%c0_6, %c0_7] : memref<18x128xbf16, #tpu.memory_space<vmem>>, vector<18x128xbf16>
    tpu.vector_store %arg4[%c0_6, %c0_7], %8 {strides = array<i32>} : memref<18x128xbf16, #tpu.memory_space<vmem>>, vector<18x128xbf16>,
    return
  }
  func.func @transform_0(%arg0: i32) -> (i32, i32) {
    %c0_i32 = arith.constant 0 : i32
    %c0_i32_0 = arith.constant 0 : i32
    return %arg0, %c0_i32 : i32, i32
  }
  func.func @transform_1(%arg0: i32) -> (i32, i32) {
    %c0_i32 = arith.constant 0 : i32
    %c0_i32_0 = arith.constant 0 : i32
    %c0_i32_1 = arith.constant 0 : i32
    return %c0_i32, %c0_i32_0 : i32, i32
  }
  func.func @transform_2(%arg0: i32) -> (i32, i32) {
    %c0_i32 = arith.constant 0 : i32
    %c0_i32_0 = arith.constant 0 : i32
    %c0_i32_1 = arith.constant 0 : i32
    return %c0_i32, %c0_i32_0 : i32, i32
  }
  func.func @transform_3(%arg0: i32) -> (i32, i32) {
    %c0_i32 = arith.constant 0 : i32
    %c0_i32_0 = arith.constant 0 : i32
    return %arg0, %c0_i32 : i32, i32
  }
}

module attributes {stable_mosaic.version = 11 : i64} {
  func.func @_head_kernel(%arg0: memref<2x1152xbf16, #tpu.memory_space<vmem>>, %arg1: memref<1152x128xbf16, #tpu.memory_space<vmem>>, %arg2: memref<1x128xf32, #tpu.memory_space<vmem>>, %arg3: memref<128x1024xbf16, #tpu.memory_space<vmem>>, %arg4: memref<1x1024xf32, #tpu.memory_space<vmem>>, %arg5: memref<1024x896xbf16, #tpu.memory_space<vmem>>, %arg6: memref<1x896xf32, #tpu.memory_space<vmem>>, %arg7: memref<2x768xf32, #tpu.memory_space<vmem>>) attributes {dimension_semantics = [], scalar_prefetch = 0 : i64, scratch_operands = 0 : i64, tpu.core_type = #tpu.core_type<tc>} {
    %c0 = arith.constant 0 : index
    %c0_0 = arith.constant 0 : index
    %0 = vector.load %arg0[%c0, %c0_0] : memref<2x1152xbf16, #tpu.memory_space<vmem>>, vector<2x1152xbf16>
    %c0_1 = arith.constant 0 : index
    %c0_2 = arith.constant 0 : index
    %1 = vector.load %arg1[%c0_1, %c0_2] : memref<1152x128xbf16, #tpu.memory_space<vmem>>, vector<1152x128xbf16>
    %cst = arith.constant dense<0.000000e+00> : vector<2x128xf32>
    %2 = tpu.matmul %0, %1, %cst {dimension_numbers = #tpu.dot_dimension_numbers<[1], [0], [0], [1], [0, 0, 1, 1], [], []>} : vector<2x1152xbf16>, vector<1152x128xbf16>, vector<2x128xf32> -> vector<2x128xf32>
    %c0_3 = arith.constant 0 : index
    %c0_4 = arith.constant 0 : index
    %3 = vector.load %arg2[%c0_3, %c0_4] : memref<1x128xf32, #tpu.memory_space<vmem>>, vector<1x128xf32>
    %4 = vector.broadcast %3 : vector<1x128xf32> to vector<2x128xf32>
    %5 = arith.addf %2, %4 : vector<2x128xf32>
    %cst_5 = arith.constant 0.000000e+00 : f32
    %6 = vector.broadcast %cst_5 : f32 to vector<2x128xf32>
    %7 = arith.maximumf %5, %6 : vector<2x128xf32>
    %8 = arith.truncf %7 : vector<2x128xf32> to vector<2x128xbf16>
    %c0_6 = arith.constant 0 : index
    %c0_7 = arith.constant 0 : index
    %9 = vector.load %arg3[%c0_6, %c0_7] : memref<128x1024xbf16, #tpu.memory_space<vmem>>, vector<128x1024xbf16>
    %cst_8 = arith.constant dense<0.000000e+00> : vector<2x1024xf32>
    %10 = tpu.matmul %8, %9, %cst_8 {dimension_numbers = #tpu.dot_dimension_numbers<[1], [0], [0], [1], [0, 0, 1, 1], [], []>} : vector<2x128xbf16>, vector<128x1024xbf16>, vector<2x1024xf32> -> vector<2x1024xf32>
    %c0_9 = arith.constant 0 : index
    %c0_10 = arith.constant 0 : index
    %11 = vector.load %arg4[%c0_9, %c0_10] : memref<1x1024xf32, #tpu.memory_space<vmem>>, vector<1x1024xf32>
    %12 = vector.broadcast %11 : vector<1x1024xf32> to vector<2x1024xf32>
    %13 = arith.addf %10, %12 : vector<2x1024xf32>
    %cst_11 = arith.constant 0.000000e+00 : f32
    %14 = vector.broadcast %cst_11 : f32 to vector<2x1024xf32>
    %15 = arith.maximumf %13, %14 : vector<2x1024xf32>
    %16 = arith.truncf %15 : vector<2x1024xf32> to vector<2x1024xbf16>
    %c0_12 = arith.constant 0 : index
    %c0_13 = arith.constant 0 : index
    %17 = vector.load %arg5[%c0_12, %c0_13] : memref<1024x896xbf16, #tpu.memory_space<vmem>>, vector<1024x896xbf16>
    %cst_14 = arith.constant dense<0.000000e+00> : vector<2x896xf32>
    %18 = tpu.matmul %16, %17, %cst_14 {dimension_numbers = #tpu.dot_dimension_numbers<[1], [0], [0], [1], [0, 0, 1, 1], [], []>} : vector<2x1024xbf16>, vector<1024x896xbf16>, vector<2x896xf32> -> vector<2x896xf32>
    %c0_15 = arith.constant 0 : index
    %c0_16 = arith.constant 0 : index
    %19 = vector.load %arg6[%c0_15, %c0_16] : memref<1x896xf32, #tpu.memory_space<vmem>>, vector<1x896xf32>
    %20 = vector.broadcast %19 : vector<1x896xf32> to vector<2x896xf32>
    %21 = arith.addf %18, %20 : vector<2x896xf32>
    %22 = vector.extract_strided_slice %21 {offsets = [0, 0], sizes = [2, 128], strides = [1, 1]} : vector<2x896xf32> to vector<2x128xf32>
    %23 = vector.extract_strided_slice %21 {offsets = [0, 128], sizes = [2, 128], strides = [1, 1]} : vector<2x896xf32> to vector<2x128xf32>
    %24 = vector.extract_strided_slice %21 {offsets = [0, 256], sizes = [2, 128], strides = [1, 1]} : vector<2x896xf32> to vector<2x128xf32>
    %25 = arith.addf %23, %24 : vector<2x128xf32>
    %26 = vector.extract_strided_slice %21 {offsets = [0, 384], sizes = [2, 128], strides = [1, 1]} : vector<2x896xf32> to vector<2x128xf32>
    %27 = arith.addf %25, %26 : vector<2x128xf32>
    %28 = vector.extract_strided_slice %21 {offsets = [0, 512], sizes = [2, 128], strides = [1, 1]} : vector<2x896xf32> to vector<2x128xf32>
    %29 = arith.addf %27, %28 : vector<2x128xf32>
    %30 = vector.extract_strided_slice %21 {offsets = [0, 640], sizes = [2, 128], strides = [1, 1]} : vector<2x896xf32> to vector<2x128xf32>
    %31 = arith.addf %29, %30 : vector<2x128xf32>
    %32 = vector.extract_strided_slice %21 {offsets = [0, 768], sizes = [2, 128], strides = [1, 1]} : vector<2x896xf32> to vector<2x128xf32>
    %33 = arith.addf %31, %32 : vector<2x128xf32>
    %cst_17 = arith.constant 0.166666672 : f32
    %34 = vector.broadcast %cst_17 : f32 to vector<2x128xf32>
    %35 = arith.mulf %33, %34 : vector<2x128xf32>
    %36 = arith.subf %22, %35 : vector<2x128xf32>
    %37 = vector.extract_strided_slice %21 {offsets = [0, 128], sizes = [2, 128], strides = [1, 1]} : vector<2x896xf32> to vector<2x128xf32>
    %38 = arith.addf %37, %36 : vector<2x128xf32>
    %c0_18 = arith.constant 0 : index
    %c0_19 = arith.constant 0 : index
    %39 = vector.load %arg7[%c0_18, %c0_19] : memref<2x768xf32, #tpu.memory_space<vmem>>, vector<2x128xf32>
    tpu.vector_store %arg7[%c0_18, %c0_19], %38 {strides = array<i32>} : memref<2x768xf32, #tpu.memory_space<vmem>>, vector<2x128xf32>,
    %40 = vector.extract_strided_slice %21 {offsets = [0, 256], sizes = [2, 128], strides = [1, 1]} : vector<2x896xf32> to vector<2x128xf32>
    %41 = arith.addf %40, %36 : vector<2x128xf32>
    %c0_20 = arith.constant 0 : index
    %c128 = arith.constant 128 : index
    %42 = vector.load %arg7[%c0_20, %c128] : memref<2x768xf32, #tpu.memory_space<vmem>>, vector<2x128xf32>
    tpu.vector_store %arg7[%c0_20, %c128], %41 {strides = array<i32>} : memref<2x768xf32, #tpu.memory_space<vmem>>, vector<2x128xf32>,
    %43 = vector.extract_strided_slice %21 {offsets = [0, 384], sizes = [2, 128], strides = [1, 1]} : vector<2x896xf32> to vector<2x128xf32>
    %44 = arith.addf %43, %36 : vector<2x128xf32>
    %c0_21 = arith.constant 0 : index
    %c256 = arith.constant 256 : index
    %45 = vector.load %arg7[%c0_21, %c256] : memref<2x768xf32, #tpu.memory_space<vmem>>, vector<2x128xf32>
    tpu.vector_store %arg7[%c0_21, %c256], %44 {strides = array<i32>} : memref<2x768xf32, #tpu.memory_space<vmem>>, vector<2x128xf32>,
    %46 = vector.extract_strided_slice %21 {offsets = [0, 512], sizes = [2, 128], strides = [1, 1]} : vector<2x896xf32> to vector<2x128xf32>
    %47 = arith.addf %46, %36 : vector<2x128xf32>
    %c0_22 = arith.constant 0 : index
    %c384 = arith.constant 384 : index
    %48 = vector.load %arg7[%c0_22, %c384] : memref<2x768xf32, #tpu.memory_space<vmem>>, vector<2x128xf32>
    tpu.vector_store %arg7[%c0_22, %c384], %47 {strides = array<i32>} : memref<2x768xf32, #tpu.memory_space<vmem>>, vector<2x128xf32>,
    %49 = vector.extract_strided_slice %21 {offsets = [0, 640], sizes = [2, 128], strides = [1, 1]} : vector<2x896xf32> to vector<2x128xf32>
    %50 = arith.addf %49, %36 : vector<2x128xf32>
    %c0_23 = arith.constant 0 : index
    %c512 = arith.constant 512 : index
    %51 = vector.load %arg7[%c0_23, %c512] : memref<2x768xf32, #tpu.memory_space<vmem>>, vector<2x128xf32>
    tpu.vector_store %arg7[%c0_23, %c512], %50 {strides = array<i32>} : memref<2x768xf32, #tpu.memory_space<vmem>>, vector<2x128xf32>,
    %52 = vector.extract_strided_slice %21 {offsets = [0, 768], sizes = [2, 128], strides = [1, 1]} : vector<2x896xf32> to vector<2x128xf32>
    %53 = arith.addf %52, %36 : vector<2x128xf32>
    %c0_24 = arith.constant 0 : index
    %c640 = arith.constant 640 : index
    %54 = vector.load %arg7[%c0_24, %c640] : memref<2x768xf32, #tpu.memory_space<vmem>>, vector<2x128xf32>
    tpu.vector_store %arg7[%c0_24, %c640], %53 {strides = array<i32>} : memref<2x768xf32, #tpu.memory_space<vmem>>, vector<2x128xf32>,
    return
  }
}

</mosaic_0001>

<bundles_post_ra>
// kernel: forward.3
= control target key start
LH: loop header
LB: loop body
LE: loop exit
PB: predicated region body
PF: predicated region fallthrough
CT: control target
= control target key end

     0   :  { %s727_s12 = smov 0   ;;  %s809_s0 = inlined_call_operand.vmem [shape: bf16[128,256], index: 0, kind: input, shape index: {}]   ;;  %s810_s1 = inlined_call_operand.vmem [shape: bf16[256,128], index: 1, kind: input, shape index: {}]   ;;  %s811_s2 = inlined_call_operand.vmem [shape: f32[1,128], index: 2, kind: input, shape index: {}]   ;;  %s812_s3 = inlined_call_operand.vmem [shape: bf16[128,128], index: 3, kind: output, shape index: {}]  }
   0x1 LB: > { %s530_s13 = sadd.s32 4294967295, %s705_s12   ;;  %p534_p0 = scmp.ge.s32.totalorder %s705_s12, 1  ;;  %s705_s12 = sphi %s727_s12, %s13_s12  }
   0x2   : > { %p139_p1 = scmp.lt.s32.totalorder %s705_s12, 3 }
   0x4   : > { %p140_p2 = pnand %p534_p0, %p139_p1 }
   0x5   : > { %v671_v0 = vld [vmem:[%s810_s1 + $0x40] sm:$0xff] (!%p140_p2)   ;;  %s535_s16 = sshll.u32 (!%p140_p2), %s530_s13, 3  ;;  %v673_v2 = vld [vmem:[%s810_s1 + $0x48] sm:$0xff] (!%p140_p2)   ;;  %v675_v4 = vld [vmem:[%s810_s1 + $0x50] sm:$0xff] (!%p140_p2)  }
   0x6   : > { %143 = sbr.rel (%p140_p2) target bundleno = 271 (0x10f), region = 32  ;;  %v672_v1 = vld [vmem:[%s810_s1] sm:$0xff] (!%p140_p2)   ;;  %607 = vmatprep.subr.bf16.mxu0 (!%p140_p2), %v671_v0  ;;  %647 = vmatprep.subr.bf16.mxu1 (!%p140_p2), %v671_v0  ;;  %v674_v3 = vld [vmem:[%s810_s1 + $0x8] sm:$0xff] (!%p140_p2)   ;;  %p165_p3 = scmp.lt.s32.totalorder (!%p140_p2), %s535_s16, 15  ;;  %v676_v5 = vld [vmem:[%s810_s1 + $0x10] sm:$0xff] (!%p140_p2)  }
   0x7   : > { %608 = vmatpush3.bf16.msra.mxu0 (!%p140_p2), %v672_v1  ;;  %655 = vmatpush3.bf16.msra.mxu1 (!%p140_p2), %v672_v1  ;;  %v677_v6 = vld [vmem:[%s810_s1 + $0x58] sm:$0xff] (!%p140_p2)   ;;  %v679_v8 = vld [vmem:[%s810_s1 + $0x60] sm:$0xff] (!%p140_p2)   ;;  %v681_v10 = vld [vmem:[%s810_s1 + $0x68] sm:$0xff] (!%p140_p2)  }
   0x8   : > { %609 = vmatprep.subr.bf16.mxu0 (!%p140_p2), %v673_v2  ;;  %648 = vmatprep.subr.bf16.mxu1 (!%p140_p2), %v673_v2  ;;  %v678_v7 = vld [vmem:[%s810_s1 + $0x18] sm:$0xff] (!%p140_p2)   ;;  %v680_v9 = vld [vmem:[%s810_s1 + $0x20] sm:$0xff] (!%p140_p2)   ;;  %v682_v13 = vld [vmem:[%s810_s1 + $0x28] sm:$0xff] (!%p140_p2)  }
   0x9   : > { %v683_v14 = vld [vmem:[%s810_s1 + $0x70] sm:$0xff] (!%p140_p2)   ;;  %v685_v16 = vld [vmem:[%s810_s1 + $0x78] sm:$0xff] (!%p140_p2)   ;;  %v540_v26 = vld [vmem:[%s811_s2] ss:$0 sm:$0xff] (!%p140_p2) }
   0xa   : > { %v684_v15 = vld [vmem:[%s810_s1 + $0x30] sm:$0xff] (!%p140_p2)   ;;  %v686_v17 = vld [vmem:[%s810_s1 + $0x38] sm:$0xff] (!%p140_p2)  }
   0xb   : > { %610 = vmatpush3.bf16.msra.mxu0 (!%p140_p2), %v674_v3  ;;  %656 = vmatpush3.bf16.msra.mxu1 (!%p140_p2), %v674_v3 }
   0xc   : > { %611 = vmatprep.subr.bf16.mxu0 (!%p140_p2), %v675_v4  ;;  %649 = vmatprep.subr.bf16.mxu1 (!%p140_p2), %v675_v4 }
   0xd   : > { %s814_s16 = smov (!%p165_p3, %s535_s16), 15 }
   0xe   : > { %s575_s4 = sshll.u32 %s814_s16, 3  ;;  %s539_s28 = sshll.u32 %s814_s16, 2 }
   0xf   : > { %612 = vmatpush3.bf16.msra.mxu0 %v676_v5  ;;  %657 = vmatpush3.bf16.msra.mxu1 %v676_v5  ;;  %s768_s9 = scalar_lea.vmem %s809_s0, %s575_s4  ;;  %s175_s4 = scalar_lea.vmem %s812_s3, %s539_s28 }
  0x10   : > { %613 = vmatprep.subr.bf16.mxu0 %v677_v6  ;;  %650 = vmatprep.subr.bf16.mxu1 %v677_v6  ;;  %v689_v11 = vld [vmem:[%s768_s9 + $0x4] ss:$8 sps:$4 sm:$0xff]   ;;  %v687_v18 = vld [vmem:[%s768_s9] ss:$8 sps:$4 sm:$0xff]   ;;  %v693_v20 = vld [vmem:[%s768_s9 + $0x14] ss:$8 sps:$4 sm:$0xff]  }
  0x11   : > { %v692_v12 = vld [vmem:[%s768_s9 + $0x24] ss:$8 sps:$4 sm:$0xff]   ;;  %393 = vmatprep.mubr.bf16.mxu0 %v689_v11  ;;  %v690_v19 = vld [vmem:[%s768_s9 + $0x20] ss:$8 sps:$4 sm:$0xff]   ;;  %v695_v21 = vld [vmem:[%s768_s9 + $0x34] ss:$8 sps:$4 sm:$0xff]  }
  0x12   : > { %409 = vmatprep.mubr.bf16.mxu1 %v692_v12  ;;  %v697_v22 = vld [vmem:[%s768_s9 + $0x10] ss:$8 sps:$4 sm:$0xff]  }
  0x13   : > { %614 = vmatpush3.bf16.msra.mxu0 %v678_v7  ;;  %658 = vmatpush3.bf16.msra.mxu1 %v678_v7  ;;  %v698_v23 = vld [vmem:[%s768_s9 + $0x30] ss:$8 sps:$4 sm:$0xff]  }
  0x14   : > { %615 = vmatprep.subr.bf16.mxu0 %v679_v8  ;;  %651 = vmatprep.subr.bf16.mxu1 %v679_v8 }
  0x17   : > { %616 = vmatpush3.bf16.msra.mxu0 %v680_v9  ;;  %659 = vmatpush3.bf16.msra.mxu1 %v680_v9 }
  0x18   : > { %617 = vmatprep.subr.bf16.mxu0 %v681_v10  ;;  %652 = vmatprep.subr.bf16.mxu1 %v681_v10 }
  0x1b   : > { %618 = vmatpush3.bf16.msra.mxu0 %v682_v13  ;;  %660 = vmatpush3.bf16.msra.mxu1 %v682_v13 }
  0x1c   : > { %619 = vmatprep.subr.bf16.mxu0 %v683_v14  ;;  %653 = vmatprep.subr.bf16.mxu1 %v683_v14 }
  0x1f   : > { %620 = vmatpush3.bf16.msra.mxu0 %v684_v15  ;;  %661 = vmatpush3.bf16.msra.mxu1 %v684_v15 }
  0x20   : > { %621 = vmatprep.subr.bf16.mxu0 %v685_v16  ;;  %654 = vmatprep.subr.bf16.mxu1 %v685_v16 }
  0x23   : > { %622 = vmatpush3.bf16.msra.mxu0 %v686_v17  ;;  %662 = vmatpush3.bf16.msra.mxu1 %v686_v17 }
  0x26   : > { %394 = vmatmul.mubr.bf16.vlgmr.msra.gmra.mrb[0].mxu0 %v687_v18  ;;  %410 = vmatmul.mubr.bf16.vlgmr.msra.gmra.mrb[0].mxu1 %v690_v19 }
  0x27   : > { %401 = vmatprep.mubr.bf16.mxu0 %v693_v20  ;;  %417 = vmatprep.mubr.bf16.mxu1 %v695_v21 }
  0x2e   : > { %402 = vmatmul.mubr.bf16.gmra.mrb[4].mxu0 %v697_v22  ;;  %418 = vmatmul.mubr.bf16.gmra.mrb[4].mxu1 %v698_v23 }
  0xf9   : > { %v623_v24 = vpop.f32.mrb[0].mxu0  ;;  %v635_v25 = vpop.f32.mrb[0].mxu1 }
  0xfa   : > { %v624_v27 = vpop.f32.mrb[1].mxu0  ;;  %v636_v28 = vpop.f32.mrb[1].mxu1 }
  0xfb   : > { %v625_v29 = vadd.f32 %v624_v27, %v623_v24  ;;  %v637_v30 = vadd.f32 %v636_v28, %v635_v25  ;;  %v626_v31 = vpop.f32.mrb[2].mxu0  ;;  %v638_v32 = vpop.f32.mrb[2].mxu1 }
  0xfc   : > { %v627_v33 = vpop.f32.mrb[3].mxu0  ;;  %v639_v34 = vpop.f32.mrb[3].mxu1 }
  0xfd   : > { %v396_v35 = vadd.f32 %v625_v29, %v540_v26  ;;  %v412_v36 = vadd.f32 %v637_v30, %v540_v26  ;;  %v628_v37 = vadd.f32 %v627_v33, %v626_v31  ;;  %v640_v38 = vadd.f32 %v639_v34, %v638_v32 }
  0xff   : > { %v399_v39 = vadd.f32 %v628_v37, %v540_v26  ;;  %v415_v40 = vadd.f32 %v640_v38, %v540_v26  ;;  %v426_v41 = vmax.f32 %v396_v35, 0.0  ;;  %v430_v42 = vmax.f32 %v412_v36, 0.0 }
 0x101   : > { %v427_v43 = vmax.f32 %v399_v39, 0.0  ;;  %v431_v44 = vmax.f32 %v415_v40, 0.0  ;;  %v629_v45 = vpop.f32.mrb[4].mxu0  ;;  %v641_v46 = vpop.f32.mrb[4].mxu1 }
 0x102   : > { %v630_v47 = vpop.f32.mrb[5].mxu0  ;;  %v642_v48 = vpop.f32.mrb[5].mxu1 }
 0x103   : > { %v587_v49 = vpack.c.bf16 %v427_v43, %v426_v41  ;;  %v597_v50 = vpack.c.bf16 %v431_v44, %v430_v42  ;;  %v631_v51 = vadd.f32 %v630_v47, %v629_v45  ;;  %v643_v52 = vadd.f32 %v642_v48, %v641_v46  ;;  %v632_v53 = vpop.f32.mrb[6].mxu0  ;;  %v644_v54 = vpop.f32.mrb[6].mxu1 }
 0x104   : > { %v633_v55 = vpop.f32.mrb[7].mxu0  ;;  %v645_v56 = vpop.f32.mrb[7].mxu1 }
 0x105   : > { %588 = vst [vmem:[%s175_s4] sm:$0xff] %v587_v49   ;;  %605 = vst [vmem:[%s175_s4 + $0x10] sm:$0xff] %v597_v50   ;;  %v404_v57 = vadd.f32 %v631_v51, %v540_v26  ;;  %v420_v58 = vadd.f32 %v643_v52, %v540_v26  ;;  %v634_v59 = vadd.f32 %v633_v55, %v632_v53 }
 0x106   : > { %v646_v60 = vadd.f32 %v645_v56, %v644_v54 }
 0x107   : > { %v407_v61 = vadd.f32 %v634_v59, %v540_v26  ;;  %v428_v63 = vmax.f32 %v404_v57, 0.0  ;;  %v432_v0 = vmax.f32 %v420_v58, 0.0 }
 0x108   : > { %v423_v62 = vadd.f32 %v646_v60, %v540_v26 }
 0x109   : > { %v429_v1 = vmax.f32 %v407_v61, 0.0 }
 0x10a   : > { %v433_v2 = vmax.f32 %v423_v62, 0.0 }
 0x10b   : > { %v592_v3 = vpack.c.bf16 %v429_v1, %v428_v63 }
 0x10c   : > { %v602_v4 = vpack.c.bf16 %v433_v2, %v432_v0 }
 0x10d   : > { %604 = vst [vmem:[%s175_s4 + $0x8] sm:$0xff] %v592_v3  }
 0x10e   : > { %606 = vst [vmem:[%s175_s4 + $0x18] sm:$0xff] %v602_v4  }
 0x10f PF: > { %s13_s12 = sadd.s32 1, %s705_s12  }
 0x110   : > { %p10_p4 = scmp.ge.s32.totalorder %s13_s12, 4  }
 0x112   :  { %12 = sbr.rel (!%p10_p4) target bundleno = 1 (0x1), region = 62 }

// kernel: forward.4
= control target key start
LH: loop header
LB: loop body
LE: loop exit
PB: predicated region body
PF: predicated region fallthrough
CT: control target
= control target key end

     0   :  { %s2638_s1 = inlined_call_operand.vmem [shape: bf16[2048,128], index: 1, kind: input, shape index: {}]   ;;  %s2639_s0 = inlined_call_operand.vmem [shape: bf16[18,2048], index: 0, kind: input, shape index: {}]   ;;  %s2640_s2 = inlined_call_operand.vmem [shape: f32[1,128], index: 2, kind: input, shape index: {}]   ;;  %s2641_s3 = inlined_call_operand.vmem [shape: bf16[18,128], index: 3, kind: output, shape index: {}]  }
   0x1   :  { %v2009_v0 = vld [vmem:[%s2638_s1 + $0x40] sm:$0xff]   ;;  %v2013_v4 = vld [vmem:[%s2638_s1 + $0x48] sm:$0xff]   ;;  %v2017_v8 = vld [vmem:[%s2638_s1 + $0x50] sm:$0xff]  }
   0x2   :  { %v2010_v1 = vld [vmem:[%s2638_s1 + $0xc0] sm:$0xff]   ;;  %1785 = vmatprep.subr.bf16.mxu0 %v2009_v0  ;;  %v2014_v5 = vld [vmem:[%s2638_s1 + $0xc8] sm:$0xff]   ;;  %v2018_v9 = vld [vmem:[%s2638_s1 + $0xd0] sm:$0xff]  }
   0x3   :  { %v2011_v2 = vld [vmem:[%s2638_s1] sm:$0xff]   ;;  %1813 = vmatprep.subr.bf16.mxu1 %v2010_v1  ;;  %v2015_v6 = vld [vmem:[%s2638_s1 + $0x8] sm:$0xff]   ;;  %v2019_v10 = vld [vmem:[%s2638_s1 + $0x10] sm:$0xff]  }
   0x4   :  { %v2012_v3 = vld [vmem:[%s2638_s1 + $0x80] sm:$0xff]   ;;  %1786 = vmatpush3.bf16.msra.mxu0 %v2011_v2  ;;  %v2016_v7 = vld [vmem:[%s2638_s1 + $0x88] sm:$0xff]   ;;  %v2020_v11 = vld [vmem:[%s2638_s1 + $0x90] sm:$0xff]  }
   0x5   :  { %1814 = vmatpush3.bf16.msra.mxu1 %v2012_v3  ;;  %1787 = vmatprep.subr.bf16.mxu0 %v2013_v4  ;;  %v2021_v12 = vld [vmem:[%s2638_s1 + $0x58] sm:$0xff]   ;;  %v2025_v16 = vld [vmem:[%s2638_s1 + $0x60] sm:$0xff]   ;;  %v2029_v20 = vld [vmem:[%s2638_s1 + $0x68] sm:$0xff]  }
   0x6   :  { %1815 = vmatprep.subr.bf16.mxu1 %v2014_v5  ;;  %v2022_v13 = vld [vmem:[%s2638_s1 + $0xd8] sm:$0xff]   ;;  %v2026_v17 = vld [vmem:[%s2638_s1 + $0xe0] sm:$0xff]   ;;  %v2030_v21 = vld [vmem:[%s2638_s1 + $0xe8] sm:$0xff]  }
   0x7   :  { %v2023_v14 = vld [vmem:[%s2638_s1 + $0x18] sm:$0xff]   ;;  %v2027_v18 = vld [vmem:[%s2638_s1 + $0x20] sm:$0xff]   ;;  %v2031_v22 = vld [vmem:[%s2638_s1 + $0x28] sm:$0xff]  }
   0x8   :  { %1788 = vmatpush3.bf16.msra.mxu0 %v2015_v6  ;;  %v2024_v15 = vld [vmem:[%s2638_s1 + $0x98] sm:$0xff]   ;;  %v2028_v19 = vld [vmem:[%s2638_s1 + $0xa0] sm:$0xff]   ;;  %v2032_v23 = vld [vmem:[%s2638_s1 + $0xa8] sm:$0xff]  }
   0x9   :  { %1816 = vmatpush3.bf16.msra.mxu1 %v2016_v7  ;;  %1789 = vmatprep.subr.bf16.mxu0 %v2017_v8  ;;  %v2033_v24 = vld [vmem:[%s2638_s1 + $0x70] sm:$0xff]   ;;  %v2037_v28 = vld [vmem:[%s2638_s1 + $0x78] sm:$0xff]   ;;  %v15_v32 = vld [vmem:[%s2639_s0] sm:$0xff] }
   0xa   :  { %1817 = vmatprep.subr.bf16.mxu1 %v2018_v9  ;;  %v2034_v25 = vld [vmem:[%s2638_s1 + $0xf0] sm:$0xff]   ;;  %v2038_v29 = vld [vmem:[%s2638_s1 + $0xf8] sm:$0xff]   ;;  %v23_v33 = vld [vmem:[%s2639_s0 + $0x40] sm:$0xff] }
   0xb   :  { %v2035_v26 = vld [vmem:[%s2638_s1 + $0x30] sm:$0xff]   ;;  %v2039_v30 = vld [vmem:[%s2638_s1 + $0x38] sm:$0xff]   ;;  %v16_v34 = vld [vmem:[%s2639_s0 + $0x8] sm:$0xff]  ;;  %v1614_v35 = vcombine.low %v15_v32, %v23_v33  ;;  %v1615_v36 = vcombine.high %v15_v32, %v23_v33 }
   0xc   :  { %1790 = vmatpush3.bf16.msra.mxu0 %v2019_v10  ;;  %v2036_v27 = vld [vmem:[%s2638_s1 + $0xb0] sm:$0xff]   ;;  %v2040_v31 = vld [vmem:[%s2638_s1 + $0xb8] sm:$0xff]   ;;  %v24_v37 = vld [vmem:[%s2639_s0 + $0x48] sm:$0xff] }
   0xd   :  { %1818 = vmatpush3.bf16.msra.mxu1 %v2020_v11  ;;  %1791 = vmatprep.subr.bf16.mxu0 %v2021_v12  ;;  %v1616_v38 = vcombine.low %v16_v34, %v24_v37  ;;  %v1617_v39 = vcombine.high %v16_v34, %v24_v37  ;;  %v2041_v40 = vld [vmem:[%s2638_s1 + $0x140] sm:$0xff]   ;;  %v2045_v44 = vld [vmem:[%s2638_s1 + $0x148] sm:$0xff]   ;;  %v2049_v48 = vld [vmem:[%s2638_s1 + $0x150] sm:$0xff]  }
   0xe   :  { %1819 = vmatprep.subr.bf16.mxu1 %v2022_v13  ;;  %1238 = vmatprep.mubr.bf16.mxu0 %v1615_v36  ;;  %v2042_v41 = vld [vmem:[%s2638_s1 + $0x1c0] sm:$0xff]   ;;  %v2046_v45 = vld [vmem:[%s2638_s1 + $0x1c8] sm:$0xff]   ;;  %v2050_v49 = vld [vmem:[%s2638_s1 + $0x1d0] sm:$0xff]  }
   0xf   :  { %1286 = vmatprep.mubr.bf16.mxu1 %v1617_v39  ;;  %v2043_v42 = vld [vmem:[%s2638_s1 + $0x100] sm:$0xff]   ;;  %v2047_v46 = vld [vmem:[%s2638_s1 + $0x108] sm:$0xff]   ;;  %v2051_v50 = vld [vmem:[%s2638_s1 + $0x110] sm:$0xff]  }
  0x10   :  { %1792 = vmatpush3.bf16.msra.mxu0 %v2023_v14  ;;  %v2044_v43 = vld [vmem:[%s2638_s1 + $0x180] sm:$0xff]   ;;  %v2048_v47 = vld [vmem:[%s2638_s1 + $0x188] sm:$0xff]   ;;  %v2052_v51 = vld [vmem:[%s2638_s1 + $0x190] sm:$0xff]  }
  0x11   :  { %1820 = vmatpush3.bf16.msra.mxu1 %v2024_v15  ;;  %1793 = vmatprep.subr.bf16.mxu0 %v2025_v16  ;;  %v2053_v52 = vld [vmem:[%s2638_s1 + $0x158] sm:$0xff]   ;;  %v2057_v56 = vld [vmem:[%s2638_s1 + $0x160] sm:$0xff]   ;;  %v2061_v60 = vld [vmem:[%s2638_s1 + $0x168] sm:$0xff]  }
  0x12   :  { %1821 = vmatprep.subr.bf16.mxu1 %v2026_v17  ;;  %v2054_v53 = vld [vmem:[%s2638_s1 + $0x1d8] sm:$0xff]   ;;  %v2058_v57 = vld [vmem:[%s2638_s1 + $0x1e0] sm:$0xff]   ;;  %v2062_v61 = vld [vmem:[%s2638_s1 + $0x1e8] sm:$0xff]  }
  0x13   :  { %v2055_v54 = vld [vmem:[%s2638_s1 + $0x118] sm:$0xff]   ;;  %v2059_v58 = vld [vmem:[%s2638_s1 + $0x120] sm:$0xff]   ;;  %v2064_v0 = vld [vmem:[%s2638_s1 + $0x128] sm:$0xff]  }
  0x14   :  { %1794 = vmatpush3.bf16.msra.mxu0 %v2027_v18  ;;  %v2056_v55 = vld [vmem:[%s2638_s1 + $0x198] sm:$0xff]   ;;  %v2060_v59 = vld [vmem:[%s2638_s1 + $0x1a0] sm:$0xff]   ;;  %v2065_v2 = vld [vmem:[%s2638_s1 + $0x1a8] sm:$0xff]  }
  0x15   :  { %1822 = vmatpush3.bf16.msra.mxu1 %v2028_v19  ;;  %1795 = vmatprep.subr.bf16.mxu0 %v2029_v20  ;;  %v31_v62 = vld [vmem:[%s2639_s0 + $0x80] sm:$0x11]  ;;  %v32_v3 = vld [vmem:[%s2639_s0 + $0x88] sm:$0x11]  ;;  %v2069_v6 = vld [vmem:[%s2638_s1 + $0x170] sm:$0xff]  }
  0x16   :  { %1823 = vmatprep.subr.bf16.mxu1 %v2030_v21  ;;  %v1631_v63 = vcombine.high %v31_v62, %v31_v62  ;;  %v1630_v1 = vcombine.low %v31_v62, %v31_v62  ;;  %v1633_v4 = vcombine.high %v32_v3, %v32_v3  ;;  %v1632_v5 = vcombine.low %v32_v3, %v32_v3  ;;  %v2070_v7 = vld [vmem:[%s2638_s1 + $0x1f0] sm:$0xff]   ;;  %v2073_v10 = vld [vmem:[%s2638_s1 + $0x178] sm:$0xff]   ;;  %v20_v62 = vld [vmem:[%s2639_s0 + $0x28] sm:$0xff] }
  0x17   :  { %v2071_v8 = vld [vmem:[%s2638_s1 + $0x130] sm:$0xff]   ;;  %v2074_v11 = vld [vmem:[%s2638_s1 + $0x1f8] sm:$0xff]  }
  0x18   :  { %1796 = vmatpush3.bf16.msra.mxu0 %v2031_v22  ;;  %v2072_v9 = vld [vmem:[%s2638_s1 + $0x1b0] sm:$0xff]   ;;  %v2075_v12 = vld [vmem:[%s2638_s1 + $0x138] sm:$0xff]   ;;  %v2077_v22 = vld [vmem:[%s2638_s1 + $0x240] sm:$0xff]  }
  0x19   :  { %1824 = vmatpush3.bf16.msra.mxu1 %v2032_v23  ;;  %1797 = vmatprep.subr.bf16.mxu0 %v2033_v24  ;;  %v2076_v13 = vld [vmem:[%s2638_s1 + $0x1b8] sm:$0xff]   ;;  %v17_v14 = vld [vmem:[%s2639_s0 + $0x10] sm:$0xff]  ;;  %v2078_v23 = vld [vmem:[%s2638_s1 + $0x2c0] sm:$0xff]  }
  0x1a   :  { %1825 = vmatprep.subr.bf16.mxu1 %v2034_v25  ;;  %v25_v15 = vld [vmem:[%s2639_s0 + $0x50] sm:$0xff]  ;;  %v18_v16 = vld [vmem:[%s2639_s0 + $0x18] sm:$0xff]  ;;  %v2079_v24 = vld [vmem:[%s2638_s1 + $0x200] sm:$0xff]  }
  0x1b   :  { %v1618_v17 = vcombine.low %v17_v14, %v25_v15  ;;  %v1619_v18 = vcombine.high %v17_v14, %v25_v15  ;;  %v26_v19 = vld [vmem:[%s2639_s0 + $0x58] sm:$0xff]  ;;  %v2080_v25 = vld [vmem:[%s2638_s1 + $0x280] sm:$0xff]   ;;  %v2087_v33 = vld [vmem:[%s2638_s1 + $0x250] sm:$0xff]  }
  0x1c   :  { %1798 = vmatpush3.bf16.msra.mxu0 %v2035_v26  ;;  %v1620_v20 = vcombine.low %v18_v16, %v26_v19  ;;  %v1621_v21 = vcombine.high %v18_v16, %v26_v19  ;;  %v2081_v26 = vld [vmem:[%s2638_s1 + $0x248] sm:$0xff]   ;;  %v2088_v34 = vld [vmem:[%s2638_s1 + $0x2d0] sm:$0xff]  }
  0x1d   :  { %1826 = vmatpush3.bf16.msra.mxu1 %v2036_v27  ;;  %1799 = vmatprep.subr.bf16.mxu0 %v2037_v28  ;;  %v2082_v27 = vld [vmem:[%s2638_s1 + $0x2c8] sm:$0xff]   ;;  %v2090_v37 = vld [vmem:[%s2638_s1 + $0x210] sm:$0xff]  }
  0x1e   :  { %1827 = vmatprep.subr.bf16.mxu1 %v2038_v29  ;;  %v2083_v28 = vld [vmem:[%s2638_s1 + $0x208] sm:$0xff]   ;;  %v2091_v39 = vld [vmem:[%s2638_s1 + $0x290] sm:$0xff]  }
  0x1f   :  { %v2084_v29 = vld [vmem:[%s2638_s1 + $0x288] sm:$0xff]   ;;  %v2123_v15 = vld [vmem:[%s2638_s1 + $0x350] sm:$0xff]  }
  0x20   :  { %1800 = vmatpush3.bf16.msra.mxu0 %v2039_v30  ;;  %v33_v30 = vld [vmem:[%s2639_s0 + $0x90] sm:$0x11] }
  0x21   :  { %1828 = vmatpush3.bf16.msra.mxu1 %v2040_v31  ;;  %1841 = vmatprep.subr.bf16.mxu0 %v2041_v40  ;;  %v1635_v31 = vcombine.high %v33_v30, %v33_v30  ;;  %v1634_v32 = vcombine.low %v33_v30, %v33_v30  ;;  %v2093_v40 = vld [vmem:[%s2638_s1 + $0x258] sm:$0xff]   ;;  %v2124_v16 = vld [vmem:[%s2638_s1 + $0x3d0] sm:$0xff]   ;;  %v2137_v30 = vld [vmem:[%s2638_s1 + $0x368] sm:$0xff]  }
  0x22   :  { %1869 = vmatprep.subr.bf16.mxu1 %v2042_v41  ;;  %v2094_v41 = vld [vmem:[%s2638_s1 + $0x2d8] sm:$0xff]   ;;  %v2126_v19 = vld [vmem:[%s2638_s1 + $0x310] sm:$0xff]  }
  0x23   :  { %1239 = vmatmul.mubr.bf16.vlgmr.msra.gmra.mrb[0].mxu0 %v1614_v35  ;;  %v34_v35 = vld [vmem:[%s2639_s0 + $0x98] sm:$0x11] }
  0x24   :  { %1287 = vmatmul.mubr.bf16.vlgmr.msra.gmra.mrb[0].mxu1 %v1616_v38  ;;  %1842 = vmatpush3.bf16.msra.mxu0 %v2043_v42  ;;  %v1637_v36 = vcombine.high %v34_v35, %v34_v35  ;;  %v1636_v38 = vcombine.low %v34_v35, %v34_v35  ;;  %v2095_v42 = vld [vmem:[%s2638_s1 + $0x218] sm:$0xff]   ;;  %v2142_v35 = vld [vmem:[%s2638_s1 + $0x3f0] sm:$0xff]  }
  0x25   :  { %1870 = vmatpush3.bf16.msra.mxu1 %v2044_v43  ;;  %1843 = vmatprep.subr.bf16.mxu0 %v2045_v44  ;;  %v2096_v43 = vld [vmem:[%s2638_s1 + $0x298] sm:$0xff]   ;;  %v2097_v44 = vld [vmem:[%s2638_s1 + $0x260] sm:$0xff]  }
  0x26   :  { %1871 = vmatprep.subr.bf16.mxu1 %v2046_v45  ;;  %1246 = vmatprep.mubr.bf16.mxu0 %v1631_v63  ;;  %v2098_v45 = vld [vmem:[%s2638_s1 + $0x2e0] sm:$0xff]  }
  0x27   :  { %1294 = vmatprep.mubr.bf16.mxu1 %v1633_v4  ;;  %v2113_v4 = vld [vmem:[%s2638_s1 + $0x340] sm:$0xff]  }
  0x28   :  { %1844 = vmatpush3.bf16.msra.mxu0 %v2047_v46  ;;  %v2099_v46 = vld [vmem:[%s2638_s1 + $0x220] sm:$0xff]  }
  0x29   :  { %1872 = vmatpush3.bf16.msra.mxu1 %v2048_v47  ;;  %1845 = vmatprep.subr.bf16.mxu0 %v2049_v48  ;;  %v2100_v47 = vld [vmem:[%s2638_s1 + $0x2a0] sm:$0xff]   ;;  %v2101_v48 = vld [vmem:[%s2638_s1 + $0x268] sm:$0xff]  }
  0x2a   :  { %1873 = vmatprep.subr.bf16.mxu1 %v2050_v49  ;;  %v2102_v49 = vld [vmem:[%s2638_s1 + $0x2e8] sm:$0xff]  }
  0x2b   :  { %1247 = vmatmul.mubr.bf16.gmra.mrb[4].mxu0 %v1630_v1  ;;  %v28_v1 = vld [vmem:[%s2639_s0 + $0x68] sm:$0xff] }
  0x2c   :  { %1846 = vmatpush3.bf16.msra.mxu0 %v2051_v50  ;;  %1295 = vmatmul.mubr.bf16.gmra.mrb[4].mxu1 %v1632_v5  ;;  %v2103_v50 = vld [vmem:[%s2638_s1 + $0x228] sm:$0xff]   ;;  %v1625_v3 = vcombine.high %v20_v62, %v28_v1  ;;  %v2114_v5 = vld [vmem:[%s2638_s1 + $0x3c0] sm:$0xff]  }
  0x2d   :  { %1874 = vmatpush3.bf16.msra.mxu1 %v2052_v51  ;;  %1847 = vmatprep.subr.bf16.mxu0 %v2053_v52  ;;  %v2104_v51 = vld [vmem:[%s2638_s1 + $0x2a8] sm:$0xff]   ;;  %v2105_v52 = vld [vmem:[%s2638_s1 + $0x270] sm:$0xff]  }
  0x2e   :  { %1875 = vmatprep.subr.bf16.mxu1 %v2054_v53  ;;  %1334 = vmatprep.mubr.bf16.mxu0 %v1619_v18  ;;  %v2106_v53 = vld [vmem:[%s2638_s1 + $0x2f0] sm:$0xff]  }
  0x2f   :  { %1382 = vmatprep.mubr.bf16.mxu1 %v1621_v21  ;;  %v2127_v21 = vld [vmem:[%s2638_s1 + $0x390] sm:$0xff]  }
  0x30   :  { %1848 = vmatpush3.bf16.msra.mxu0 %v2055_v54  ;;  %v2107_v54 = vld [vmem:[%s2638_s1 + $0x230] sm:$0xff]  }
  0x31   :  { %1876 = vmatpush3.bf16.msra.mxu1 %v2056_v55  ;;  %1849 = vmatprep.subr.bf16.mxu0 %v2057_v56  ;;  %v2108_v55 = vld [vmem:[%s2638_s1 + $0x2b0] sm:$0xff]   ;;  %v2109_v56 = vld [vmem:[%s2638_s1 + $0x278] sm:$0xff]  }
  0x32   :  { %1877 = vmatprep.subr.bf16.mxu1 %v2058_v57  ;;  %v2110_v57 = vld [vmem:[%s2638_s1 + $0x2f8] sm:$0xff]  }
  0x34   :  { %1850 = vmatpush3.bf16.msra.mxu0 %v2059_v58  ;;  %v2111_v58 = vld [vmem:[%s2638_s1 + $0x238] sm:$0xff]  }
  0x35   :  { %1878 = vmatpush3.bf16.msra.mxu1 %v2060_v59  ;;  %1851 = vmatprep.subr.bf16.mxu0 %v2061_v60  ;;  %v2112_v59 = vld [vmem:[%s2638_s1 + $0x2b8] sm:$0xff]   ;;  %v19_v60 = vld [vmem:[%s2639_s0 + $0x20] sm:$0xff] }
  0x36   :  { %1879 = vmatprep.subr.bf16.mxu1 %v2062_v61  ;;  %v27_v61 = vld [vmem:[%s2639_s0 + $0x60] sm:$0xff] }
  0x37   :  { %v1622_v63 = vcombine.low %v19_v60, %v27_v61 }
  0x38   :  { %1852 = vmatpush3.bf16.msra.mxu0 %v2064_v0  ;;  %v1623_v0 = vcombine.high %v19_v60, %v27_v61 }
  0x39   :  { %1880 = vmatpush3.bf16.msra.mxu1 %v2065_v2  ;;  %1853 = vmatprep.subr.bf16.mxu0 %v2069_v6  ;;  %v1624_v2 = vcombine.low %v20_v62, %v28_v1  ;;  %v2115_v6 = vld [vmem:[%s2638_s1 + $0x300] sm:$0xff]  }
  0x3a   :  { %1881 = vmatprep.subr.bf16.mxu1 %v2070_v7  ;;  %v2116_v7 = vld [vmem:[%s2638_s1 + $0x380] sm:$0xff]  }
  0x3c   :  { %1854 = vmatpush3.bf16.msra.mxu0 %v2071_v8  ;;  %v2117_v8 = vld [vmem:[%s2638_s1 + $0x348] sm:$0xff]  }
  0x3d   :  { %1882 = vmatpush3.bf16.msra.mxu1 %v2072_v9  ;;  %1855 = vmatprep.subr.bf16.mxu0 %v2073_v10  ;;  %v2118_v9 = vld [vmem:[%s2638_s1 + $0x3c8] sm:$0xff]  }
  0x3e   :  { %1883 = vmatprep.subr.bf16.mxu1 %v2074_v11  ;;  %v2119_v10 = vld [vmem:[%s2638_s1 + $0x308] sm:$0xff]  }
  0x3f   :  { %v2120_v11 = vld [vmem:[%s2638_s1 + $0x388] sm:$0xff]  }
  0x40   :  { %1856 = vmatpush3.bf16.msra.mxu0 %v2075_v12  ;;  %v35_v12 = vld [vmem:[%s2639_s0 + $0xa0] sm:$0x11] }
  0x41   :  { %1884 = vmatpush3.bf16.msra.mxu1 %v2076_v13  ;;  %1897 = vmatprep.subr.bf16.mxu0 %v2077_v22  ;;  %v1639_v13 = vcombine.high %v35_v12, %v35_v12  ;;  %v1638_v14 = vcombine.low %v35_v12, %v35_v12  ;;  %v2129_v22 = vld [vmem:[%s2638_s1 + $0x358] sm:$0xff]  }
  0x42   :  { %1925 = vmatprep.subr.bf16.mxu1 %v2078_v23  ;;  %v2130_v23 = vld [vmem:[%s2638_s1 + $0x3d8] sm:$0xff]  }
  0x43   :  { %1335 = vmatmul.mubr.bf16.vlgmr.msra.gmra.mrb[8].mxu0 %v1618_v17  ;;  %v36_v17 = vld [vmem:[%s2639_s0 + $0xa8] sm:$0x11] }
  0x44   :  { %1383 = vmatmul.mubr.bf16.vlgmr.msra.gmra.mrb[8].mxu1 %v1620_v20  ;;  %1898 = vmatpush3.bf16.msra.mxu0 %v2079_v24  ;;  %v1641_v18 = vcombine.high %v36_v17, %v36_v17  ;;  %v1640_v20 = vcombine.low %v36_v17, %v36_v17  ;;  %v2131_v24 = vld [vmem:[%s2638_s1 + $0x318] sm:$0xff]  }
  0x45   :  { %1926 = vmatpush3.bf16.msra.mxu1 %v2080_v25  ;;  %1899 = vmatprep.subr.bf16.mxu0 %v2081_v26  ;;  %v2132_v25 = vld [vmem:[%s2638_s1 + $0x398] sm:$0xff]   ;;  %v2133_v26 = vld [vmem:[%s2638_s1 + $0x360] sm:$0xff]  }
  0x46   :  { %1927 = vmatprep.subr.bf16.mxu1 %v2082_v27  ;;  %1342 = vmatprep.mubr.bf16.mxu0 %v1635_v31  ;;  %v2134_v27 = vld [vmem:[%s2638_s1 + $0x3e0] sm:$0xff]   ;;  %v2138_v31 = vld [vmem:[%s2638_s1 + $0x3e8] sm:$0xff]  }
  0x47   :  { %1390 = vmatprep.mubr.bf16.mxu1 %v1637_v36  ;;  %v2143_v36 = vld [vmem:[%s2638_s1 + $0x330] sm:$0xff]  }
  0x48   :  { %1900 = vmatpush3.bf16.msra.mxu0 %v2083_v28  ;;  %v2135_v28 = vld [vmem:[%s2638_s1 + $0x320] sm:$0xff]  }
  0x49   :  { %1928 = vmatpush3.bf16.msra.mxu1 %v2084_v29  ;;  %1901 = vmatprep.subr.bf16.mxu0 %v2087_v33  ;;  %v2136_v29 = vld [vmem:[%s2638_s1 + $0x3a0] sm:$0xff]   ;;  %v2140_v33 = vld [vmem:[%s2638_s1 + $0x3a8] sm:$0xff]  }
  0x4a   :  { %1929 = vmatprep.subr.bf16.mxu1 %v2088_v34  ;;  %v2141_v34 = vld [vmem:[%s2638_s1 + $0x370] sm:$0xff]  }
  0x4b   :  { %1343 = vmatmul.mubr.bf16.gmra.mrb[12].mxu0 %v1634_v32  ;;  %v2139_v32 = vld [vmem:[%s2638_s1 + $0x328] sm:$0xff]  }
  0x4c   :  { %1902 = vmatpush3.bf16.msra.mxu0 %v2090_v37  ;;  %1391 = vmatmul.mubr.bf16.gmra.mrb[12].mxu1 %v1636_v38  ;;  %v2144_v37 = vld [vmem:[%s2638_s1 + $0x3b0] sm:$0xff]   ;;  %v2145_v38 = vld [vmem:[%s2638_s1 + $0x378] sm:$0xff]  }
  0x4d   :  { %1930 = vmatpush3.bf16.msra.mxu1 %v2091_v39  ;;  %1903 = vmatprep.subr.bf16.mxu0 %v2093_v40  ;;  %v2146_v39 = vld [vmem:[%s2638_s1 + $0x3f8] sm:$0xff]  }
  0x4e   :  { %1931 = vmatprep.subr.bf16.mxu1 %v2094_v41  ;;  %1430 = vmatprep.mubr.bf16.mxu0 %v1623_v0  ;;  %v2147_v40 = vld [vmem:[%s2638_s1 + $0x338] sm:$0xff]  }
  0x4f   :  { %1478 = vmatprep.mubr.bf16.mxu1 %v1625_v3  ;;  %v2148_v41 = vld [vmem:[%s2638_s1 + $0x3b8] sm:$0xff]  }
  0x50   :  { %1904 = vmatpush3.bf16.msra.mxu0 %v2095_v42  ;;  %v21_v42 = vld [vmem:[%s2639_s0 + $0x30] sm:$0xff] }
  0x51   :  { %1932 = vmatpush3.bf16.msra.mxu1 %v2096_v43  ;;  %1905 = vmatprep.subr.bf16.mxu0 %v2097_v44  ;;  %v29_v43 = vld [vmem:[%s2639_s0 + $0x70] sm:$0xff]  ;;  %v22_v44 = vld [vmem:[%s2639_s0 + $0x38] sm:$0xff] }
  0x52   :  { %1933 = vmatprep.subr.bf16.mxu1 %v2098_v45  ;;  %v1626_v45 = vcombine.low %v21_v42, %v29_v43 }
  0x54   :  { %1906 = vmatpush3.bf16.msra.mxu0 %v2099_v46  ;;  %v1627_v46 = vcombine.high %v21_v42, %v29_v43 }
  0x55   :  { %1934 = vmatpush3.bf16.msra.mxu1 %v2100_v47  ;;  %1907 = vmatprep.subr.bf16.mxu0 %v2101_v48  ;;  %v30_v47 = vld [vmem:[%s2639_s0 + $0x78] sm:$0xff]  ;;  %v37_v48 = vld [vmem:[%s2639_s0 + $0xb0] sm:$0x11] }
  0x56   :  { %1935 = vmatprep.subr.bf16.mxu1 %v2102_v49  ;;  %v38_v49 = vld [vmem:[%s2639_s0 + $0xb8] sm:$0x11] }
  0x58   :  { %1908 = vmatpush3.bf16.msra.mxu0 %v2103_v50  ;;  %v1628_v50 = vcombine.low %v22_v44, %v30_v47 }
  0x59   :  { %1936 = vmatpush3.bf16.msra.mxu1 %v2104_v51  ;;  %1909 = vmatprep.subr.bf16.mxu0 %v2105_v52  ;;  %v1629_v51 = vcombine.high %v22_v44, %v30_v47  ;;  %v1643_v52 = vcombine.high %v37_v48, %v37_v48 }
  0x5a   :  { %1937 = vmatprep.subr.bf16.mxu1 %v2106_v53  ;;  %v1645_v53 = vcombine.high %v38_v49, %v38_v49 }
  0x5c   :  { %1910 = vmatpush3.bf16.msra.mxu0 %v2107_v54  ;;  %v1642_v54 = vcombine.low %v37_v48, %v37_v48 }
  0x5d   :  { %1938 = vmatpush3.bf16.msra.mxu1 %v2108_v55  ;;  %1911 = vmatprep.subr.bf16.mxu0 %v2109_v56  ;;  %v1644_v55 = vcombine.low %v38_v49, %v38_v49 }
  0x5e   :  { %1939 = vmatprep.subr.bf16.mxu1 %v2110_v57 }
  0x60   :  { %1912 = vmatpush3.bf16.msra.mxu0 %v2111_v58  ;;  %v1613_v58 = vld [vmem:[%s2640_s2] ss:$0 sm:$0xff] }
  0x61   :  { %1940 = vmatpush3.bf16.msra.mxu1 %v2112_v59  ;;  %1953 = vmatprep.subr.bf16.mxu0 %v2113_v4 }
  0x62   :  { %1981 = vmatprep.subr.bf16.mxu1 %v2114_v5 }
  0x63   :  { %1431 = vmatmul.mubr.bf16.vlgmr.msra.gmra.mrb[16].mxu0 %v1622_v63 }
  0x64   :  { %1479 = vmatmul.mubr.bf16.vlgmr.msra.gmra.mrb[16].mxu1 %v1624_v2  ;;  %1954 = vmatpush3.bf16.msra.mxu0 %v2115_v6 }
  0x65   :  { %1982 = vmatpush3.bf16.msra.mxu1 %v2116_v7  ;;  %1955 = vmatprep.subr.bf16.mxu0 %v2117_v8 }
  0x66   :  { %1983 = vmatprep.subr.bf16.mxu1 %v2118_v9  ;;  %1438 = vmatprep.mubr.bf16.mxu0 %v1639_v13 }
  0x67   :  { %1486 = vmatprep.mubr.bf16.mxu1 %v1641_v18 }
  0x68   :  { %1956 = vmatpush3.bf16.msra.mxu0 %v2119_v10 }
  0x69   :  { %1984 = vmatpush3.bf16.msra.mxu1 %v2120_v11  ;;  %1957 = vmatprep.subr.bf16.mxu0 %v2123_v15 }
  0x6a   :  { %1985 = vmatprep.subr.bf16.mxu1 %v2124_v16 }
  0x6b   :  { %1439 = vmatmul.mubr.bf16.gmra.mrb[20].mxu0 %v1638_v14 }
  0x6c   :  { %1958 = vmatpush3.bf16.msra.mxu0 %v2126_v19  ;;  %1487 = vmatmul.mubr.bf16.gmra.mrb[20].mxu1 %v1640_v20 }
  0x6d   :  { %1986 = vmatpush3.bf16.msra.mxu1 %v2127_v21  ;;  %1959 = vmatprep.subr.bf16.mxu0 %v2129_v22 }
  0x6e   :  { %1987 = vmatprep.subr.bf16.mxu1 %v2130_v23  ;;  %1526 = vmatprep.mubr.bf16.mxu0 %v1627_v46 }
  0x6f   :  { %1574 = vmatprep.mubr.bf16.mxu1 %v1629_v51 }
  0x70   :  { %1960 = vmatpush3.bf16.msra.mxu0 %v2131_v24 }
  0x71   :  { %1988 = vmatpush3.bf16.msra.mxu1 %v2132_v25  ;;  %1961 = vmatprep.subr.bf16.mxu0 %v2133_v26 }
  0x72   :  { %1989 = vmatprep.subr.bf16.mxu1 %v2134_v27 }
  0x74   :  { %1962 = vmatpush3.bf16.msra.mxu0 %v2135_v28 }
  0x75   :  { %1990 = vmatpush3.bf16.msra.mxu1 %v2136_v29  ;;  %1963 = vmatprep.subr.bf16.mxu0 %v2137_v30 }
  0x76   :  { %1991 = vmatprep.subr.bf16.mxu1 %v2138_v31 }
  0x78   :  { %1964 = vmatpush3.bf16.msra.mxu0 %v2139_v32 }
  0x79   :  { %1992 = vmatpush3.bf16.msra.mxu1 %v2140_v33  ;;  %1965 = vmatprep.subr.bf16.mxu0 %v2141_v34 }
  0x7a   :  { %1993 = vmatprep.subr.bf16.mxu1 %v2142_v35 }
  0x7c   :  { %1966 = vmatpush3.bf16.msra.mxu0 %v2143_v36 }
  0x7d   :  { %1994 = vmatpush3.bf16.msra.mxu1 %v2144_v37  ;;  %1967 = vmatprep.subr.bf16.mxu0 %v2145_v38 }
  0x7e   :  { %1995 = vmatprep.subr.bf16.mxu1 %v2146_v39 }
  0x80   :  { %1968 = vmatpush3.bf16.msra.mxu0 %v2147_v40 }
  0x81   :  { %1996 = vmatpush3.bf16.msra.mxu1 %v2148_v41 }
  0x83   :  { %1527 = vmatmul.mubr.bf16.vlgmr.msra.gmra.mrb[24].mxu0 %v1626_v45 }
  0x84   :  { %1575 = vmatmul.mubr.bf16.vlgmr.msra.gmra.mrb[24].mxu1 %v1628_v50  ;;  %1534 = vmatprep.mubr.bf16.mxu0 %v1643_v52 }
  0x85   :  { %1582 = vmatprep.mubr.bf16.mxu1 %v1645_v53 }
  0x8b   :  { %1535 = vmatmul.mubr.bf16.gmra.mrb[28].mxu0 %v1642_v54 }
  0x8c   :  { %1583 = vmatmul.mubr.bf16.gmra.mrb[28].mxu1 %v1644_v55 }
  0xf6   :  { %v1801_v56 = vpop.f32.mrb[0].mxu0 }
  0xf7   :  { %v1829_v57 = vpop.f32.mrb[0].mxu1  ;;  %v1802_v59 = vpop.f32.mrb[1].mxu0 }
  0xf8   :  { %v1803_v60 = vadd.f32 %v1802_v59, %v1801_v56  ;;  %v1830_v61 = vpop.f32.mrb[1].mxu1  ;;  %v1804_v62 = vpop.f32.mrb[2].mxu0 }
  0xf9   :  { %v1831_v63 = vadd.f32 %v1830_v61, %v1829_v57  ;;  %v1832_v0 = vpop.f32.mrb[2].mxu1  ;;  %v1805_v1 = vpop.f32.mrb[3].mxu0 }
  0xfa   :  { %v1241_v2 = vadd.f32 %v1803_v60, %v1613_v58  ;;  %v1806_v3 = vadd.f32 %v1805_v1, %v1804_v62  ;;  %v1833_v4 = vpop.f32.mrb[3].mxu1 }
  0xfb   :  { %v1834_v5 = vadd.f32 %v1833_v4, %v1832_v0 }
  0xfc   :  { %v1289_v6 = vadd.f32 %v1831_v63, %v1241_v2  ;;  %v1244_v7 = vadd.f32 %v1806_v3, %v1613_v58 }
  0xfe   :  { %v1292_v8 = vadd.f32 %v1834_v5, %v1244_v7  ;;  %v1807_v9 = vpop.f32.mrb[4].mxu0 }
  0xff   :  { %v1808_v10 = vpop.f32.mrb[5].mxu0  ;;  %v1835_v13 = vpop.f32.mrb[4].mxu1 }
 0x100   :  { %v1809_v11 = vadd.f32 %v1808_v10, %v1807_v9  ;;  %v1810_v12 = vpop.f32.mrb[6].mxu0  ;;  %v1836_v15 = vpop.f32.mrb[5].mxu1 }
 0x101   :  { %v1811_v14 = vpop.f32.mrb[7].mxu0  ;;  %v1837_v17 = vadd.f32 %v1836_v15, %v1835_v13  ;;  %v1838_v18 = vpop.f32.mrb[6].mxu1 }
 0x102   :  { %v1249_v16 = vadd.f32 %v1809_v11, %v1613_v58  ;;  %v1839_v19 = vpop.f32.mrb[7].mxu1 }
 0x104   :  { %v1297_v20 = vadd.f32 %v1837_v17, %v1249_v16 }
 0x116   :  { %v1857_v21 = vpop.f32.mrb[8].mxu0 }
 0x117   :  { %v1885_v22 = vpop.f32.mrb[8].mxu1  ;;  %v1858_v23 = vpop.f32.mrb[9].mxu0 }
 0x118   :  { %v1859_v24 = vadd.f32 %v1858_v23, %v1857_v21  ;;  %v1886_v25 = vpop.f32.mrb[9].mxu1  ;;  %v1860_v26 = vpop.f32.mrb[10].mxu0 }
 0x119   :  { %v1887_v27 = vadd.f32 %v1886_v25, %v1885_v22  ;;  %v1888_v28 = vpop.f32.mrb[10].mxu1  ;;  %v1861_v29 = vpop.f32.mrb[11].mxu0 }
 0x11a   :  { %v1337_v30 = vadd.f32 %v1859_v24, %v1289_v6  ;;  %v1862_v31 = vadd.f32 %v1861_v29, %v1860_v26  ;;  %v1889_v32 = vpop.f32.mrb[11].mxu1 }
 0x11b   :  { %v1890_v33 = vadd.f32 %v1889_v32, %v1888_v28 }
 0x11c   :  { %v1385_v34 = vadd.f32 %v1887_v27, %v1337_v30  ;;  %v1340_v35 = vadd.f32 %v1862_v31, %v1292_v8 }
 0x11e   :  { %v1388_v36 = vadd.f32 %v1890_v33, %v1340_v35  ;;  %v1863_v37 = vpop.f32.mrb[12].mxu0 }
 0x11f   :  { %v1864_v38 = vpop.f32.mrb[13].mxu0  ;;  %v1891_v41 = vpop.f32.mrb[12].mxu1 }
 0x120   :  { %v1865_v39 = vadd.f32 %v1864_v38, %v1863_v37  ;;  %v1866_v40 = vpop.f32.mrb[14].mxu0  ;;  %v1892_v44 = vpop.f32.mrb[13].mxu1 }
 0x121   :  { %v1867_v42 = vpop.f32.mrb[15].mxu0  ;;  %v1893_v45 = vadd.f32 %v1892_v44, %v1891_v41  ;;  %v1894_v46 = vpop.f32.mrb[14].mxu1 }
 0x122   :  { %v1345_v43 = vadd.f32 %v1865_v39, %v1297_v20  ;;  %v1895_v47 = vpop.f32.mrb[15].mxu1 }
 0x124   :  { %v1393_v48 = vadd.f32 %v1893_v45, %v1345_v43 }
 0x136   :  { %v1913_v49 = vpop.f32.mrb[16].mxu0 }
 0x137   :  { %v1941_v50 = vpop.f32.mrb[16].mxu1  ;;  %v1914_v51 = vpop.f32.mrb[17].mxu0 }
 0x138   :  { %v1915_v52 = vadd.f32 %v1914_v51, %v1913_v49  ;;  %v1942_v53 = vpop.f32.mrb[17].mxu1  ;;  %v1916_v54 = vpop.f32.mrb[18].mxu0 }
 0x139   :  { %v1943_v55 = vadd.f32 %v1942_v53, %v1941_v50  ;;  %v1944_v56 = vpop.f32.mrb[18].mxu1  ;;  %v1917_v57 = vpop.f32.mrb[19].mxu0 }
 0x13a   :  { %v1433_v58 = vadd.f32 %v1915_v52, %v1385_v34  ;;  %v1918_v59 = vadd.f32 %v1917_v57, %v1916_v54  ;;  %v1945_v60 = vpop.f32.mrb[19].mxu1 }
 0x13b   :  { %v1946_v61 = vadd.f32 %v1945_v60, %v1944_v56 }
 0x13c   :  { %v1481_v62 = vadd.f32 %v1943_v55, %v1433_v58  ;;  %v1436_v63 = vadd.f32 %v1918_v59, %v1388_v36 }
 0x13e   :  { %v1484_v0 = vadd.f32 %v1946_v61, %v1436_v63  ;;  %v1919_v1 = vpop.f32.mrb[20].mxu0 }
 0x13f   :  { %v1920_v2 = vpop.f32.mrb[21].mxu0  ;;  %v1947_v5 = vpop.f32.mrb[20].mxu1 }
 0x140   :  { %v1921_v3 = vadd.f32 %v1920_v2, %v1919_v1  ;;  %v1922_v4 = vpop.f32.mrb[22].mxu0  ;;  %v1948_v8 = vpop.f32.mrb[21].mxu1 }
 0x141   :  { %v1923_v6 = vpop.f32.mrb[23].mxu0  ;;  %v1949_v9 = vadd.f32 %v1948_v8, %v1947_v5  ;;  %v1950_v10 = vpop.f32.mrb[22].mxu1 }
 0x142   :  { %v1441_v7 = vadd.f32 %v1921_v3, %v1393_v48  ;;  %v1951_v11 = vpop.f32.mrb[23].mxu1 }
 0x144   :  { %v1489_v12 = vadd.f32 %v1949_v9, %v1441_v7 }
 0x156   :  { %v1969_v13 = vpop.f32.mrb[24].mxu0 }
 0x157   :  { %v1997_v14 = vpop.f32.mrb[24].mxu1  ;;  %v1970_v15 = vpop.f32.mrb[25].mxu0 }
 0x158   :  { %v1971_v16 = vadd.f32 %v1970_v15, %v1969_v13  ;;  %v1998_v17 = vpop.f32.mrb[25].mxu1  ;;  %v1972_v18 = vpop.f32.mrb[26].mxu0 }
 0x159   :  { %v1999_v19 = vadd.f32 %v1998_v17, %v1997_v14  ;;  %v2000_v20 = vpop.f32.mrb[26].mxu1  ;;  %v1973_v21 = vpop.f32.mrb[27].mxu0 }
 0x15a   :  { %v1529_v22 = vadd.f32 %v1971_v16, %v1481_v62  ;;  %v1974_v23 = vadd.f32 %v1973_v21, %v1972_v18  ;;  %v2001_v24 = vpop.f32.mrb[27].mxu1 }
 0x15b   :  { %v2002_v25 = vadd.f32 %v2001_v24, %v2000_v20 }
 0x15c   :  { %v1577_v26 = vadd.f32 %v1999_v19, %v1529_v22  ;;  %v1532_v27 = vadd.f32 %v1974_v23, %v1484_v0 }
 0x15e   :  { %v1580_v28 = vadd.f32 %v2002_v25, %v1532_v27  ;;  %v1975_v29 = vpop.f32.mrb[28].mxu0  ;;  %v1590_v32 = vmax.f32 %v1577_v26, 0.0 }
 0x15f   :  { %v2003_v30 = vpop.f32.mrb[28].mxu1  ;;  %v1976_v31 = vpop.f32.mrb[29].mxu0 }
 0x160   :  { %v1591_v33 = vmax.f32 %v1580_v28, 0.0  ;;  %v1977_v34 = vadd.f32 %v1976_v31, %v1975_v29  ;;  %v2004_v35 = vpop.f32.mrb[29].mxu1  ;;  %v1978_v36 = vpop.f32.mrb[30].mxu0 }
 0x161   :  { %v2005_v37 = vadd.f32 %v2004_v35, %v2003_v30  ;;  %v2006_v38 = vpop.f32.mrb[30].mxu1  ;;  %v1979_v39 = vpop.f32.mrb[31].mxu0 }
 0x162   :  { %v1783_v40 = vpack.c.bf16 %v1591_v33, %v1590_v32  ;;  %v1537_v41 = vadd.f32 %v1977_v34, %v1489_v12  ;;  %v2007_v42 = vpop.f32.mrb[31].mxu1 }
 0x164   :  { %v1585_v43 = vadd.f32 %v2005_v37, %v1537_v41  ;;  %1784 = vst [vmem:[%s2641_s3] sm:$0xff] %v1783_v40  }
 0x166   :  { %v1592_v44 = vmax.f32 %v1585_v43, 0.0 }
 0x168   :  { %v1779_v45 = vpack.c.bf16 %v1592_v44, %v1592_v44 }
 0x16a   :  { %1608 = vst [vmem:[%s2641_s3 + $0x8] sm:$0x1] %v1779_v45 }

// kernel: forward.5
= control target key start
LH: loop header
LB: loop body
LE: loop exit
PB: predicated region body
PF: predicated region fallthrough
CT: control target
= control target key end

     0   :  { %v6572_v5 = vmov 1966171168   ;;  %v186_v7 = vlaneseq  ;;  %vm6574_vm0 = vmmov 0   ;;  %s8574_s1 = inlined_call_operand.vmem [shape: bf16[1152,128], index: 1, kind: input, shape index: {}]   ;;  %s8575_s0 = inlined_call_operand.vmem [shape: bf16[2,1152], index: 0, kind: input, shape index: {}]   ;;  %s8576_s3 = inlined_call_operand.vmem [shape: bf16[128,1024], index: 3, kind: input, shape index: {}]   ;;  %s8577_s5 = inlined_call_operand.vmem [shape: bf16[1024,896], index: 5, kind: input, shape index: {}]   ;;  %s8578_s2 = inlined_call_operand.vmem [shape: f32[1,128], index: 2, kind: input, shape index: {}]   ;;  %s8579_s4 = inlined_call_operand.vmem [shape: f32[1,1024], index: 4, kind: input, shape index: {}]   ;;  %s8580_s6 = inlined_call_operand.vmem [shape: f32[1,896], index: 6, kind: input, shape index: {}]   ;;  %s8581_s7 = inlined_call_operand.vmem [shape: f32[2,768], index: 7, kind: output, shape index: {}]  }
   0x1   :  { %v5859_v0 = vld [vmem:[%s8574_s1 + $0x40] sm:$0xff]   ;;  %v5861_v2 = vld [vmem:[%s8574_s1 + $0x48] sm:$0xff]   ;;  %v5863_v4 = vld [vmem:[%s8574_s1 + $0x50] sm:$0xff]   ;;  %v184_v6 = vunpack.c.l.s4 %v6572_v5 }
   0x2   :  { %v5860_v1 = vld [vmem:[%s8574_s1] sm:$0xff]   ;;  %5608 = vmatprep.subr.bf16.mxu0 %v5859_v0  ;;  %v5862_v3 = vld [vmem:[%s8574_s1 + $0x8] sm:$0xff]   ;;  %v5864_v8 = vld [vmem:[%s8574_s1 + $0x10] sm:$0xff]   ;;  %v6637_v11 = vshrl.u32 %v186_v7, 7 }
   0x3   :  { %5609 = vmatpush3.bf16.msra.mxu0 %v5860_v1  ;;  %v5865_v9 = vld [vmem:[%s8574_s1 + $0x58] sm:$0xff]   ;;  %v185_v10 = vunpack.c.0.s8 %v184_v6  ;;  %v5867_v13 = vld [vmem:[%s8574_s1 + $0x60] sm:$0xff]   ;;  %v5869_v16 = vld [vmem:[%s8574_s1 + $0x68] sm:$0xff]  }
   0x4   :  { %5610 = vmatprep.subr.bf16.mxu0 %v5861_v2  ;;  %v5866_v12 = vld [vmem:[%s8574_s1 + $0x18] sm:$0xff]   ;;  %v5868_v15 = vld [vmem:[%s8574_s1 + $0x20] sm:$0xff]   ;;  %v5870_v20 = vld [vmem:[%s8574_s1 + $0x28] sm:$0xff]  }
   0x5   :  { %v6646_v14 = vsub.s32 %v185_v10, %v6637_v11  ;;  %v27_v17 = vld [vmem:[%s8575_s0] sm:$0xff]  ;;  %v5871_v23 = vld [vmem:[%s8574_s1 + $0x70] sm:$0xff]   ;;  %v5873_v28 = vld [vmem:[%s8574_s1 + $0x78] sm:$0xff]  }
   0x6   :  { %v182_v18 = vcombine.high %v27_v17, %v27_v17  ;;  %v5872_v26 = vld [vmem:[%s8574_s1 + $0x30] sm:$0xff]   ;;  %v5874_v30 = vld [vmem:[%s8574_s1 + $0x38] sm:$0xff]   ;;  %v5876_v31 = vld [vmem:[%s8574_s1 + $0xc0] sm:$0xff]  }
   0x7   :  { %5611 = vmatpush3.bf16.msra.mxu0 %v5862_v3  ;;  %v189_v19 = vrot.slane %v27_v17, %v6646_v14  ;;  %v5877_v34 = vld [vmem:[%s8574_s1 + $0x80] sm:$0xff]   ;;  %v5878_v35 = vld [vmem:[%s8574_s1 + $0xc8] sm:$0xff]   ;;  %v5880_v37 = vld [vmem:[%s8574_s1 + $0xd0] sm:$0xff]  }
   0x8   :  { %5612 = vmatprep.subr.bf16.mxu0 %v5863_v4  ;;  %v6662_v22 = vrot.slane %v182_v18, %v6646_v14  ;;  %v5879_v36 = vld [vmem:[%s8574_s1 + $0x88] sm:$0xff]   ;;  %v5894_v38 = vld [vmem:[%s8574_s1 + $0x1c0] sm:$0xff]   ;;  %v5881_v40 = vld [vmem:[%s8574_s1 + $0x90] sm:$0xff]  }
   0x9   :  { %v197_v21 = vcombine.high %v189_v19, %v189_v19  ;;  %v6688_v32 = vrot.slane %v189_v19, %v6646_v14  ;;  %v5895_v39 = vld [vmem:[%s8574_s1 + $0x180] sm:$0xff]   ;;  %5674 = vmatprep.subr.bf16.mxu1 %v5894_v38  ;;  %v5882_v41 = vld [vmem:[%s8574_s1 + $0xd8] sm:$0xff]   ;;  %v5898_v42 = vld [vmem:[%s8574_s1 + $0x1c8] sm:$0xff]  }
   0xa   :  { %v198_v25 = vcombine.high %v6662_v22, %v6662_v22  ;;  %5675 = vmatpush3.bf16.msra.mxu1 %v5895_v39  ;;  %v5899_v43 = vld [vmem:[%s8574_s1 + $0x188] sm:$0xff]   ;;  %v5883_v44 = vld [vmem:[%s8574_s1 + $0x98] sm:$0xff]   ;;  %v5884_v45 = vld [vmem:[%s8574_s1 + $0xe0] sm:$0xff]   ;;  %v212_v1 = vrot.slane %v6662_v22, %v6646_v14 }
   0xb   :  { %5613 = vmatpush3.bf16.msra.mxu0 %v5864_v8  ;;  %v219_v24 = vrot.slane %v197_v21, %v6646_v14  ;;  %5676 = vmatprep.subr.bf16.mxu1 %v5898_v42  ;;  %v5902_v46 = vld [vmem:[%s8574_s1 + $0x1d0] sm:$0xff]   ;;  %v5885_v48 = vld [vmem:[%s8574_s1 + $0xa0] sm:$0xff]   ;;  %v5886_v49 = vld [vmem:[%s8574_s1 + $0xe8] sm:$0xff]   ;;  %v227_v2 = vcombine.high %v6688_v32, %v6688_v32 }
   0xc   :  { %5614 = vmatprep.subr.bf16.mxu0 %v5865_v9  ;;  %v6674_v27 = vrot.slane %v198_v25, %v6646_v14  ;;  %v5903_v47 = vld [vmem:[%s8574_s1 + $0x190] sm:$0xff]   ;;  %v5906_v50 = vld [vmem:[%s8574_s1 + $0x1d8] sm:$0xff]   ;;  %v5887_v52 = vld [vmem:[%s8574_s1 + $0xa8] sm:$0xff]   ;;  %v228_v6 = vcombine.high %v212_v1, %v212_v1 }
   0xd   :  { %718 = vmatprep.mubr.bf16.mxu0 %v219_v24  ;;  %v229_v33 = vcombine.high %v219_v24, %v219_v24  ;;  %v5907_v51 = vld [vmem:[%s8574_s1 + $0x198] sm:$0xff]   ;;  %v5888_v53 = vld [vmem:[%s8574_s1 + $0xf0] sm:$0xff]   ;;  %v5910_v54 = vld [vmem:[%s8574_s1 + $0x1e0] sm:$0xff]   ;;  %v6573_v24 = vmov 0.0  }
   0xe   :  { %v230_v29 = vcombine.high %v6674_v27, %v6674_v27  ;;  %5677 = vmatpush3.bf16.msra.mxu1 %v5899_v43  ;;  %v5911_v55 = vld [vmem:[%s8574_s1 + $0x1a0] sm:$0xff]   ;;  %v5889_v56 = vld [vmem:[%s8574_s1 + $0xb0] sm:$0xff]   ;;  %v5890_v57 = vld [vmem:[%s8574_s1 + $0xf8] sm:$0xff]  }
   0xf   :  { %5615 = vmatpush3.bf16.msra.mxu0 %v5866_v12  ;;  %5678 = vmatprep.subr.bf16.mxu1 %v5902_v46  ;;  %v5914_v58 = vld [vmem:[%s8574_s1 + $0x1e8] sm:$0xff]   ;;  %v5891_v60 = vld [vmem:[%s8574_s1 + $0xb8] sm:$0xff]   ;;  %v5892_v61 = vld [vmem:[%s8574_s1 + $0x140] sm:$0xff]  }
  0x10   :  { %5616 = vmatprep.subr.bf16.mxu0 %v5867_v13  ;;  %838 = vmatprep.mubr.bf16.mxu1 %v230_v29  ;;  %v5915_v59 = vld [vmem:[%s8574_s1 + $0x1a8] sm:$0xff]   ;;  %v5918_v62 = vld [vmem:[%s8574_s1 + $0x1f0] sm:$0xff]   ;;  %v5893_v0 = vld [vmem:[%s8574_s1 + $0x100] sm:$0xff]  }
  0x11   :  { %v5919_v63 = vld [vmem:[%s8574_s1 + $0x1b0] sm:$0xff]   ;;  %v5896_v3 = vld [vmem:[%s8574_s1 + $0x148] sm:$0xff]   ;;  %v5922_v4 = vld [vmem:[%s8574_s1 + $0x1f8] sm:$0xff]  }
  0x12   :  { %5679 = vmatpush3.bf16.msra.mxu1 %v5903_v47  ;;  %v5923_v5 = vld [vmem:[%s8574_s1 + $0x1b8] sm:$0xff]   ;;  %v5897_v7 = vld [vmem:[%s8574_s1 + $0x108] sm:$0xff]   ;;  %v5900_v8 = vld [vmem:[%s8574_s1 + $0x150] sm:$0xff]  }
  0x13   :  { %5617 = vmatpush3.bf16.msra.mxu0 %v5868_v15  ;;  %5680 = vmatprep.subr.bf16.mxu1 %v5906_v50  ;;  %v5901_v9 = vld [vmem:[%s8574_s1 + $0x110] sm:$0xff]   ;;  %v5904_v10 = vld [vmem:[%s8574_s1 + $0x158] sm:$0xff]   ;;  %v5023_v12 = vld.sshfl [vmem:[%s8575_s0 + $0x8] sm:$0x1 pattern:$0x75316420] }
  0x14   :  { %5618 = vmatprep.subr.bf16.mxu0 %v5869_v16  ;;  %v244_v13 = vrot.slane %v5023_v12, %v6646_v14  ;;  %v5905_v15 = vld [vmem:[%s8574_s1 + $0x118] sm:$0xff]   ;;  %v5908_v16 = vld [vmem:[%s8574_s1 + $0x160] sm:$0xff]   ;;  %v5912_v14 = vld [vmem:[%s8574_s1 + $0x168] sm:$0xff]  }
  0x15   :  { %v5909_v17 = vld [vmem:[%s8574_s1 + $0x120] sm:$0xff]   ;;  %v5913_v18 = vld [vmem:[%s8574_s1 + $0x128] sm:$0xff]   ;;  %v5916_v19 = vld [vmem:[%s8574_s1 + $0x170] sm:$0xff]  }
  0x16   :  { %5681 = vmatpush3.bf16.msra.mxu1 %v5907_v51  ;;  %v5920_v21 = vld [vmem:[%s8574_s1 + $0x178] sm:$0xff]   ;;  %v5925_v25 = vld [vmem:[%s8574_s1 + $0x208] sm:$0xff]   ;;  %v896_v38 = vld [vmem:[%s8576_s3 + $0x40] sm:$0xff] }
  0x17   :  { %5619 = vmatpush3.bf16.msra.mxu0 %v5870_v20  ;;  %5682 = vmatprep.subr.bf16.mxu1 %v5910_v54  ;;  %v5917_v20 = vld [vmem:[%s8574_s1 + $0x130] sm:$0xff]   ;;  %v5921_v22 = vld [vmem:[%s8574_s1 + $0x138] sm:$0xff]   ;;  %v5929_v29 = vld [vmem:[%s8574_s1 + $0x228] sm:$0xff]  }
  0x18   :  { %5620 = vmatprep.subr.bf16.mxu0 %v5871_v23  ;;  %v5924_v23 = vld [vmem:[%s8574_s1 + $0x200] sm:$0xff]   ;;  %v897_v43 = vld [vmem:[%s8576_s3 + $0x48] sm:$0xff] }
  0x19   :  { %v900_v39 = vld [vmem:[%s8576_s3 + $0x60] sm:$0xff] }
  0x1a   :  { %5683 = vmatpush3.bf16.msra.mxu1 %v5911_v55  ;;  %v5105_v42 = vcombine.high %v896_v38, %v900_v39  ;;  %v908_v47 = vld [vmem:[%s8576_s3 + $0xa0] sm:$0xff]  ;;  %v5104_v50 = vcombine.low %v896_v38, %v900_v39 }
  0x1b   :  { %5621 = vmatpush3.bf16.msra.mxu0 %v5872_v26  ;;  %5684 = vmatprep.subr.bf16.mxu1 %v5914_v58  ;;  %v5926_v26 = vld [vmem:[%s8574_s1 + $0x210] sm:$0xff]   ;;  %v912_v54 = vld [vmem:[%s8576_s3 + $0xc0] sm:$0xff] }
  0x1c   :  { %5622 = vmatprep.subr.bf16.mxu0 %v5873_v28  ;;  %v5928_v28 = vld [vmem:[%s8574_s1 + $0x220] sm:$0xff]  }
  0x1d   :  { %v916_v55 = vld [vmem:[%s8576_s3 + $0xe0] sm:$0xff] }
  0x1e   :  { %5685 = vmatpush3.bf16.msra.mxu1 %v5915_v59 }
  0x1f   :  { %5623 = vmatpush3.bf16.msra.mxu0 %v5874_v30  ;;  %5686 = vmatprep.subr.bf16.mxu1 %v5918_v62  ;;  %v5930_v30 = vld [vmem:[%s8574_s1 + $0x230] sm:$0xff]   ;;  %v920_v62 = vld [vmem:[%s8576_s3 + $0x100] sm:$0xff] }
  0x20   :  { %5630 = vmatprep.subr.bf16.mxu0 %v5876_v31  ;;  %v5931_v31 = vld [vmem:[%s8574_s1 + $0x238] sm:$0xff]  }
  0x22   :  { %719 = vmatmul.mubr.bf16.vlgmr.msra.gmra.mrb[0].mxu0 %v6688_v32  ;;  %5687 = vmatpush3.bf16.msra.mxu1 %v5919_v63  ;;  %v888_v32 = vld [vmem:[%s8576_s3] sm:$0xff] }
  0x23   :  { %5631 = vmatpush3.bf16.msra.mxu0 %v5877_v34  ;;  %758 = vmatprep.mubr.bf16.mxu0 %v229_v33  ;;  %v892_v33 = vld [vmem:[%s8576_s3 + $0x20] sm:$0xff]  ;;  %v889_v34 = vld [vmem:[%s8576_s3 + $0x8] sm:$0xff] }
  0x24   :  { %5632 = vmatprep.subr.bf16.mxu0 %v5878_v35  ;;  %5688 = vmatprep.subr.bf16.mxu1 %v5922_v4  ;;  %v5096_v35 = vcombine.low %v888_v32, %v892_v33  ;;  %v924_v63 = vld [vmem:[%s8576_s3 + $0x120] sm:$0xff] }
  0x25   :  { %v5129_v4 = vcombine.high %v920_v62, %v924_v63 }
  0x26   :  { %5689 = vmatpush3.bf16.msra.mxu1 %v5923_v5 }
  0x27   :  { %5633 = vmatpush3.bf16.msra.mxu0 %v5879_v36  ;;  %v5097_v36 = vcombine.high %v888_v32, %v892_v33  ;;  %v890_v33 = vld [vmem:[%s8576_s3 + $0x10] sm:$0xff] }
  0x28   :  { %5634 = vmatprep.subr.bf16.mxu0 %v5880_v37  ;;  %v893_v37 = vld [vmem:[%s8576_s3 + $0x28] sm:$0xff] }
  0x29   :  { %839 = vmatmul.mubr.bf16.vlgmr.msra.gmra.mrb[0].mxu1 %v228_v6  ;;  %1314 = vmatprep.subr.bf16.mxu1 %v5097_v36  ;;  %v928_v6 = vld [vmem:[%s8576_s3 + $0x140] sm:$0xff] }
  0x2a   :  { %1315 = vmatpush1.bf16.msra.mxu1 %v5096_v35  ;;  %v891_v35 = vld [vmem:[%s8576_s3 + $0x18] sm:$0xff] }
  0x2b   :  { %5635 = vmatpush3.bf16.msra.mxu0 %v5881_v40  ;;  %v5098_v40 = vcombine.low %v889_v34, %v893_v37  ;;  %1316 = vmatprep.subr.bf16.mxu1 %v5105_v42 }
  0x2c   :  { %5636 = vmatprep.subr.bf16.mxu0 %v5882_v41  ;;  %v5099_v41 = vcombine.high %v889_v34, %v893_v37  ;;  %v894_v34 = vld [vmem:[%s8576_s3 + $0x30] sm:$0xff]  ;;  %v895_v37 = vld [vmem:[%s8576_s3 + $0x38] sm:$0xff] }
  0x2d   :  { %v5101_v36 = vcombine.high %v890_v33, %v894_v34  ;;  %v5100_v38 = vcombine.low %v890_v33, %v894_v34  ;;  %v5102_v39 = vcombine.low %v891_v35, %v895_v37  ;;  %v923_v33 = vld [vmem:[%s8576_s3 + $0x118] sm:$0xff] }
  0x2e   :  { %1317 = vmatpush1.bf16.msra.mxu1 %v5104_v50  ;;  %v927_v34 = vld [vmem:[%s8576_s3 + $0x138] sm:$0xff] }
  0x2f   :  { %5637 = vmatpush3.bf16.msra.mxu0 %v5883_v44  ;;  %v901_v44 = vld [vmem:[%s8576_s3 + $0x68] sm:$0xff] }
  0x30   :  { %5638 = vmatprep.subr.bf16.mxu0 %v5884_v45  ;;  %v904_v45 = vld [vmem:[%s8576_s3 + $0x80] sm:$0xff]  ;;  %v5107_v46 = vcombine.high %v897_v43, %v901_v44  ;;  %v5106_v51 = vcombine.low %v897_v43, %v901_v44 }
  0x31   :  { %v5112_v58 = vcombine.low %v904_v45, %v908_v47 }
  0x33   :  { %5639 = vmatpush3.bf16.msra.mxu0 %v5885_v48  ;;  %v905_v48 = vld [vmem:[%s8576_s3 + $0x88] sm:$0xff] }
  0x34   :  { %5640 = vmatprep.subr.bf16.mxu0 %v5886_v49  ;;  %v909_v49 = vld [vmem:[%s8576_s3 + $0xa8] sm:$0xff] }
  0x35   :  { %v5114_v59 = vcombine.low %v905_v48, %v909_v49 }
  0x37   :  { %5641 = vmatpush3.bf16.msra.mxu0 %v5887_v52  ;;  %v5113_v52 = vcombine.high %v904_v45, %v908_v47  ;;  %v5022_v47 = vld [vmem:[%s8578_s2] ss:$0 sm:$0xff] }
  0x38   :  { %5642 = vmatprep.subr.bf16.mxu0 %v5888_v53  ;;  %v5115_v53 = vcombine.high %v905_v48, %v909_v49 }
  0x39   :  { %1318 = vmatprep.subr.bf16.mxu1 %v5113_v52 }
  0x3a   :  { %1319 = vmatpush1.bf16.msra.mxu1 %v5112_v58 }
  0x3b   :  { %5643 = vmatpush3.bf16.msra.mxu0 %v5889_v56  ;;  %v913_v56 = vld [vmem:[%s8576_s3 + $0xc8] sm:$0xff] }
  0x3c   :  { %5644 = vmatprep.subr.bf16.mxu0 %v5890_v57  ;;  %v917_v57 = vld [vmem:[%s8576_s3 + $0xe8] sm:$0xff] }
  0x3f   :  { %5645 = vmatpush3.bf16.msra.mxu0 %v5891_v60  ;;  %v5121_v60 = vcombine.high %v912_v54, %v916_v55 }
  0x40   :  { %5652 = vmatprep.subr.bf16.mxu0 %v5892_v61  ;;  %v5123_v61 = vcombine.high %v913_v56, %v917_v57 }
  0x41   :  { %1320 = vmatprep.subr.bf16.mxu1 %v5121_v60 }
  0x42   :  { %759 = vmatmul.mubr.bf16.vlgmr.msra.gmra.mrb[4].mxu0 %v227_v2  ;;  %v5120_v2 = vcombine.low %v912_v54, %v916_v55 }
  0x43   :  { %5653 = vmatpush3.bf16.msra.mxu0 %v5893_v0  ;;  %798 = vmatprep.mubr.bf16.mxu0 %v6674_v27  ;;  %v5927_v27 = vld [vmem:[%s8574_s1 + $0x218] sm:$0xff]   ;;  %v921_v0 = vld [vmem:[%s8576_s3 + $0x108] sm:$0xff] }
  0x44   :  { %5654 = vmatprep.subr.bf16.mxu0 %v5896_v3  ;;  %v5122_v3 = vcombine.low %v913_v56, %v917_v57  ;;  %1321 = vmatpush1.bf16.msra.mxu1 %v5120_v2 }
  0x45   :  { %1322 = vmatprep.subr.bf16.mxu1 %v5129_v4  ;;  %v898_v4 = vld [vmem:[%s8576_s3 + $0x50] sm:$0xff] }
  0x47   :  { %5655 = vmatpush3.bf16.msra.mxu0 %v5897_v7  ;;  %v932_v7 = vld [vmem:[%s8576_s3 + $0x160] sm:$0xff] }
  0x48   :  { %5656 = vmatprep.subr.bf16.mxu0 %v5900_v8  ;;  %v929_v8 = vld [vmem:[%s8576_s3 + $0x148] sm:$0xff] }
  0x4b   :  { %5657 = vmatpush3.bf16.msra.mxu0 %v5901_v9  ;;  %v933_v9 = vld [vmem:[%s8576_s3 + $0x168] sm:$0xff] }
  0x4c   :  { %5658 = vmatprep.subr.bf16.mxu0 %v5904_v10  ;;  %v5128_v10 = vcombine.low %v920_v62, %v924_v63 }
  0x4e   :  { %1323 = vmatpush1.bf16.msra.mxu1 %v5128_v10 }
  0x4f   :  { %5659 = vmatpush3.bf16.msra.mxu0 %v5905_v15  ;;  %v5139_v15 = vcombine.high %v929_v8, %v933_v9 }
  0x50   :  { %5660 = vmatprep.subr.bf16.mxu0 %v5908_v16  ;;  %v936_v16 = vld [vmem:[%s8576_s3 + $0x180] sm:$0xff] }
  0x53   :  { %5661 = vmatpush3.bf16.msra.mxu0 %v5909_v17  ;;  %v940_v17 = vld [vmem:[%s8576_s3 + $0x1a0] sm:$0xff] }
  0x54   :  { %5662 = vmatprep.subr.bf16.mxu0 %v5912_v14  ;;  %v937_v14 = vld [vmem:[%s8576_s3 + $0x188] sm:$0xff] }
  0x57   :  { %5663 = vmatpush3.bf16.msra.mxu0 %v5913_v18  ;;  %v941_v18 = vld [vmem:[%s8576_s3 + $0x1a8] sm:$0xff] }
  0x58   :  { %5664 = vmatprep.subr.bf16.mxu0 %v5916_v19  ;;  %v5136_v19 = vcombine.low %v928_v6, %v932_v7 }
  0x5b   :  { %5665 = vmatpush3.bf16.msra.mxu0 %v5917_v20  ;;  %v5138_v20 = vcombine.low %v929_v8, %v933_v9 }
  0x5c   :  { %5666 = vmatprep.subr.bf16.mxu0 %v5920_v21  ;;  %v5145_v21 = vcombine.high %v936_v16, %v940_v17 }
  0x5f   :  { %5667 = vmatpush3.bf16.msra.mxu0 %v5921_v22  ;;  %v5147_v22 = vcombine.high %v937_v14, %v941_v18 }
  0x60   :  { %5793 = vmatprep.subr.bf16.mxu0 %v6573_v24 }
  0x62   :  { %799 = vmatmul.mubr.bf16.vlgmr.msra.gmra.mrb[8].mxu0 %v212_v1  ;;  %v925_v1 = vld [vmem:[%s8576_s3 + $0x128] sm:$0xff] }
  0x63   :  { %5794 = vmatpush3.bf16.msra.mxu0 %v5924_v23  ;;  %5809 = vmatprep.mubr.msk.bf16.mxu0 %vm6574_vm0, %v6573_v24  ;;  %v5131_v5 = vcombine.high %v921_v0, %v925_v1  ;;  %v5130_v12 = vcombine.low %v921_v0, %v925_v1  ;;  %v5144_v23 = vcombine.low %v936_v16, %v940_v17  ;;  %v910_v16 = vld [vmem:[%s8576_s3 + $0xb0] sm:$0xff]  ;;  %v907_v17 = vld [vmem:[%s8576_s3 + $0x98] sm:$0xff] }
  0x64   :  { %5795 = vmatprep.subr.bf16.mxu0 %v6573_v24 }
  0x67   :  { %5796 = vmatpush3.bf16.msra.mxu0 %v5925_v25  ;;  %v944_v25 = vld [vmem:[%s8576_s3 + $0x1c0] sm:$0xff] }
  0x68   :  { %5797 = vmatprep.subr.bf16.mxu0 %v6573_v24 }
  0x6b   :  { %5798 = vmatpush3.bf16.msra.mxu0 %v5926_v26  ;;  %v948_v26 = vld [vmem:[%s8576_s3 + $0x1e0] sm:$0xff] }
  0x6c   :  { %5799 = vmatprep.subr.bf16.mxu0 %v6573_v24 }
  0x6f   :  { %5800 = vmatpush3.bf16.msra.mxu0 %v5927_v27  ;;  %v945_v27 = vld [vmem:[%s8576_s3 + $0x1c8] sm:$0xff] }
  0x70   :  { %5801 = vmatprep.subr.bf16.mxu0 %v6573_v24 }
  0x73   :  { %5802 = vmatpush3.bf16.msra.mxu0 %v5928_v28  ;;  %v5153_v28 = vcombine.high %v944_v25, %v948_v26 }
  0x74   :  { %5803 = vmatprep.subr.bf16.mxu0 %v6573_v24 }
  0x77   :  { %5804 = vmatpush3.bf16.msra.mxu0 %v5929_v29  ;;  %v949_v29 = vld [vmem:[%s8576_s3 + $0x1e8] sm:$0xff] }
  0x78   :  { %5805 = vmatprep.subr.bf16.mxu0 %v6573_v24  ;;  %v5155_v32 = vcombine.high %v945_v27, %v949_v29 }
  0x7b   :  { %5806 = vmatpush3.bf16.msra.mxu0 %v5930_v30  ;;  %v5152_v30 = vcombine.low %v944_v25, %v948_v26  ;;  %v915_v25 = vld [vmem:[%s8576_s3 + $0xd8] sm:$0xff] }
  0x7c   :  { %5807 = vmatprep.subr.bf16.mxu0 %v6573_v24  ;;  %v5146_v24 = vcombine.low %v937_v14, %v941_v18  ;;  %v911_v14 = vld [vmem:[%s8576_s3 + $0xb8] sm:$0xff] }
  0x7d   :  { %v919_v26 = vld [vmem:[%s8576_s3 + $0xf8] sm:$0xff] }
  0x7f   :  { %5808 = vmatpush3.bf16.msra.mxu0 %v5931_v31  ;;  %v5154_v31 = vcombine.low %v945_v27, %v949_v29 }
  0x80   :  { %1355 = vmatprep.subr.bf16.mxu0 %v5099_v41  ;;  %v6575_v41 = vmov 0  }
  0x81   :  { %1346 = vmatprep.mubr.bf16.mxu1 %v6575_v41 }
  0x82   :  { %5810 = vmatmul.mubr.bf16.vlgmr.msra.gmra.mrb[12].mxu0 %v244_v13  ;;  %v5137_v13 = vcombine.high %v928_v6, %v932_v7  ;;  %v899_v6 = vld [vmem:[%s8576_s3 + $0x58] sm:$0xff] }
  0x83   :  { %1356 = vmatpush1.bf16.msra.mxu0 %v5098_v40  ;;  %v5103_v40 = vcombine.high %v891_v35, %v895_v37  ;;  %1387 = vmatprep.mubr.bf16.mxu0 %v6575_v41  ;;  %v903_v7 = vld [vmem:[%s8576_s3 + $0x78] sm:$0xff] }
  0x84   :  { %1357 = vmatprep.subr.bf16.mxu0 %v5107_v46  ;;  %1324 = vmatprep.subr.bf16.mxu1 %v5137_v13 }
  0x85   :  { %1325 = vmatpush1.bf16.msra.mxu1 %v5136_v19 }
  0x86   :  { %1326 = vmatprep.subr.bf16.mxu1 %v5145_v21 }
  0x87   :  { %1358 = vmatpush1.bf16.msra.mxu0 %v5106_v51 }
  0x88   :  { %1359 = vmatprep.subr.bf16.mxu0 %v5115_v53 }
  0x89   :  { %1327 = vmatpush1.bf16.msra.mxu1 %v5144_v23  ;;  %v914_v23 = vld [vmem:[%s8576_s3 + $0xd0] sm:$0xff] }
  0x8a   :  { %1328 = vmatprep.subr.bf16.mxu1 %v5153_v28  ;;  %v5119_v28 = vcombine.high %v907_v17, %v911_v14 }
  0x8b   :  { %1360 = vmatpush1.bf16.msra.mxu0 %v5114_v59 }
  0x8c   :  { %1361 = vmatprep.subr.bf16.mxu0 %v5123_v61 }
  0x8d   :  { %1329 = vmatpush1.bf16.msra.mxu1 %v5152_v30  ;;  %v5118_v30 = vcombine.low %v907_v17, %v911_v14  ;;  %v5952_v17 = vld [vmem:[%s8577_s5 + $0xac] ss:$28 sps:$4 sm:$0xff]   ;;  %v5955_v14 = vld [vmem:[%s8577_s5 + $0xb4] ss:$28 sps:$4 sm:$0xff]  }
  0x8e   :  { %1396 = vmatprep.subr.bf16.mxu1 %v5101_v36  ;;  %v5127_v36 = vcombine.high %v915_v25, %v919_v26 }
  0x8f   :  { %1362 = vmatpush1.bf16.msra.mxu0 %v5122_v3 }
  0x90   :  { %1363 = vmatprep.subr.bf16.mxu0 %v5131_v5  ;;  %v902_v5 = vld [vmem:[%s8576_s3 + $0x70] sm:$0xff] }
  0x91   :  { %v5109_v19 = vcombine.high %v898_v4, %v902_v5  ;;  %v5108_v21 = vcombine.low %v898_v4, %v902_v5  ;;  %v5932_v5 = vld [vmem:[%s8577_s5] ss:$28 sps:$4 sm:$0xff]  }
  0x93   :  { %1364 = vmatpush1.bf16.msra.mxu0 %v5130_v12 }
  0x94   :  { %1365 = vmatprep.subr.bf16.mxu0 %v5139_v15  ;;  %v906_v15 = vld [vmem:[%s8576_s3 + $0x90] sm:$0xff] }
  0x95   :  { %v5117_v27 = vcombine.high %v906_v15, %v910_v16  ;;  %v5116_v29 = vcombine.low %v906_v15, %v910_v16  ;;  %v5944_v15 = vld [vmem:[%s8577_s5 + $0x70] ss:$28 sps:$4 sm:$0xff]   ;;  %v5947_v16 = vld [vmem:[%s8577_s5 + $0x78] ss:$28 sps:$4 sm:$0xff]  }
  0x97   :  { %1366 = vmatpush1.bf16.msra.mxu0 %v5138_v20  ;;  %v5111_v20 = vcombine.high %v899_v6, %v903_v7 }
  0x98   :  { %1367 = vmatprep.subr.bf16.mxu0 %v5147_v22  ;;  %v5110_v22 = vcombine.low %v899_v6, %v903_v7  ;;  %v5935_v6 = vld [vmem:[%s8577_s5 + $0x8] ss:$28 sps:$4 sm:$0xff]   ;;  %v5940_v7 = vld [vmem:[%s8577_s5 + $0x3c] ss:$28 sps:$4 sm:$0xff]  }
  0x9b   :  { %1368 = vmatpush1.bf16.msra.mxu0 %v5146_v24  ;;  %v918_v24 = vld [vmem:[%s8576_s3 + $0xf0] sm:$0xff] }
  0x9c   :  { %1369 = vmatprep.subr.bf16.mxu0 %v5155_v32  ;;  %v926_v32 = vld [vmem:[%s8576_s3 + $0x130] sm:$0xff]  ;;  %v5125_v35 = vcombine.high %v914_v23, %v918_v24  ;;  %v5124_v37 = vcombine.low %v914_v23, %v918_v24  ;;  %v5959_v23 = vld [vmem:[%s8577_s5 + $0xe8] ss:$28 sps:$4 sm:$0xff]   ;;  %v5964_v24 = vld [vmem:[%s8577_s5 + $0x11c] ss:$28 sps:$4 sm:$0xff]  }
  0x9f   :  { %1370 = vmatpush1.bf16.msra.mxu0 %v5154_v31  ;;  %v922_v31 = vld [vmem:[%s8576_s3 + $0x110] sm:$0xff] }
  0xa0   :  { %1437 = vmatprep.subr.bf16.mxu0 %v5103_v40  ;;  %v934_v40 = vld [vmem:[%s8576_s3 + $0x170] sm:$0xff] }
  0xf5   :  { %v5624_v42 = vpop.f32.mrb[0].mxu0 }
  0xf6   :  { %v5625_v43 = vpop.f32.mrb[1].mxu0 }
  0xf7   :  { %v5626_v44 = vadd.f32 %v5625_v43, %v5624_v42  ;;  %v5627_v45 = vpop.f32.mrb[2].mxu0  ;;  %v935_v42 = vld [vmem:[%s8576_s3 + $0x178] sm:$0xff]  ;;  %v5133_v43 = vcombine.high %v922_v31, %v926_v32 }
  0xf8   :  { %v5628_v46 = vpop.f32.mrb[3].mxu0  ;;  %v5132_v45 = vcombine.low %v922_v31, %v926_v32  ;;  %v5971_v31 = vld [vmem:[%s8577_s5 + $0x158] ss:$28 sps:$4 sm:$0xff]   ;;  %v5976_v32 = vld [vmem:[%s8577_s5 + $0x18c] ss:$28 sps:$4 sm:$0xff]  }
  0xf9   :  { %v721_v50 = vadd.f32 %v5626_v44, %v5022_v47  ;;  %v5135_v44 = vcombine.high %v923_v33, %v927_v34  ;;  %v5134_v46 = vcombine.low %v923_v33, %v927_v34  ;;  %v938_v47 = vld [vmem:[%s8576_s3 + $0x190] sm:$0xff]  ;;  %v5974_v34 = vld [vmem:[%s8577_s5 + $0x188] ss:$28 sps:$4 sm:$0xff]  }
  0xfa   :  { %v5979_v33 = vld [vmem:[%s8577_s5 + $0x194] ss:$28 sps:$4 sm:$0xff]  }
  0xfc   :  { %v5690_v54 = vpop.f32.mrb[0].mxu1 }
  0xfd   :  { %v5691_v56 = vpop.f32.mrb[1].mxu1 }
  0xfe   :  { %v5692_v57 = vadd.f32 %v5691_v56, %v5690_v54  ;;  %v5693_v58 = vpop.f32.mrb[2].mxu1  ;;  %v950_v56 = vld [vmem:[%s8576_s3 + $0x1f0] sm:$0xff] }
  0xff   :  { %v5694_v59 = vpop.f32.mrb[3].mxu1  ;;  %v951_v58 = vld [vmem:[%s8576_s3 + $0x1f8] sm:$0xff] }
 0x115   :  { %v5646_v48 = vpop.f32.mrb[4].mxu0 }
 0x116   :  { %v5647_v49 = vpop.f32.mrb[5].mxu0 }
 0x117   :  { %v5648_v51 = vadd.f32 %v5647_v49, %v5646_v48  ;;  %v5649_v52 = vpop.f32.mrb[6].mxu0  ;;  %v942_v48 = vld [vmem:[%s8576_s3 + $0x1b0] sm:$0xff]  ;;  %v939_v49 = vld [vmem:[%s8576_s3 + $0x198] sm:$0xff] }
 0x118   :  { %v5650_v53 = vpop.f32.mrb[7].mxu0  ;;  %v5149_v59 = vcombine.high %v938_v47, %v942_v48 }
 0x119   :  { %v761_v55 = vadd.f32 %v5648_v51, %v721_v50  ;;  %v943_v50 = vld [vmem:[%s8576_s3 + $0x1b8] sm:$0xff] }
 0x135   :  { %v5668_v60 = vpop.f32.mrb[8].mxu0 }
 0x136   :  { %v5669_v61 = vpop.f32.mrb[9].mxu0 }
 0x137   :  { %v5670_v62 = vadd.f32 %v5669_v61, %v5668_v60  ;;  %v5671_v63 = vpop.f32.mrb[10].mxu0  ;;  %v5151_v60 = vcombine.high %v939_v49, %v943_v50  ;;  %v5148_v61 = vcombine.low %v938_v47, %v942_v48  ;;  %v5995_v47 = vld [vmem:[%s8577_s5 + $0x238] ss:$28 sps:$4 sm:$0xff]   ;;  %v6000_v48 = vld [vmem:[%s8577_s5 + $0x26c] ss:$28 sps:$4 sm:$0xff]  }
 0x138   :  { %v5672_v0 = vpop.f32.mrb[11].mxu0 }
 0x139   :  { %v801_v1 = vadd.f32 %v5670_v62, %v761_v55  ;;  %v946_v55 = vld [vmem:[%s8576_s3 + $0x1d0] sm:$0xff]  ;;  %v5150_v62 = vcombine.low %v939_v49, %v943_v50  ;;  %v5998_v50 = vld [vmem:[%s8577_s5 + $0x268] ss:$28 sps:$4 sm:$0xff]  }
 0x13a   :  { %v5157_v63 = vcombine.high %v946_v55, %v950_v56  ;;  %v6003_v49 = vld [vmem:[%s8577_s5 + $0x274] ss:$28 sps:$4 sm:$0xff]  }
 0x13b   :  { %v841_v2 = vadd.f32 %v5692_v57, %v801_v1  ;;  %v947_v57 = vld [vmem:[%s8576_s3 + $0x1d8] sm:$0xff]  ;;  %v5934_v1 = vld [vmem:[%s8577_s5 + $0x4] ss:$28 sps:$4 sm:$0xff]  }
 0x13c   :  { %v5159_v0 = vcombine.high %v947_v57, %v951_v58  ;;  %v5158_v4 = vcombine.low %v947_v57, %v951_v58  ;;  %v6015_v57 = vld [vmem:[%s8577_s5 + $0x2e4] ss:$28 sps:$4 sm:$0xff]   ;;  %v6010_v58 = vld [vmem:[%s8577_s5 + $0x2d8] ss:$28 sps:$4 sm:$0xff]  }
 0x155   :  { %v880_v3 = vpop.f32.mrb[12].mxu0 }
 0x156   :  { %v881_v8 = vadd.f32 %v880_v3, %v841_v2  ;;  %v5811_v9 = vpop.f32.mrb[13].mxu0  ;;  %v5937_v2 = vld [vmem:[%s8577_s5 + $0xc] ss:$28 sps:$4 sm:$0xff]   ;;  %v5156_v3 = vcombine.low %v946_v55, %v950_v56  ;;  %v6012_v56 = vld [vmem:[%s8577_s5 + $0x2dc] ss:$28 sps:$4 sm:$0xff]  }
 0x157   :  { %v883_v10 = vpop.f32.mrb[14].mxu0  ;;  %v5938_v9 = vld [vmem:[%s8577_s5 + $0x38] ss:$28 sps:$4 sm:$0xff]   ;;  %v6007_v55 = vld [vmem:[%s8577_s5 + $0x2a8] ss:$28 sps:$4 sm:$0xff]  }
 0x158   :  { %v886_v12 = vmax.f32 %v881_v8, 0.0  ;;  %v5812_v13 = vpop.f32.mrb[15].mxu0  ;;  %v5943_v8 = vld [vmem:[%s8577_s5 + $0x44] ss:$28 sps:$4 sm:$0xff]  }
 0x159   :  { %v5941_v10 = vld [vmem:[%s8577_s5 + $0x40] ss:$28 sps:$4 sm:$0xff]  }
 0x15a   :  { %v7002_v18 = vpack.c.bf16 %v886_v12, %v886_v12  ;;  %v5946_v12 = vld [vmem:[%s8577_s5 + $0x74] ss:$28 sps:$4 sm:$0xff]   ;;  %v5949_v13 = vld [vmem:[%s8577_s5 + $0x7c] ss:$28 sps:$4 sm:$0xff]  }
 0x15c   :  { %1347 = vmatmul.mubr.bf16.vlgmr.msra.gmra.mrb[4].mxu1 %v7002_v18  ;;  %1388 = vmatmul.mubr.bf16.vlgmr.msra.gmra.mrb[16].mxu0 %v7002_v18 }
 0x15d   :  { %1397 = vmatpush1.bf16.msra.mxu1 %v5100_v38  ;;  %1438 = vmatpush1.bf16.msra.mxu0 %v5102_v39  ;;  %v5126_v38 = vcombine.low %v915_v25, %v919_v26  ;;  %v930_v39 = vld [vmem:[%s8576_s3 + $0x150] sm:$0xff]  ;;  %v5967_v25 = vld [vmem:[%s8577_s5 + $0x124] ss:$28 sps:$4 sm:$0xff]  }
 0x15e   :  { %1398 = vmatprep.subr.bf16.mxu1 %v5109_v19  ;;  %1439 = vmatprep.subr.bf16.mxu0 %v5111_v20  ;;  %v5141_v51 = vcombine.high %v930_v39, %v934_v40  ;;  %v5140_v53 = vcombine.low %v930_v39, %v934_v40  ;;  %v5953_v19 = vld [vmem:[%s8577_s5 + $0xb0] ss:$28 sps:$4 sm:$0xff]   ;;  %v5958_v20 = vld [vmem:[%s8577_s5 + $0xe4] ss:$28 sps:$4 sm:$0xff]   ;;  %v5962_v26 = vld [vmem:[%s8577_s5 + $0x118] ss:$28 sps:$4 sm:$0xff]  }
 0x15f   :  { %1428 = vmatprep.mubr.bf16.mxu1 %v6575_v41  ;;  %1469 = vmatprep.mubr.bf16.mxu0 %v6575_v41  ;;  %v931_v41 = vld [vmem:[%s8576_s3 + $0x158] sm:$0xff]  ;;  %v5983_v39 = vld [vmem:[%s8577_s5 + $0x1c8] ss:$28 sps:$4 sm:$0xff]  }
 0x160   :  { %v5143_v52 = vcombine.high %v931_v41, %v935_v42  ;;  %v5142_v54 = vcombine.low %v931_v41, %v935_v42  ;;  %v5988_v40 = vld [vmem:[%s8577_s5 + $0x1fc] ss:$28 sps:$4 sm:$0xff]   ;;  %v5991_v41 = vld [vmem:[%s8577_s5 + $0x204] ss:$28 sps:$4 sm:$0xff]  }
 0x161   :  { %1399 = vmatpush1.bf16.msra.mxu1 %v5108_v21  ;;  %1440 = vmatpush1.bf16.msra.mxu0 %v5110_v22  ;;  %v5961_v21 = vld [vmem:[%s8577_s5 + $0xec] ss:$28 sps:$4 sm:$0xff]   ;;  %v5956_v22 = vld [vmem:[%s8577_s5 + $0xe0] ss:$28 sps:$4 sm:$0xff]   ;;  %v5986_v42 = vld [vmem:[%s8577_s5 + $0x1f8] ss:$28 sps:$4 sm:$0xff]  }
 0x162   :  { %1400 = vmatprep.subr.bf16.mxu1 %v5117_v27  ;;  %1441 = vmatprep.subr.bf16.mxu0 %v5119_v28  ;;  %v5965_v27 = vld [vmem:[%s8577_s5 + $0x120] ss:$28 sps:$4 sm:$0xff]   ;;  %v5970_v28 = vld [vmem:[%s8577_s5 + $0x154] ss:$28 sps:$4 sm:$0xff]  }
 0x165   :  { %1401 = vmatpush1.bf16.msra.mxu1 %v5116_v29  ;;  %1442 = vmatpush1.bf16.msra.mxu0 %v5118_v30  ;;  %v5973_v29 = vld [vmem:[%s8577_s5 + $0x15c] ss:$28 sps:$4 sm:$0xff]   ;;  %v5968_v30 = vld [vmem:[%s8577_s5 + $0x150] ss:$28 sps:$4 sm:$0xff]  }
 0x166   :  { %1402 = vmatprep.subr.bf16.mxu1 %v5125_v35  ;;  %1443 = vmatprep.subr.bf16.mxu0 %v5127_v36  ;;  %v5977_v35 = vld [vmem:[%s8577_s5 + $0x190] ss:$28 sps:$4 sm:$0xff]   ;;  %v5982_v36 = vld [vmem:[%s8577_s5 + $0x1c4] ss:$28 sps:$4 sm:$0xff]  }
 0x169   :  { %1403 = vmatpush1.bf16.msra.mxu1 %v5124_v37  ;;  %1444 = vmatpush1.bf16.msra.mxu0 %v5126_v38  ;;  %v5985_v37 = vld [vmem:[%s8577_s5 + $0x1cc] ss:$28 sps:$4 sm:$0xff]   ;;  %v5980_v38 = vld [vmem:[%s8577_s5 + $0x1c0] ss:$28 sps:$4 sm:$0xff]  }
 0x16a   :  { %1404 = vmatprep.subr.bf16.mxu1 %v5133_v43  ;;  %1445 = vmatprep.subr.bf16.mxu0 %v5135_v44  ;;  %v5989_v43 = vld [vmem:[%s8577_s5 + $0x200] ss:$28 sps:$4 sm:$0xff]   ;;  %v5994_v44 = vld [vmem:[%s8577_s5 + $0x234] ss:$28 sps:$4 sm:$0xff]  }
 0x16d   :  { %1405 = vmatpush1.bf16.msra.mxu1 %v5132_v45  ;;  %1446 = vmatpush1.bf16.msra.mxu0 %v5134_v46  ;;  %v5997_v45 = vld [vmem:[%s8577_s5 + $0x23c] ss:$28 sps:$4 sm:$0xff]   ;;  %v5992_v46 = vld [vmem:[%s8577_s5 + $0x230] ss:$28 sps:$4 sm:$0xff]  }
 0x16e   :  { %1406 = vmatprep.subr.bf16.mxu1 %v5141_v51  ;;  %1447 = vmatprep.subr.bf16.mxu0 %v5143_v52  ;;  %v6001_v51 = vld [vmem:[%s8577_s5 + $0x270] ss:$28 sps:$4 sm:$0xff]   ;;  %v6006_v52 = vld [vmem:[%s8577_s5 + $0x2a4] ss:$28 sps:$4 sm:$0xff]  }
 0x171   :  { %1407 = vmatpush1.bf16.msra.mxu1 %v5140_v53  ;;  %1448 = vmatpush1.bf16.msra.mxu0 %v5142_v54  ;;  %v6009_v53 = vld [vmem:[%s8577_s5 + $0x2ac] ss:$28 sps:$4 sm:$0xff]   ;;  %v6004_v54 = vld [vmem:[%s8577_s5 + $0x2a0] ss:$28 sps:$4 sm:$0xff]  }
 0x172   :  { %1408 = vmatprep.subr.bf16.mxu1 %v5149_v59  ;;  %1449 = vmatprep.subr.bf16.mxu0 %v5151_v60  ;;  %v6013_v59 = vld [vmem:[%s8577_s5 + $0x2e0] ss:$28 sps:$4 sm:$0xff]   ;;  %v6018_v60 = vld [vmem:[%s8577_s5 + $0x314] ss:$28 sps:$4 sm:$0xff]  }
 0x175   :  { %1409 = vmatpush1.bf16.msra.mxu1 %v5148_v61  ;;  %1450 = vmatpush1.bf16.msra.mxu0 %v5150_v62  ;;  %v6021_v61 = vld [vmem:[%s8577_s5 + $0x31c] ss:$28 sps:$4 sm:$0xff]   ;;  %v6016_v62 = vld [vmem:[%s8577_s5 + $0x310] ss:$28 sps:$4 sm:$0xff]  }
 0x176   :  { %1410 = vmatprep.subr.bf16.mxu1 %v5157_v63  ;;  %1451 = vmatprep.subr.bf16.mxu0 %v5159_v0  ;;  %v6019_v63 = vld [vmem:[%s8577_s5 + $0x318] ss:$28 sps:$4 sm:$0xff]   ;;  %v6024_v0 = vld [vmem:[%s8577_s5 + $0x34c] ss:$28 sps:$4 sm:$0xff]  }
 0x179   :  { %1411 = vmatpush1.bf16.msra.mxu1 %v5156_v3  ;;  %1452 = vmatpush1.bf16.msra.mxu0 %v5158_v4  ;;  %v6025_v3 = vld [vmem:[%s8577_s5 + $0x350] ss:$28 sps:$4 sm:$0xff]   ;;  %v6030_v4 = vld [vmem:[%s8577_s5 + $0x384] ss:$28 sps:$4 sm:$0xff]  }
 0x17a   :  { %4347 = vmatprep.subr.bf16.mxu1 %v5934_v1  ;;  %4511 = vmatprep.subr.bf16.mxu0 %v5937_v2  ;;  %v6027_v1 = vld [vmem:[%s8577_s5 + $0x354] ss:$28 sps:$4 sm:$0xff]   ;;  %v6022_v2 = vld [vmem:[%s8577_s5 + $0x348] ss:$28 sps:$4 sm:$0xff]  }
 0x17c   :  { %1429 = vmatmul.mubr.bf16.vlgmr.msra.gmra.mrb[8].mxu1 %v7002_v18  ;;  %1470 = vmatmul.mubr.bf16.vlgmr.msra.gmra.mrb[20].mxu0 %v7002_v18  ;;  %v5950_v18 = vld [vmem:[%s8577_s5 + $0xa8] ss:$28 sps:$4 sm:$0xff]  }
 0x17d   :  { %4348 = vmatpush1.bf16.msra.mxu1 %v5932_v5  ;;  %4512 = vmatpush1.bf16.msra.mxu0 %v5935_v6  ;;  %v6033_v5 = vld [vmem:[%s8577_s5 + $0x38c] ss:$28 sps:$4 sm:$0xff]   ;;  %v956_v6 = vsub.s32 0, %v6637_v11 }
 0x17e   :  { %4349 = vmatprep.subr.bf16.mxu1 %v5940_v7  ;;  %4513 = vmatprep.subr.bf16.mxu0 %v5943_v8  ;;  %v7272_v7 = vld [vmem:[%s8579_s4] sm:$0xff]  ;;  %v960_v8 = vsub.s32 1, %v6637_v11 }
 0x181   :  { %4350 = vmatpush1.bf16.msra.mxu1 %v5938_v9  ;;  %4514 = vmatpush1.bf16.msra.mxu0 %v5941_v10  ;;  %v968_v9 = vsub.s32 3, %v6637_v11  ;;  %v957_v10 = vrot.slane %v7272_v7, %v956_v6 }
 0x182   :  { %4351 = vmatprep.subr.bf16.mxu1 %v5946_v12  ;;  %4515 = vmatprep.subr.bf16.mxu0 %v5949_v13  ;;  %v961_v12 = vrot.slane %v7272_v7, %v960_v8 }
 0x183   :  { %v969_v13 = vrot.slane %v7272_v7, %v968_v9 }
 0x185   :  { %4352 = vmatpush1.bf16.msra.mxu1 %v5944_v15  ;;  %4516 = vmatpush1.bf16.msra.mxu0 %v5947_v16 }
 0x186   :  { %4353 = vmatprep.subr.bf16.mxu1 %v5952_v17  ;;  %4517 = vmatprep.subr.bf16.mxu0 %v5955_v14 }
 0x189   :  { %4354 = vmatpush1.bf16.msra.mxu1 %v5950_v18  ;;  %4518 = vmatpush1.bf16.msra.mxu0 %v5953_v19 }
 0x18a   :  { %4355 = vmatprep.subr.bf16.mxu1 %v5958_v20  ;;  %4519 = vmatprep.subr.bf16.mxu0 %v5961_v21 }
 0x18d   :  { %4356 = vmatpush1.bf16.msra.mxu1 %v5956_v22  ;;  %4520 = vmatpush1.bf16.msra.mxu0 %v5959_v23 }
 0x18e   :  { %4357 = vmatprep.subr.bf16.mxu1 %v5964_v24  ;;  %4521 = vmatprep.subr.bf16.mxu0 %v5967_v25 }
 0x191   :  { %4358 = vmatpush1.bf16.msra.mxu1 %v5962_v26  ;;  %4522 = vmatpush1.bf16.msra.mxu0 %v5965_v27 }
 0x192   :  { %4359 = vmatprep.subr.bf16.mxu1 %v5970_v28  ;;  %4523 = vmatprep.subr.bf16.mxu0 %v5973_v29  ;;  %v6028_v29 = vld [vmem:[%s8577_s5 + $0x380] ss:$28 sps:$4 sm:$0xff]  }
 0x195   :  { %4360 = vmatpush1.bf16.msra.mxu1 %v5968_v30  ;;  %4524 = vmatpush1.bf16.msra.mxu0 %v5971_v31  ;;  %v6031_v30 = vld [vmem:[%s8577_s5 + $0x388] ss:$28 sps:$4 sm:$0xff]  }
 0x196   :  { %4361 = vmatprep.subr.bf16.mxu1 %v5976_v32  ;;  %4525 = vmatprep.subr.bf16.mxu0 %v5979_v33  ;;  %v6036_v32 = vld [vmem:[%s8577_s5 + $0x3bc] ss:$28 sps:$4 sm:$0xff]   ;;  %v6039_v33 = vld [vmem:[%s8577_s5 + $0x3c4] ss:$28 sps:$4 sm:$0xff]  }
 0x199   :  { %4362 = vmatpush1.bf16.msra.mxu1 %v5974_v34  ;;  %4526 = vmatpush1.bf16.msra.mxu0 %v5977_v35  ;;  %v6034_v35 = vld [vmem:[%s8577_s5 + $0x3b8] ss:$28 sps:$4 sm:$0xff]  }
 0x19a   :  { %4363 = vmatprep.subr.bf16.mxu1 %v5982_v36  ;;  %4527 = vmatprep.subr.bf16.mxu0 %v5985_v37  ;;  %v6037_v36 = vld [vmem:[%s8577_s5 + $0x3c0] ss:$28 sps:$4 sm:$0xff]   ;;  %v6042_v37 = vld [vmem:[%s8577_s5 + $0x3f4] ss:$28 sps:$4 sm:$0xff]  }
 0x19d   :  { %4364 = vmatpush1.bf16.msra.mxu1 %v5980_v38  ;;  %4528 = vmatpush1.bf16.msra.mxu0 %v5983_v39  ;;  %v6045_v38 = vld [vmem:[%s8577_s5 + $0x3fc] ss:$28 sps:$4 sm:$0xff]   ;;  %v6040_v39 = vld [vmem:[%s8577_s5 + $0x3f0] ss:$28 sps:$4 sm:$0xff]  }
 0x19e   :  { %4365 = vmatprep.subr.bf16.mxu1 %v5988_v40  ;;  %4529 = vmatprep.subr.bf16.mxu0 %v5991_v41  ;;  %v6043_v40 = vld [vmem:[%s8577_s5 + $0x3f8] ss:$28 sps:$4 sm:$0xff]   ;;  %v6048_v41 = vld [vmem:[%s8577_s5 + $0x42c] ss:$28 sps:$4 sm:$0xff]  }
 0x1a1   :  { %4366 = vmatpush1.bf16.msra.mxu1 %v5986_v42  ;;  %4530 = vmatpush1.bf16.msra.mxu0 %v5989_v43  ;;  %v6051_v42 = vld [vmem:[%s8577_s5 + $0x434] ss:$28 sps:$4 sm:$0xff]   ;;  %v6046_v43 = vld [vmem:[%s8577_s5 + $0x428] ss:$28 sps:$4 sm:$0xff]  }
 0x1a2   :  { %4367 = vmatprep.subr.bf16.mxu1 %v5994_v44  ;;  %4531 = vmatprep.subr.bf16.mxu0 %v5997_v45  ;;  %v6049_v44 = vld [vmem:[%s8577_s5 + $0x430] ss:$28 sps:$4 sm:$0xff]   ;;  %v6054_v45 = vld [vmem:[%s8577_s5 + $0x464] ss:$28 sps:$4 sm:$0xff]  }
 0x1a5   :  { %4368 = vmatpush1.bf16.msra.mxu1 %v5992_v46  ;;  %4532 = vmatpush1.bf16.msra.mxu0 %v5995_v47  ;;  %v6057_v46 = vld [vmem:[%s8577_s5 + $0x46c] ss:$28 sps:$4 sm:$0xff]   ;;  %v6052_v47 = vld [vmem:[%s8577_s5 + $0x460] ss:$28 sps:$4 sm:$0xff]  }
 0x1a6   :  { %4369 = vmatprep.subr.bf16.mxu1 %v6000_v48  ;;  %4533 = vmatprep.subr.bf16.mxu0 %v6003_v49  ;;  %v6055_v48 = vld [vmem:[%s8577_s5 + $0x468] ss:$28 sps:$4 sm:$0xff]   ;;  %v6060_v49 = vld [vmem:[%s8577_s5 + $0x49c] ss:$28 sps:$4 sm:$0xff]  }
 0x1a9   :  { %4370 = vmatpush1.bf16.msra.mxu1 %v5998_v50  ;;  %4534 = vmatpush1.bf16.msra.mxu0 %v6001_v51  ;;  %v6063_v50 = vld [vmem:[%s8577_s5 + $0x4a4] ss:$28 sps:$4 sm:$0xff]   ;;  %v6058_v51 = vld [vmem:[%s8577_s5 + $0x498] ss:$28 sps:$4 sm:$0xff]  }
 0x1aa   :  { %4371 = vmatprep.subr.bf16.mxu1 %v6006_v52  ;;  %4535 = vmatprep.subr.bf16.mxu0 %v6009_v53  ;;  %v6061_v52 = vld [vmem:[%s8577_s5 + $0x4a0] ss:$28 sps:$4 sm:$0xff]   ;;  %v6066_v53 = vld [vmem:[%s8577_s5 + $0x4d4] ss:$28 sps:$4 sm:$0xff]  }
 0x1ad   :  { %4372 = vmatpush1.bf16.msra.mxu1 %v6004_v54  ;;  %4536 = vmatpush1.bf16.msra.mxu0 %v6007_v55  ;;  %v6069_v54 = vld [vmem:[%s8577_s5 + $0x4dc] ss:$28 sps:$4 sm:$0xff]   ;;  %v6064_v55 = vld [vmem:[%s8577_s5 + $0x4d0] ss:$28 sps:$4 sm:$0xff]  }
 0x1ae   :  { %4373 = vmatprep.subr.bf16.mxu1 %v6012_v56  ;;  %4537 = vmatprep.subr.bf16.mxu0 %v6015_v57  ;;  %v6067_v56 = vld [vmem:[%s8577_s5 + $0x4d8] ss:$28 sps:$4 sm:$0xff]   ;;  %v6072_v57 = vld [vmem:[%s8577_s5 + $0x50c] ss:$28 sps:$4 sm:$0xff]  }
 0x1b1   :  { %4374 = vmatpush1.bf16.msra.mxu1 %v6010_v58  ;;  %4538 = vmatpush1.bf16.msra.mxu0 %v6013_v59  ;;  %v6075_v58 = vld [vmem:[%s8577_s5 + $0x514] ss:$28 sps:$4 sm:$0xff]  }
 0x1b2   :  { %4375 = vmatprep.subr.bf16.mxu1 %v6018_v60  ;;  %4539 = vmatprep.subr.bf16.mxu0 %v6021_v61 }
 0x1b5   :  { %4376 = vmatpush1.bf16.msra.mxu1 %v6016_v62  ;;  %4540 = vmatpush1.bf16.msra.mxu0 %v6019_v63 }
 0x1b6   :  { %4377 = vmatprep.subr.bf16.mxu1 %v6024_v0  ;;  %4541 = vmatprep.subr.bf16.mxu0 %v6027_v1  ;;  %v6070_v1 = vld [vmem:[%s8577_s5 + $0x508] ss:$28 sps:$4 sm:$0xff]  }
 0x1b9   :  { %4378 = vmatpush1.bf16.msra.mxu1 %v6022_v2  ;;  %4542 = vmatpush1.bf16.msra.mxu0 %v6025_v3  ;;  %v6073_v2 = vld [vmem:[%s8577_s5 + $0x510] ss:$28 sps:$4 sm:$0xff]  }
 0x1ba   :  { %4388 = vmatprep.subr.bf16.mxu1 %v6030_v4  ;;  %4552 = vmatprep.subr.bf16.mxu0 %v6033_v5  ;;  %v6078_v5 = vld [vmem:[%s8577_s5 + $0x544] ss:$28 sps:$4 sm:$0xff]  }
 0x22f   :  { %v1348_v15 = vpop.f32.mrb[4].mxu1  ;;  %v7285_v16 = vpop.f32.mrb[16].mxu0 }
 0x230   :  { %v1349_v17 = vadd.f32 %v1348_v15, %v957_v10  ;;  %v1350_v14 = vpop.f32.mrb[5].mxu1  ;;  %v1391_v18 = vpop.f32.mrb[17].mxu0  ;;  %v6081_v10 = vld [vmem:[%s8577_s5 + $0x54c] ss:$28 sps:$4 sm:$0xff]   ;;  %v6084_v15 = vld [vmem:[%s8577_s5 + $0x57c] ss:$28 sps:$4 sm:$0xff]  }
 0x231   :  { %v1351_v19 = vadd.f32 %v1350_v14, %v961_v12  ;;  %v1392_v20 = vadd.f32 %v1391_v18, %v969_v13  ;;  %v1352_v21 = vpop.f32.mrb[6].mxu1  ;;  %v1393_v22 = vpop.f32.mrb[18].mxu0  ;;  %v6076_v12 = vld [vmem:[%s8577_s5 + $0x540] ss:$28 sps:$4 sm:$0xff]   ;;  %v6079_v13 = vld [vmem:[%s8577_s5 + $0x548] ss:$28 sps:$4 sm:$0xff]  }
 0x232   :  { %v1478_v23 = vmax.f32 %v1349_v17, 0.0  ;;  %v1353_v24 = vpop.f32.mrb[7].mxu1  ;;  %v1394_v25 = vpop.f32.mrb[19].mxu0  ;;  %v6087_v17 = vld [vmem:[%s8577_s5 + $0x584] ss:$28 sps:$4 sm:$0xff]  }
 0x233   :  { %v1479_v26 = vmax.f32 %v1351_v19, 0.0  ;;  %v1481_v27 = vmax.f32 %v1392_v20, 0.0  ;;  %v6082_v14 = vld [vmem:[%s8577_s5 + $0x578] ss:$28 sps:$4 sm:$0xff]   ;;  %v6085_v18 = vld [vmem:[%s8577_s5 + $0x580] ss:$28 sps:$4 sm:$0xff]  }
 0x234   :  { %v7295_v31 = vpack.c.bf16 %v1478_v23, %v1478_v23  ;;  %v6090_v19 = vld [vmem:[%s8577_s5 + $0x5b4] ss:$28 sps:$4 sm:$0xff]   ;;  %v6093_v20 = vld [vmem:[%s8577_s5 + $0x5bc] ss:$28 sps:$4 sm:$0xff]   ;;  %v6096_v23 = vld [vmem:[%s8577_s5 + $0x5ec] ss:$28 sps:$4 sm:$0xff]  }
 0x235   :  { %v7287_v28 = vpack.c.bf16 %v1479_v26, %v1479_v26  ;;  %v7305_v34 = vpack.c.bf16 %v1481_v27, %v1481_v27  ;;  %v6088_v21 = vld [vmem:[%s8577_s5 + $0x5b0] ss:$28 sps:$4 sm:$0xff]   ;;  %v6091_v22 = vld [vmem:[%s8577_s5 + $0x5b8] ss:$28 sps:$4 sm:$0xff]   ;;  %v6094_v25 = vld [vmem:[%s8577_s5 + $0x5e8] ss:$28 sps:$4 sm:$0xff]  }
 0x236   :  { %v6099_v24 = vld [vmem:[%s8577_s5 + $0x5f4] ss:$28 sps:$4 sm:$0xff]   ;;  %v6102_v27 = vld [vmem:[%s8577_s5 + $0x624] ss:$28 sps:$4 sm:$0xff]  }
 0x237   :  { %4379 = vmatprep.mubr.bf16.mxu1 %v7287_v28  ;;  %4543 = vmatprep.mubr.bf16.mxu0 %v7287_v28  ;;  %v6097_v26 = vld [vmem:[%s8577_s5 + $0x5f0] ss:$28 sps:$4 sm:$0xff]  }
 0x238   :  { %4380 = vmatmul.mubr.bf16.vlgmr.msra.gmra.mrb[12].mxu1 %v7295_v31  ;;  %4544 = vmatmul.mubr.bf16.vlgmr.msra.gmra.mrb[24].mxu0 %v7295_v31 }
 0x239   :  { %4389 = vmatpush1.bf16.msra.mxu1 %v6028_v29  ;;  %4553 = vmatpush1.bf16.msra.mxu0 %v6031_v30  ;;  %v6105_v29 = vld [vmem:[%s8577_s5 + $0x62c] ss:$28 sps:$4 sm:$0xff]   ;;  %v6100_v30 = vld [vmem:[%s8577_s5 + $0x620] ss:$28 sps:$4 sm:$0xff]  }
 0x23a   :  { %4420 = vmatprep.mubr.bf16.mxu1 %v7305_v34  ;;  %4584 = vmatprep.mubr.bf16.mxu0 %v7305_v34 }
 0x23b   :  { %4390 = vmatprep.subr.bf16.mxu1 %v6036_v32  ;;  %4554 = vmatprep.subr.bf16.mxu0 %v6039_v33  ;;  %v6103_v32 = vld [vmem:[%s8577_s5 + $0x628] ss:$28 sps:$4 sm:$0xff]   ;;  %v964_v33 = vsub.s32 2, %v6637_v11 }
 0x23d   :  { %4391 = vmatpush1.bf16.msra.mxu1 %v6034_v35  ;;  %4555 = vmatpush1.bf16.msra.mxu0 %v6037_v36  ;;  %v6108_v35 = vld [vmem:[%s8577_s5 + $0x65c] ss:$28 sps:$4 sm:$0xff]   ;;  %v6111_v36 = vld [vmem:[%s8577_s5 + $0x664] ss:$28 sps:$4 sm:$0xff]  }
 0x23e   :  { %4392 = vmatprep.subr.bf16.mxu1 %v6042_v37  ;;  %4556 = vmatprep.subr.bf16.mxu0 %v6045_v38  ;;  %v976_v37 = vsub.s32 5, %v6637_v11  ;;  %v6106_v38 = vld [vmem:[%s8577_s5 + $0x658] ss:$28 sps:$4 sm:$0xff]  }
 0x241   :  { %4393 = vmatpush1.bf16.msra.mxu1 %v6040_v39  ;;  %4557 = vmatpush1.bf16.msra.mxu0 %v6043_v40  ;;  %v6109_v39 = vld [vmem:[%s8577_s5 + $0x660] ss:$28 sps:$4 sm:$0xff]   ;;  %v965_v40 = vrot.slane %v7272_v7, %v964_v33 }
 0x242   :  { %4394 = vmatprep.subr.bf16.mxu1 %v6048_v41  ;;  %4558 = vmatprep.subr.bf16.mxu0 %v6051_v42  ;;  %v6114_v41 = vld [vmem:[%s8577_s5 + $0x694] ss:$28 sps:$4 sm:$0xff]   ;;  %v6117_v42 = vld [vmem:[%s8577_s5 + $0x69c] ss:$28 sps:$4 sm:$0xff]  }
 0x245   :  { %4395 = vmatpush1.bf16.msra.mxu1 %v6046_v43  ;;  %4559 = vmatpush1.bf16.msra.mxu0 %v6049_v44  ;;  %v977_v43 = vrot.slane %v7272_v7, %v976_v37  ;;  %v6112_v44 = vld [vmem:[%s8577_s5 + $0x690] ss:$28 sps:$4 sm:$0xff]  }
 0x246   :  { %4396 = vmatprep.subr.bf16.mxu1 %v6054_v45  ;;  %4560 = vmatprep.subr.bf16.mxu0 %v6057_v46  ;;  %v6115_v45 = vld [vmem:[%s8577_s5 + $0x698] ss:$28 sps:$4 sm:$0xff]   ;;  %v1390_v46 = vadd.f32 %v7285_v16, %v965_v40  ;;  %v6121_v16 = vld [vmem:[%s8577_s5 + $0x6d0] ss:$28 sps:$4 sm:$0xff]   ;;  %v6175_v40 = vld [vmem:[%s8577_s5 + $0x8c8] ss:$28 sps:$4 sm:$0xff]  }
 0x249   :  { %4397 = vmatpush1.bf16.msra.mxu1 %v6052_v47  ;;  %4561 = vmatpush1.bf16.msra.mxu0 %v6055_v48  ;;  %v6120_v47 = vld [vmem:[%s8577_s5 + $0x6cc] ss:$28 sps:$4 sm:$0xff]   ;;  %v6123_v48 = vld [vmem:[%s8577_s5 + $0x6d4] ss:$28 sps:$4 sm:$0xff]  }
 0x24a   :  { %4398 = vmatprep.subr.bf16.mxu1 %v6060_v49  ;;  %4562 = vmatprep.subr.bf16.mxu0 %v6063_v50  ;;  %v6118_v50 = vld [vmem:[%s8577_s5 + $0x6c8] ss:$28 sps:$4 sm:$0xff]  }
 0x24d   :  { %4399 = vmatpush1.bf16.msra.mxu1 %v6058_v51  ;;  %4563 = vmatpush1.bf16.msra.mxu0 %v6061_v52  ;;  %v1480_v51 = vmax.f32 %v1390_v46, 0.0  ;;  %v6126_v52 = vld [vmem:[%s8577_s5 + $0x704] ss:$28 sps:$4 sm:$0xff]   ;;  %v6189_v46 = vld [vmem:[%s8577_s5 + $0x93c] ss:$28 sps:$4 sm:$0xff]  }
 0x24e   :  { %4400 = vmatprep.subr.bf16.mxu1 %v6066_v53  ;;  %4564 = vmatprep.subr.bf16.mxu0 %v6069_v54  ;;  %v6129_v53 = vld [vmem:[%s8577_s5 + $0x70c] ss:$28 sps:$4 sm:$0xff]  }
 0x24f   :  { %v7383_v59 = vpop.f32.mrb[8].mxu1  ;;  %v7385_v60 = vpop.f32.mrb[20].mxu0 }
 0x250   :  { %v7387_v61 = vpop.f32.mrb[9].mxu1  ;;  %v7389_v62 = vpop.f32.mrb[21].mxu0 }
 0x251   :  { %v1434_v63 = vpop.f32.mrb[10].mxu1  ;;  %v1475_v0 = vpop.f32.mrb[22].mxu0  ;;  %4401 = vmatpush1.bf16.msra.mxu1 %v6064_v55  ;;  %4565 = vmatpush1.bf16.msra.mxu0 %v6067_v56  ;;  %v1433_v49 = vadd.f32 %v7387_v61, %v977_v43  ;;  %v6124_v55 = vld [vmem:[%s8577_s5 + $0x700] ss:$28 sps:$4 sm:$0xff]   ;;  %v7512_v56 = vpack.c.bf16 %v1480_v51, %v1480_v51  ;;  %v6178_v43 = vld [vmem:[%s8577_s5 + $0x8f8] ss:$28 sps:$4 sm:$0xff]  }
 0x252   :  { %v1435_v3 = vpop.f32.mrb[11].mxu1  ;;  %v1476_v4 = vpop.f32.mrb[23].mxu0  ;;  %4402 = vmatprep.subr.bf16.mxu1 %v6072_v57  ;;  %4566 = vmatprep.subr.bf16.mxu0 %v6075_v58  ;;  %v6127_v57 = vld [vmem:[%s8577_s5 + $0x708] ss:$28 sps:$4 sm:$0xff]   ;;  %v6132_v61 = vld [vmem:[%s8577_s5 + $0x73c] ss:$28 sps:$4 sm:$0xff]  }
 0x253   :  { %v1483_v54 = vmax.f32 %v1433_v49, 0.0  ;;  %v6135_v63 = vld [vmem:[%s8577_s5 + $0x744] ss:$28 sps:$4 sm:$0xff]   ;;  %v6130_v0 = vld [vmem:[%s8577_s5 + $0x738] ss:$28 sps:$4 sm:$0xff]  }
 0x254   :  { %v6141_v3 = vld [vmem:[%s8577_s5 + $0x77c] ss:$28 sps:$4 sm:$0xff]   ;;  %v6136_v4 = vld [vmem:[%s8577_s5 + $0x770] ss:$28 sps:$4 sm:$0xff]  }
 0x255   :  { %4403 = vmatpush1.bf16.msra.mxu1 %v6070_v1  ;;  %4567 = vmatpush1.bf16.msra.mxu0 %v6073_v2  ;;  %v7517_v58 = vpack.c.bf16 %v1483_v54, %v1483_v54  ;;  %v6133_v1 = vld [vmem:[%s8577_s5 + $0x740] ss:$28 sps:$4 sm:$0xff]   ;;  %v6138_v2 = vld [vmem:[%s8577_s5 + $0x774] ss:$28 sps:$4 sm:$0xff]   ;;  %v6192_v49 = vld [vmem:[%s8577_s5 + $0x96c] ss:$28 sps:$4 sm:$0xff]  }
 0x256   :  { %4404 = vmatprep.subr.bf16.mxu1 %v6078_v5  ;;  %4568 = vmatprep.subr.bf16.mxu0 %v6081_v10  ;;  %v6139_v5 = vld [vmem:[%s8577_s5 + $0x778] ss:$28 sps:$4 sm:$0xff]   ;;  %v6144_v10 = vld [vmem:[%s8577_s5 + $0x7ac] ss:$28 sps:$4 sm:$0xff]   ;;  %v6196_v54 = vld [vmem:[%s8577_s5 + $0x9a0] ss:$28 sps:$4 sm:$0xff]  }
 0x257   :  { %v6193_v51 = vld [vmem:[%s8577_s5 + $0x970] ss:$28 sps:$4 sm:$0xff]  }
 0x259   :  { %4405 = vmatpush1.bf16.msra.mxu1 %v6076_v12  ;;  %4569 = vmatpush1.bf16.msra.mxu0 %v6079_v13  ;;  %v6147_v12 = vld [vmem:[%s8577_s5 + $0x7b4] ss:$28 sps:$4 sm:$0xff]   ;;  %v6142_v13 = vld [vmem:[%s8577_s5 + $0x7a8] ss:$28 sps:$4 sm:$0xff]  }
 0x25a   :  { %4406 = vmatprep.subr.bf16.mxu1 %v6084_v15  ;;  %4570 = vmatprep.subr.bf16.mxu0 %v6087_v17  ;;  %v6145_v15 = vld [vmem:[%s8577_s5 + $0x7b0] ss:$28 sps:$4 sm:$0xff]   ;;  %v6150_v17 = vld [vmem:[%s8577_s5 + $0x7e4] ss:$28 sps:$4 sm:$0xff]  }
 0x25d   :  { %4407 = vmatpush1.bf16.msra.mxu1 %v6082_v14  ;;  %4571 = vmatpush1.bf16.msra.mxu0 %v6085_v18  ;;  %v6153_v14 = vld [vmem:[%s8577_s5 + $0x7ec] ss:$28 sps:$4 sm:$0xff]   ;;  %v6148_v18 = vld [vmem:[%s8577_s5 + $0x7e0] ss:$28 sps:$4 sm:$0xff]  }
 0x25e   :  { %4408 = vmatprep.subr.bf16.mxu1 %v6090_v19  ;;  %4572 = vmatprep.subr.bf16.mxu0 %v6093_v20  ;;  %v6151_v19 = vld [vmem:[%s8577_s5 + $0x7e8] ss:$28 sps:$4 sm:$0xff]   ;;  %v6156_v20 = vld [vmem:[%s8577_s5 + $0x81c] ss:$28 sps:$4 sm:$0xff]  }
 0x261   :  { %4409 = vmatpush1.bf16.msra.mxu1 %v6088_v21  ;;  %4573 = vmatpush1.bf16.msra.mxu0 %v6091_v22  ;;  %v6159_v21 = vld [vmem:[%s8577_s5 + $0x824] ss:$28 sps:$4 sm:$0xff]   ;;  %v6154_v22 = vld [vmem:[%s8577_s5 + $0x818] ss:$28 sps:$4 sm:$0xff]  }
 0x262   :  { %4410 = vmatprep.subr.bf16.mxu1 %v6096_v23  ;;  %4574 = vmatprep.subr.bf16.mxu0 %v6099_v24  ;;  %v6157_v23 = vld [vmem:[%s8577_s5 + $0x820] ss:$28 sps:$4 sm:$0xff]   ;;  %v6162_v24 = vld [vmem:[%s8577_s5 + $0x854] ss:$28 sps:$4 sm:$0xff]  }
 0x265   :  { %4411 = vmatpush1.bf16.msra.mxu1 %v6094_v25  ;;  %4575 = vmatpush1.bf16.msra.mxu0 %v6097_v26  ;;  %v6165_v25 = vld [vmem:[%s8577_s5 + $0x85c] ss:$28 sps:$4 sm:$0xff]   ;;  %v6160_v26 = vld [vmem:[%s8577_s5 + $0x850] ss:$28 sps:$4 sm:$0xff]  }
 0x266   :  { %4412 = vmatprep.subr.bf16.mxu1 %v6102_v27  ;;  %4576 = vmatprep.subr.bf16.mxu0 %v6105_v29  ;;  %v6163_v27 = vld [vmem:[%s8577_s5 + $0x858] ss:$28 sps:$4 sm:$0xff]   ;;  %v6168_v29 = vld [vmem:[%s8577_s5 + $0x88c] ss:$28 sps:$4 sm:$0xff]  }
 0x269   :  { %4413 = vmatpush1.bf16.msra.mxu1 %v6100_v30  ;;  %4577 = vmatpush1.bf16.msra.mxu0 %v6103_v32  ;;  %v6171_v30 = vld [vmem:[%s8577_s5 + $0x894] ss:$28 sps:$4 sm:$0xff]   ;;  %v6166_v32 = vld [vmem:[%s8577_s5 + $0x888] ss:$28 sps:$4 sm:$0xff]  }
 0x26a   :  { %4414 = vmatprep.subr.bf16.mxu1 %v6108_v35  ;;  %4578 = vmatprep.subr.bf16.mxu0 %v6111_v36  ;;  %v6169_v35 = vld [vmem:[%s8577_s5 + $0x890] ss:$28 sps:$4 sm:$0xff]   ;;  %v6174_v36 = vld [vmem:[%s8577_s5 + $0x8c4] ss:$28 sps:$4 sm:$0xff]  }
 0x26d   :  { %4415 = vmatpush1.bf16.msra.mxu1 %v6106_v38  ;;  %4579 = vmatpush1.bf16.msra.mxu0 %v6109_v39  ;;  %v6177_v38 = vld [vmem:[%s8577_s5 + $0x8cc] ss:$28 sps:$4 sm:$0xff]   ;;  %v6172_v39 = vld [vmem:[%s8577_s5 + $0x8c0] ss:$28 sps:$4 sm:$0xff]  }
 0x26e   :  { %4416 = vmatprep.subr.bf16.mxu1 %v6114_v41  ;;  %4580 = vmatprep.subr.bf16.mxu0 %v6117_v42  ;;  %v6180_v41 = vld [vmem:[%s8577_s5 + $0x8fc] ss:$28 sps:$4 sm:$0xff]   ;;  %v6183_v42 = vld [vmem:[%s8577_s5 + $0x904] ss:$28 sps:$4 sm:$0xff]  }
 0x271   :  { %4417 = vmatpush1.bf16.msra.mxu1 %v6112_v44  ;;  %4581 = vmatpush1.bf16.msra.mxu0 %v6115_v45  ;;  %v6181_v44 = vld [vmem:[%s8577_s5 + $0x900] ss:$28 sps:$4 sm:$0xff]   ;;  %v6186_v45 = vld [vmem:[%s8577_s5 + $0x934] ss:$28 sps:$4 sm:$0xff]  }
 0x272   :  { %4418 = vmatprep.subr.bf16.mxu1 %v6120_v47  ;;  %4582 = vmatprep.subr.bf16.mxu0 %v6123_v48  ;;  %v6184_v47 = vld [vmem:[%s8577_s5 + $0x930] ss:$28 sps:$4 sm:$0xff]   ;;  %v6187_v48 = vld [vmem:[%s8577_s5 + $0x938] ss:$28 sps:$4 sm:$0xff]  }
 0x275   :  { %4419 = vmatpush1.bf16.msra.mxu1 %v6118_v50  ;;  %4583 = vmatpush1.bf16.msra.mxu0 %v6121_v16  ;;  %v6195_v50 = vld [vmem:[%s8577_s5 + $0x974] ss:$28 sps:$4 sm:$0xff]   ;;  %v6190_v16 = vld [vmem:[%s8577_s5 + $0x968] ss:$28 sps:$4 sm:$0xff]  }
 0x276   :  { %4429 = vmatprep.subr.bf16.mxu1 %v6126_v52  ;;  %4593 = vmatprep.subr.bf16.mxu0 %v6129_v53  ;;  %v6198_v52 = vld [vmem:[%s8577_s5 + $0x9a4] ss:$28 sps:$4 sm:$0xff]   ;;  %v6201_v53 = vld [vmem:[%s8577_s5 + $0x9ac] ss:$28 sps:$4 sm:$0xff]  }
 0x278   :  { %4421 = vmatmul.mubr.bf16.vlgmr.msra.gmra.mrb[12].mxu1 %v7512_v56  ;;  %4585 = vmatmul.mubr.bf16.vlgmr.msra.gmra.mrb[24].mxu0 %v7512_v56 }
 0x279   :  { %4430 = vmatpush1.bf16.msra.mxu1 %v6124_v55  ;;  %4461 = vmatprep.mubr.bf16.mxu1 %v7517_v58  ;;  %v972_v55 = vsub.s32 4, %v6637_v11 }
 0x27a   :  { %4594 = vmatpush1.bf16.msra.mxu0 %v6127_v57  ;;  %4625 = vmatprep.mubr.bf16.mxu0 %v7517_v58  ;;  %v6199_v57 = vld [vmem:[%s8577_s5 + $0x9a8] ss:$28 sps:$4 sm:$0xff]  }
 0x27b   :  { %4431 = vmatprep.subr.bf16.mxu1 %v6132_v61  ;;  %4595 = vmatprep.subr.bf16.mxu0 %v6135_v63  ;;  %v6204_v61 = vld [vmem:[%s8577_s5 + $0x9dc] ss:$28 sps:$4 sm:$0xff]   ;;  %v6207_v63 = vld [vmem:[%s8577_s5 + $0x9e4] ss:$28 sps:$4 sm:$0xff]  }
 0x27d   :  { %4432 = vmatpush1.bf16.msra.mxu1 %v6130_v0  ;;  %v984_v0 = vsub.s32 7, %v6637_v11 }
 0x27e   :  { %4596 = vmatpush1.bf16.msra.mxu0 %v6133_v1  ;;  %4433 = vmatprep.subr.bf16.mxu1 %v6138_v2  ;;  %v6202_v1 = vld [vmem:[%s8577_s5 + $0x9d8] ss:$28 sps:$4 sm:$0xff]   ;;  %v973_v2 = vrot.slane %v7272_v7, %v972_v55 }
 0x27f   :  { %4597 = vmatprep.subr.bf16.mxu0 %v6141_v3  ;;  %v6205_v3 = vld [vmem:[%s8577_s5 + $0x9e0] ss:$28 sps:$4 sm:$0xff]  }
 0x281   :  { %4434 = vmatpush1.bf16.msra.mxu1 %v6136_v4  ;;  %v6210_v4 = vld [vmem:[%s8577_s5 + $0xa14] ss:$28 sps:$4 sm:$0xff]  }
 0x282   :  { %4598 = vmatpush1.bf16.msra.mxu0 %v6139_v5  ;;  %4435 = vmatprep.subr.bf16.mxu1 %v6144_v10  ;;  %v6213_v5 = vld [vmem:[%s8577_s5 + $0xa1c] ss:$28 sps:$4 sm:$0xff]   ;;  %v985_v10 = vrot.slane %v7272_v7, %v984_v0  ;;  %v6265_v0 = vld [vmem:[%s8577_s5 + $0xc10] ss:$28 sps:$4 sm:$0xff]  }
 0x283   :  { %4599 = vmatprep.subr.bf16.mxu0 %v6147_v12  ;;  %v6208_v12 = vld [vmem:[%s8577_s5 + $0xa10] ss:$28 sps:$4 sm:$0xff]  }
 0x285   :  { %4436 = vmatpush1.bf16.msra.mxu1 %v6142_v13  ;;  %v1431_v13 = vadd.f32 %v7383_v59, %v973_v2  ;;  %v6214_v59 = vld [vmem:[%s8577_s5 + $0xa48] ss:$28 sps:$4 sm:$0xff]  }
 0x286   :  { %4600 = vmatpush1.bf16.msra.mxu0 %v6145_v15  ;;  %4437 = vmatprep.subr.bf16.mxu1 %v6150_v17  ;;  %v6211_v15 = vld [vmem:[%s8577_s5 + $0xa18] ss:$28 sps:$4 sm:$0xff]   ;;  %v6216_v17 = vld [vmem:[%s8577_s5 + $0xa4c] ss:$28 sps:$4 sm:$0xff]  }
 0x287   :  { %4601 = vmatprep.subr.bf16.mxu0 %v6153_v14  ;;  %v6219_v14 = vld [vmem:[%s8577_s5 + $0xa54] ss:$28 sps:$4 sm:$0xff]   ;;  %v6273_v2 = vld [vmem:[%s8577_s5 + $0xc4c] ss:$28 sps:$4 sm:$0xff]  }
 0x289   :  { %4438 = vmatpush1.bf16.msra.mxu1 %v6148_v18  ;;  %v1474_v18 = vadd.f32 %v7389_v62, %v985_v10  ;;  %v6225_v62 = vld [vmem:[%s8577_s5 + $0xa8c] ss:$28 sps:$4 sm:$0xff]   ;;  %v6279_v10 = vld [vmem:[%s8577_s5 + $0xc84] ss:$28 sps:$4 sm:$0xff]  }
 0x28a   :  { %4602 = vmatpush1.bf16.msra.mxu0 %v6151_v19  ;;  %4439 = vmatprep.subr.bf16.mxu1 %v6156_v20  ;;  %v1482_v19 = vmax.f32 %v1431_v13, 0.0  ;;  %v6217_v20 = vld [vmem:[%s8577_s5 + $0xa50] ss:$28 sps:$4 sm:$0xff]   ;;  %v6277_v13 = vld [vmem:[%s8577_s5 + $0xc80] ss:$28 sps:$4 sm:$0xff]  }
 0x28b   :  { %4603 = vmatprep.subr.bf16.mxu0 %v6159_v21  ;;  %v6222_v21 = vld [vmem:[%s8577_s5 + $0xa84] ss:$28 sps:$4 sm:$0xff]  }
 0x28d   :  { %4440 = vmatpush1.bf16.msra.mxu1 %v6154_v22  ;;  %v1485_v22 = vmax.f32 %v1474_v18, 0.0  ;;  %v6283_v18 = vld [vmem:[%s8577_s5 + $0xcb8] ss:$28 sps:$4 sm:$0xff]  }
 0x28e   :  { %4604 = vmatpush1.bf16.msra.mxu0 %v6157_v23  ;;  %4441 = vmatprep.subr.bf16.mxu1 %v6162_v24  ;;  %v6220_v23 = vld [vmem:[%s8577_s5 + $0xa80] ss:$28 sps:$4 sm:$0xff]   ;;  %v7720_v24 = vpack.c.bf16 %v1482_v19, %v1482_v19  ;;  %v6291_v19 = vld [vmem:[%s8577_s5 + $0xcf4] ss:$28 sps:$4 sm:$0xff]  }
 0x28f   :  { %4605 = vmatprep.subr.bf16.mxu0 %v6165_v25  ;;  %v6223_v25 = vld [vmem:[%s8577_s5 + $0xa88] ss:$28 sps:$4 sm:$0xff]  }
 0x291   :  { %4442 = vmatpush1.bf16.msra.mxu1 %v6160_v26  ;;  %v6228_v26 = vld [vmem:[%s8577_s5 + $0xabc] ss:$28 sps:$4 sm:$0xff]  }
 0x292   :  { %4606 = vmatpush1.bf16.msra.mxu0 %v6163_v27  ;;  %4443 = vmatprep.subr.bf16.mxu1 %v6168_v29  ;;  %v7728_v27 = vpack.c.bf16 %v1485_v22, %v1485_v22  ;;  %v6231_v29 = vld [vmem:[%s8577_s5 + $0xac4] ss:$28 sps:$4 sm:$0xff]   ;;  %v6297_v22 = vld [vmem:[%s8577_s5 + $0xd2c] ss:$28 sps:$4 sm:$0xff]  }
 0x293   :  { %4607 = vmatprep.subr.bf16.mxu0 %v6171_v30  ;;  %v6226_v30 = vld [vmem:[%s8577_s5 + $0xab8] ss:$28 sps:$4 sm:$0xff]  }
 0x295   :  { %4444 = vmatpush1.bf16.msra.mxu1 %v6166_v32  ;;  %v6229_v32 = vld [vmem:[%s8577_s5 + $0xac0] ss:$28 sps:$4 sm:$0xff]  }
 0x296   :  { %4608 = vmatpush1.bf16.msra.mxu0 %v6169_v35  ;;  %4445 = vmatprep.subr.bf16.mxu1 %v6174_v36  ;;  %v6234_v35 = vld [vmem:[%s8577_s5 + $0xaf4] ss:$28 sps:$4 sm:$0xff]   ;;  %v6237_v36 = vld [vmem:[%s8577_s5 + $0xafc] ss:$28 sps:$4 sm:$0xff]  }
 0x297   :  { %4609 = vmatprep.subr.bf16.mxu0 %v6177_v38  ;;  %v6232_v38 = vld [vmem:[%s8577_s5 + $0xaf0] ss:$28 sps:$4 sm:$0xff]  }
 0x299   :  { %4446 = vmatpush1.bf16.msra.mxu1 %v6172_v39  ;;  %v6235_v39 = vld [vmem:[%s8577_s5 + $0xaf8] ss:$28 sps:$4 sm:$0xff]  }
 0x29a   :  { %4610 = vmatpush1.bf16.msra.mxu0 %v6175_v40  ;;  %4447 = vmatprep.subr.bf16.mxu1 %v6180_v41  ;;  %v6240_v40 = vld [vmem:[%s8577_s5 + $0xb2c] ss:$28 sps:$4 sm:$0xff]   ;;  %v6243_v41 = vld [vmem:[%s8577_s5 + $0xb34] ss:$28 sps:$4 sm:$0xff]  }
 0x29b   :  { %4611 = vmatprep.subr.bf16.mxu0 %v6183_v42  ;;  %v6238_v42 = vld [vmem:[%s8577_s5 + $0xb28] ss:$28 sps:$4 sm:$0xff]  }
 0x29d   :  { %4448 = vmatpush1.bf16.msra.mxu1 %v6178_v43  ;;  %v6241_v43 = vld [vmem:[%s8577_s5 + $0xb30] ss:$28 sps:$4 sm:$0xff]  }
 0x29e   :  { %4612 = vmatpush1.bf16.msra.mxu0 %v6181_v44  ;;  %4449 = vmatprep.subr.bf16.mxu1 %v6186_v45  ;;  %v6246_v44 = vld [vmem:[%s8577_s5 + $0xb64] ss:$28 sps:$4 sm:$0xff]   ;;  %v6249_v45 = vld [vmem:[%s8577_s5 + $0xb6c] ss:$28 sps:$4 sm:$0xff]  }
 0x29f   :  { %4613 = vmatprep.subr.bf16.mxu0 %v6189_v46  ;;  %v6244_v46 = vld [vmem:[%s8577_s5 + $0xb60] ss:$28 sps:$4 sm:$0xff]  }
 0x2a1   :  { %4450 = vmatpush1.bf16.msra.mxu1 %v6184_v47  ;;  %v6247_v47 = vld [vmem:[%s8577_s5 + $0xb68] ss:$28 sps:$4 sm:$0xff]  }
 0x2a2   :  { %4614 = vmatpush1.bf16.msra.mxu0 %v6187_v48  ;;  %4451 = vmatprep.subr.bf16.mxu1 %v6192_v49  ;;  %v6252_v48 = vld [vmem:[%s8577_s5 + $0xb9c] ss:$28 sps:$4 sm:$0xff]   ;;  %v6255_v49 = vld [vmem:[%s8577_s5 + $0xba4] ss:$28 sps:$4 sm:$0xff]  }
 0x2a3   :  { %4615 = vmatprep.subr.bf16.mxu0 %v6195_v50  ;;  %v6250_v50 = vld [vmem:[%s8577_s5 + $0xb98] ss:$28 sps:$4 sm:$0xff]  }
 0x2a5   :  { %4452 = vmatpush1.bf16.msra.mxu1 %v6190_v16  ;;  %v6253_v16 = vld [vmem:[%s8577_s5 + $0xba0] ss:$28 sps:$4 sm:$0xff]  }
 0x2a6   :  { %4616 = vmatpush1.bf16.msra.mxu0 %v6193_v51  ;;  %4453 = vmatprep.subr.bf16.mxu1 %v6198_v52  ;;  %v6258_v51 = vld [vmem:[%s8577_s5 + $0xbd4] ss:$28 sps:$4 sm:$0xff]   ;;  %v6261_v52 = vld [vmem:[%s8577_s5 + $0xbdc] ss:$28 sps:$4 sm:$0xff]  }
 0x2a7   :  { %4617 = vmatprep.subr.bf16.mxu0 %v6201_v53  ;;  %v6256_v53 = vld [vmem:[%s8577_s5 + $0xbd0] ss:$28 sps:$4 sm:$0xff]  }
 0x2a9   :  { %4454 = vmatpush1.bf16.msra.mxu1 %v6196_v54  ;;  %v6259_v54 = vld [vmem:[%s8577_s5 + $0xbd8] ss:$28 sps:$4 sm:$0xff]  }
 0x2aa   :  { %4618 = vmatpush1.bf16.msra.mxu0 %v6199_v57  ;;  %4455 = vmatprep.subr.bf16.mxu1 %v6204_v61  ;;  %v6264_v57 = vld [vmem:[%s8577_s5 + $0xc0c] ss:$28 sps:$4 sm:$0xff]   ;;  %v6267_v61 = vld [vmem:[%s8577_s5 + $0xc14] ss:$28 sps:$4 sm:$0xff]  }
 0x2ab   :  { %4619 = vmatprep.subr.bf16.mxu0 %v6207_v63  ;;  %v6262_v63 = vld [vmem:[%s8577_s5 + $0xc08] ss:$28 sps:$4 sm:$0xff]  }
 0x2ad   :  { %4456 = vmatpush1.bf16.msra.mxu1 %v6202_v1  ;;  %v6270_v1 = vld [vmem:[%s8577_s5 + $0xc44] ss:$28 sps:$4 sm:$0xff]  }
 0x2ae   :  { %4620 = vmatpush1.bf16.msra.mxu0 %v6205_v3  ;;  %4457 = vmatprep.subr.bf16.mxu1 %v6210_v4  ;;  %v6268_v3 = vld [vmem:[%s8577_s5 + $0xc40] ss:$28 sps:$4 sm:$0xff]   ;;  %v6271_v4 = vld [vmem:[%s8577_s5 + $0xc48] ss:$28 sps:$4 sm:$0xff]  }
 0x2af   :  { %4621 = vmatprep.subr.bf16.mxu0 %v6213_v5  ;;  %v6276_v5 = vld [vmem:[%s8577_s5 + $0xc7c] ss:$28 sps:$4 sm:$0xff]  }
 0x2b1   :  { %4458 = vmatpush1.bf16.msra.mxu1 %v6208_v12  ;;  %v6274_v12 = vld [vmem:[%s8577_s5 + $0xc78] ss:$28 sps:$4 sm:$0xff]  }
 0x2b2   :  { %4622 = vmatpush1.bf16.msra.mxu0 %v6211_v15  ;;  %4459 = vmatprep.subr.bf16.mxu1 %v6216_v17  ;;  %v6282_v15 = vld [vmem:[%s8577_s5 + $0xcb4] ss:$28 sps:$4 sm:$0xff]   ;;  %v6285_v17 = vld [vmem:[%s8577_s5 + $0xcbc] ss:$28 sps:$4 sm:$0xff]  }
 0x2b3   :  { %4623 = vmatprep.subr.bf16.mxu0 %v6219_v14  ;;  %v6280_v14 = vld [vmem:[%s8577_s5 + $0xcb0] ss:$28 sps:$4 sm:$0xff]  }
 0x2b5   :  { %4460 = vmatpush1.bf16.msra.mxu1 %v6214_v59  ;;  %v6288_v59 = vld [vmem:[%s8577_s5 + $0xcec] ss:$28 sps:$4 sm:$0xff]  }
 0x2b6   :  { %4624 = vmatpush1.bf16.msra.mxu0 %v6217_v20  ;;  %4470 = vmatprep.subr.bf16.mxu1 %v6222_v21  ;;  %v6286_v20 = vld [vmem:[%s8577_s5 + $0xce8] ss:$28 sps:$4 sm:$0xff]   ;;  %v6289_v21 = vld [vmem:[%s8577_s5 + $0xcf0] ss:$28 sps:$4 sm:$0xff]  }
 0x2b7   :  { %4634 = vmatprep.subr.bf16.mxu0 %v6225_v62  ;;  %v6294_v62 = vld [vmem:[%s8577_s5 + $0xd24] ss:$28 sps:$4 sm:$0xff]  }
 0x2b8   :  { %4462 = vmatmul.mubr.bf16.vlgmr.msra.gmra.mrb[12].mxu1 %v7720_v24 }
 0x2b9   :  { %4626 = vmatmul.mubr.bf16.vlgmr.msra.gmra.mrb[24].mxu0 %v7720_v24  ;;  %4471 = vmatpush1.bf16.msra.mxu1 %v6220_v23  ;;  %v6292_v23 = vld [vmem:[%s8577_s5 + $0xd20] ss:$28 sps:$4 sm:$0xff]  }
 0x2ba   :  { %4502 = vmatprep.mubr.bf16.mxu1 %v7728_v27  ;;  %4635 = vmatpush1.bf16.msra.mxu0 %v6223_v25  ;;  %v980_v25 = vsub.s32 6, %v6637_v11 }
 0x2bb   :  { %4666 = vmatprep.mubr.bf16.mxu0 %v7728_v27  ;;  %4472 = vmatprep.subr.bf16.mxu1 %v6228_v26  ;;  %v6295_v26 = vld [vmem:[%s8577_s5 + $0xd28] ss:$28 sps:$4 sm:$0xff]  }
 0x2bc   :  { %4636 = vmatprep.subr.bf16.mxu0 %v6231_v29  ;;  %v6300_v29 = vld [vmem:[%s8577_s5 + $0xd5c] ss:$28 sps:$4 sm:$0xff]  }
 0x2bd   :  { %4473 = vmatpush1.bf16.msra.mxu1 %v6226_v30  ;;  %v6303_v30 = vld [vmem:[%s8577_s5 + $0xd64] ss:$28 sps:$4 sm:$0xff]  }
 0x2be   :  { %4637 = vmatpush1.bf16.msra.mxu0 %v6229_v32  ;;  %4474 = vmatprep.subr.bf16.mxu1 %v6234_v35  ;;  %v6298_v32 = vld [vmem:[%s8577_s5 + $0xd58] ss:$28 sps:$4 sm:$0xff]   ;;  %v981_v35 = vrot.slane %v7272_v7, %v980_v25  ;;  %v6304_v7 = vld [vmem:[%s8577_s5 + $0xd90] ss:$28 sps:$4 sm:$0xff]  }
 0x2bf   :  { %4638 = vmatprep.subr.bf16.mxu0 %v6237_v36  ;;  %v6301_v36 = vld [vmem:[%s8577_s5 + $0xd60] ss:$28 sps:$4 sm:$0xff]  }
 0x2c1   :  { %4475 = vmatpush1.bf16.msra.mxu1 %v6232_v38  ;;  %v6306_v38 = vld [vmem:[%s8577_s5 + $0xd94] ss:$28 sps:$4 sm:$0xff]  }
 0x2c2   :  { %4639 = vmatpush1.bf16.msra.mxu0 %v6235_v39  ;;  %4476 = vmatprep.subr.bf16.mxu1 %v6240_v40  ;;  %v6309_v39 = vld [vmem:[%s8577_s5 + $0xd9c] ss:$28 sps:$4 sm:$0xff]   ;;  %v1472_v40 = vadd.f32 %v7385_v60, %v981_v35  ;;  %v6310_v60 = vld [vmem:[%s8577_s5 + $0xdc8] ss:$28 sps:$4 sm:$0xff]   ;;  %v6364_v35 = vld [vmem:[%s8577_s5 + $0x590] ss:$28 sps:$4 sm:$0xff]  }
 0x2c3   :  { %4640 = vmatprep.subr.bf16.mxu0 %v6243_v41  ;;  %v6307_v41 = vld [vmem:[%s8577_s5 + $0xd98] ss:$28 sps:$4 sm:$0xff]  }
 0x2c5   :  { %4477 = vmatpush1.bf16.msra.mxu1 %v6238_v42  ;;  %v6312_v42 = vld [vmem:[%s8577_s5 + $0xdcc] ss:$28 sps:$4 sm:$0xff]  }
 0x2c6   :  { %4641 = vmatpush1.bf16.msra.mxu0 %v6241_v43  ;;  %4478 = vmatprep.subr.bf16.mxu1 %v6246_v44  ;;  %v6315_v43 = vld [vmem:[%s8577_s5 + $0xdd4] ss:$28 sps:$4 sm:$0xff]   ;;  %v1484_v44 = vmax.f32 %v1472_v40, 0.0  ;;  %v6366_v40 = vld [vmem:[%s8577_s5 + $0x240] ss:$28 sps:$4 sm:$0xff]  }
 0x2c7   :  { %4642 = vmatprep.subr.bf16.mxu0 %v6249_v45  ;;  %v6313_v45 = vld [vmem:[%s8577_s5 + $0xdd0] ss:$28 sps:$4 sm:$0xff]  }
 0x2c9   :  { %4479 = vmatpush1.bf16.msra.mxu1 %v6244_v46  ;;  %v6318_v46 = vld [vmem:[%s8577_s5 + $0x14] ss:$28 sps:$4 sm:$0xff]  }
 0x2ca   :  { %4643 = vmatpush1.bf16.msra.mxu0 %v6247_v47  ;;  %4480 = vmatprep.subr.bf16.mxu1 %v6252_v48  ;;  %v6319_v47 = vld [vmem:[%s8577_s5 + $0x1d8] ss:$28 sps:$4 sm:$0xff]   ;;  %v6316_v48 = vld [vmem:[%s8577_s5 + $0x10] ss:$28 sps:$4 sm:$0xff]  }
 0x2cb   :  { %4644 = vmatprep.subr.bf16.mxu0 %v6255_v49  ;;  %v7925_v49 = vpack.c.bf16 %v1484_v44, %v1484_v44  ;;  %v6375_v44 = vld [vmem:[%s8577_s5 + $0x440] ss:$28 sps:$4 sm:$0xff]  }
 0x2cd   :  { %4481 = vmatpush1.bf16.msra.mxu1 %v6250_v50  ;;  %v6320_v50 = vld [vmem:[%s8577_s5 + $0x18] ss:$28 sps:$4 sm:$0xff]  }
 0x2ce   :  { %4645 = vmatpush1.bf16.msra.mxu0 %v6253_v16  ;;  %4482 = vmatprep.subr.bf16.mxu1 %v6258_v51  ;;  %v6323_v16 = vld [vmem:[%s8577_s5 + $0x4c] ss:$28 sps:$4 sm:$0xff]  }
 0x2cf   :  { %4646 = vmatprep.subr.bf16.mxu0 %v6261_v52  ;;  %v6324_v51 = vld [vmem:[%s8577_s5 + $0x210] ss:$28 sps:$4 sm:$0xff]   ;;  %v6321_v52 = vld [vmem:[%s8577_s5 + $0x48] ss:$28 sps:$4 sm:$0xff]  }
 0x2d1   :  { %4483 = vmatpush1.bf16.msra.mxu1 %v6256_v53  ;;  %v6325_v53 = vld [vmem:[%s8577_s5 + $0x50] ss:$28 sps:$4 sm:$0xff]  }
 0x2d2   :  { %4647 = vmatpush1.bf16.msra.mxu0 %v6259_v54  ;;  %4484 = vmatprep.subr.bf16.mxu1 %v6264_v57  ;;  %v6328_v54 = vld [vmem:[%s8577_s5 + $0x84] ss:$28 sps:$4 sm:$0xff]  }
 0x2d3   :  { %4648 = vmatprep.subr.bf16.mxu0 %v6267_v61  ;;  %v6329_v57 = vld [vmem:[%s8577_s5 + $0x248] ss:$28 sps:$4 sm:$0xff]   ;;  %v6326_v61 = vld [vmem:[%s8577_s5 + $0x80] ss:$28 sps:$4 sm:$0xff]  }
 0x2d5   :  { %4485 = vmatpush1.bf16.msra.mxu1 %v6262_v63  ;;  %v6330_v63 = vld [vmem:[%s8577_s5 + $0x88] ss:$28 sps:$4 sm:$0xff]  }
 0x2d6   :  { %4649 = vmatpush1.bf16.msra.mxu0 %v6265_v0  ;;  %4486 = vmatprep.subr.bf16.mxu1 %v6270_v1  ;;  %v6334_v0 = vld [vmem:[%s8577_s5 + $0x280] ss:$28 sps:$4 sm:$0xff]   ;;  %v6331_v1 = vld [vmem:[%s8577_s5 + $0xb8] ss:$28 sps:$4 sm:$0xff]  }
 0x2d7   :  { %4650 = vmatprep.subr.bf16.mxu0 %v6273_v2  ;;  %v6335_v2 = vld [vmem:[%s8577_s5 + $0xc0] ss:$28 sps:$4 sm:$0xff]  }
 0x2d9   :  { %4487 = vmatpush1.bf16.msra.mxu1 %v6268_v3  ;;  %v6338_v3 = vld [vmem:[%s8577_s5 + $0xf4] ss:$28 sps:$4 sm:$0xff]  }
 0x2da   :  { %4651 = vmatpush1.bf16.msra.mxu0 %v6271_v4  ;;  %4488 = vmatprep.subr.bf16.mxu1 %v6276_v5  ;;  %v6339_v4 = vld [vmem:[%s8577_s5 + $0x2b8] ss:$28 sps:$4 sm:$0xff]   ;;  %v6336_v5 = vld [vmem:[%s8577_s5 + $0xf0] ss:$28 sps:$4 sm:$0xff]  }
 0x2db   :  { %4652 = vmatprep.subr.bf16.mxu0 %v6279_v10  ;;  %v6340_v10 = vld [vmem:[%s8577_s5 + $0xf8] ss:$28 sps:$4 sm:$0xff]  }
 0x2dd   :  { %4489 = vmatpush1.bf16.msra.mxu1 %v6274_v12  ;;  %v6343_v12 = vld [vmem:[%s8577_s5 + $0x12c] ss:$28 sps:$4 sm:$0xff]  }
 0x2de   :  { %4653 = vmatpush1.bf16.msra.mxu0 %v6277_v13  ;;  %4490 = vmatprep.subr.bf16.mxu1 %v6282_v15  ;;  %v6344_v13 = vld [vmem:[%s8577_s5 + $0x2f0] ss:$28 sps:$4 sm:$0xff]   ;;  %v6341_v15 = vld [vmem:[%s8577_s5 + $0x128] ss:$28 sps:$4 sm:$0xff]  }
 0x2df   :  { %4654 = vmatprep.subr.bf16.mxu0 %v6285_v17  ;;  %v6345_v17 = vld [vmem:[%s8577_s5 + $0x130] ss:$28 sps:$4 sm:$0xff]  }
 0x2e1   :  { %4491 = vmatpush1.bf16.msra.mxu1 %v6280_v14  ;;  %v6348_v14 = vld [vmem:[%s8577_s5 + $0x164] ss:$28 sps:$4 sm:$0xff]  }
 0x2e2   :  { %4655 = vmatpush1.bf16.msra.mxu0 %v6283_v18  ;;  %4492 = vmatprep.subr.bf16.mxu1 %v6288_v59  ;;  %v6349_v18 = vld [vmem:[%s8577_s5 + $0x328] ss:$28 sps:$4 sm:$0xff]   ;;  %v6346_v59 = vld [vmem:[%s8577_s5 + $0x160] ss:$28 sps:$4 sm:$0xff]  }
 0x2e3   :  { %4656 = vmatprep.subr.bf16.mxu0 %v6291_v19  ;;  %v6350_v19 = vld [vmem:[%s8577_s5 + $0x168] ss:$28 sps:$4 sm:$0xff]  }
 0x2e5   :  { %4493 = vmatpush1.bf16.msra.mxu1 %v6286_v20  ;;  %v6353_v20 = vld [vmem:[%s8577_s5 + $0x19c] ss:$28 sps:$4 sm:$0xff]  }
 0x2e6   :  { %4657 = vmatpush1.bf16.msra.mxu0 %v6289_v21  ;;  %4494 = vmatprep.subr.bf16.mxu1 %v6294_v62  ;;  %v6354_v21 = vld [vmem:[%s8577_s5 + $0x360] ss:$28 sps:$4 sm:$0xff]   ;;  %v6351_v62 = vld [vmem:[%s8577_s5 + $0x198] ss:$28 sps:$4 sm:$0xff]  }
 0x2e7   :  { %4658 = vmatprep.subr.bf16.mxu0 %v6297_v22  ;;  %v6355_v22 = vld [vmem:[%s8577_s5 + $0x1a0] ss:$28 sps:$4 sm:$0xff]  }
 0x2e9   :  { %4495 = vmatpush1.bf16.msra.mxu1 %v6292_v23  ;;  %v6358_v23 = vld [vmem:[%s8577_s5 + $0x1d4] ss:$28 sps:$4 sm:$0xff]  }
 0x2ea   :  { %4659 = vmatpush1.bf16.msra.mxu0 %v6295_v26  ;;  %4496 = vmatprep.subr.bf16.mxu1 %v6300_v29  ;;  %v6359_v26 = vld [vmem:[%s8577_s5 + $0x558] ss:$28 sps:$4 sm:$0xff]   ;;  %v6356_v29 = vld [vmem:[%s8577_s5 + $0x1d0] ss:$28 sps:$4 sm:$0xff]  }
 0x2eb   :  { %4660 = vmatprep.subr.bf16.mxu0 %v6303_v30  ;;  %v6360_v30 = vld [vmem:[%s8577_s5 + $0x398] ss:$28 sps:$4 sm:$0xff]  }
 0x2ed   :  { %4497 = vmatpush1.bf16.msra.mxu1 %v6298_v32  ;;  %v6363_v32 = vld [vmem:[%s8577_s5 + $0x20c] ss:$28 sps:$4 sm:$0xff]  }
 0x2ee   :  { %4661 = vmatpush1.bf16.msra.mxu0 %v6301_v36  ;;  %4498 = vmatprep.subr.bf16.mxu1 %v6306_v38  ;;  %v6361_v36 = vld [vmem:[%s8577_s5 + $0x208] ss:$28 sps:$4 sm:$0xff]   ;;  %v6365_v38 = vld [vmem:[%s8577_s5 + $0x3d0] ss:$28 sps:$4 sm:$0xff]  }
 0x2ef   :  { %4662 = vmatprep.subr.bf16.mxu0 %v6309_v39  ;;  %v6368_v39 = vld [vmem:[%s8577_s5 + $0x244] ss:$28 sps:$4 sm:$0xff]  }
 0x2f1   :  { %4499 = vmatpush1.bf16.msra.mxu1 %v6304_v7  ;;  %v6369_v7 = vld [vmem:[%s8577_s5 + $0x5c8] ss:$28 sps:$4 sm:$0xff]  }
 0x2f2   :  { %4663 = vmatpush1.bf16.msra.mxu0 %v6307_v41  ;;  %4500 = vmatprep.subr.bf16.mxu1 %v6312_v42  ;;  %v6370_v41 = vld [vmem:[%s8577_s5 + $0x408] ss:$28 sps:$4 sm:$0xff]   ;;  %v6373_v42 = vld [vmem:[%s8577_s5 + $0x27c] ss:$28 sps:$4 sm:$0xff]  }
 0x2f3   :  { %4664 = vmatprep.subr.bf16.mxu0 %v6315_v43  ;;  %v6374_v43 = vld [vmem:[%s8577_s5 + $0x600] ss:$28 sps:$4 sm:$0xff]  }
 0x2f5   :  { %4501 = vmatpush1.bf16.msra.mxu1 %v6310_v60  ;;  %v6371_v60 = vld [vmem:[%s8577_s5 + $0x278] ss:$28 sps:$4 sm:$0xff]  }
 0x2f6   :  { %4665 = vmatpush1.bf16.msra.mxu0 %v6313_v45  ;;  %4675 = vmatprep.subr.bf16.mxu1 %v6318_v46  ;;  %v6378_v45 = vld [vmem:[%s8577_s5 + $0x2b4] ss:$28 sps:$4 sm:$0xff]  }
 0x2f7   :  { %5705 = vmatprep.subr.bf16.mxu0 %v6319_v47  ;;  %v6379_v46 = vld [vmem:[%s8577_s5 + $0x638] ss:$28 sps:$4 sm:$0xff]   ;;  %v6376_v47 = vld [vmem:[%s8577_s5 + $0x2b0] ss:$28 sps:$4 sm:$0xff]  }
 0x2f8   :  { %4503 = vmatmul.mubr.bf16.vlgmr.msra.gmra.mrb[12].mxu1 %v7925_v49 }
 0x2f9   :  { %4667 = vmatmul.mubr.bf16.vlgmr.msra.gmra.mrb[24].mxu0 %v7925_v49  ;;  %4676 = vmatpush1.bf16.msra.mxu1 %v6316_v48  ;;  %v6380_v48 = vld [vmem:[%s8577_s5 + $0x478] ss:$28 sps:$4 sm:$0xff]  }
 0x2fa   :  { %4707 = vmatprep.mubr.bf16.mxu1 %v7287_v28  ;;  %5706 = vmatpush3.bf16.msra.mxu0 %v6320_v50  ;;  %v6383_v50 = vld [vmem:[%s8577_s5 + $0x2ec] ss:$28 sps:$4 sm:$0xff]  }
 0x2fb   :  { %4871 = vmatprep.mubr.bf16.mxu0 %v7287_v28  ;;  %4677 = vmatprep.subr.bf16.mxu1 %v6323_v16  ;;  %v6333_v28 = vld [vmem:[%s8577_s5 + $0xbc] ss:$28 sps:$4 sm:$0xff]   ;;  %v6384_v16 = vld [vmem:[%s8577_s5 + $0x670] ss:$28 sps:$4 sm:$0xff]  }
 0x2fc   :  { %5707 = vmatprep.subr.bf16.mxu0 %v6324_v51  ;;  %v6381_v51 = vld [vmem:[%s8577_s5 + $0x2e8] ss:$28 sps:$4 sm:$0xff]  }
 0x2fd   :  { %4678 = vmatpush1.bf16.msra.mxu1 %v6321_v52  ;;  %v6385_v52 = vld [vmem:[%s8577_s5 + $0x4b0] ss:$28 sps:$4 sm:$0xff]  }
 0x2fe   :  { %5708 = vmatpush3.bf16.msra.mxu0 %v6325_v53  ;;  %4679 = vmatprep.subr.bf16.mxu1 %v6328_v54  ;;  %v6388_v53 = vld [vmem:[%s8577_s5 + $0x324] ss:$28 sps:$4 sm:$0xff]  }
 0x2ff   :  { %5709 = vmatprep.subr.bf16.mxu0 %v6329_v57  ;;  %v6389_v54 = vld [vmem:[%s8577_s5 + $0x6a8] ss:$28 sps:$4 sm:$0xff]   ;;  %v6386_v57 = vld [vmem:[%s8577_s5 + $0x320] ss:$28 sps:$4 sm:$0xff]  }
 0x301   :  { %4680 = vmatpush1.bf16.msra.mxu1 %v6326_v61  ;;  %v6390_v61 = vld [vmem:[%s8577_s5 + $0x4e8] ss:$28 sps:$4 sm:$0xff]  }
 0x302   :  { %5710 = vmatpush3.bf16.msra.mxu0 %v6330_v63  ;;  %4681 = vmatprep.subr.bf16.mxu1 %v6333_v28  ;;  %v6393_v63 = vld [vmem:[%s8577_s5 + $0x35c] ss:$28 sps:$4 sm:$0xff]  }
 0x303   :  { %5711 = vmatprep.subr.bf16.mxu0 %v6334_v0  ;;  %v6394_v28 = vld [vmem:[%s8577_s5 + $0x6e0] ss:$28 sps:$4 sm:$0xff]   ;;  %v6391_v0 = vld [vmem:[%s8577_s5 + $0x358] ss:$28 sps:$4 sm:$0xff]  }
 0x305   :  { %4682 = vmatpush1.bf16.msra.mxu1 %v6331_v1  ;;  %v6395_v1 = vld [vmem:[%s8577_s5 + $0x520] ss:$28 sps:$4 sm:$0xff]  }
 0x306   :  { %5712 = vmatpush3.bf16.msra.mxu0 %v6335_v2  ;;  %4683 = vmatprep.subr.bf16.mxu1 %v6338_v3  ;;  %v6398_v2 = vld [vmem:[%s8577_s5 + $0x394] ss:$28 sps:$4 sm:$0xff]  }
 0x307   :  { %5713 = vmatprep.subr.bf16.mxu0 %v6339_v4  ;;  %v6399_v3 = vld [vmem:[%s8577_s5 + $0x8d8] ss:$28 sps:$4 sm:$0xff]   ;;  %v6396_v4 = vld [vmem:[%s8577_s5 + $0x390] ss:$28 sps:$4 sm:$0xff]  }
 0x309   :  { %4684 = vmatpush1.bf16.msra.mxu1 %v6336_v5  ;;  %v6400_v5 = vld [vmem:[%s8577_s5 + $0x718] ss:$28 sps:$4 sm:$0xff]  }
 0x30a   :  { %5714 = vmatpush3.bf16.msra.mxu0 %v6340_v10  ;;  %4685 = vmatprep.subr.bf16.mxu1 %v6343_v12  ;;  %v6403_v10 = vld [vmem:[%s8577_s5 + $0x3cc] ss:$28 sps:$4 sm:$0xff]  }
 0x30b   :  { %5715 = vmatprep.subr.bf16.mxu0 %v6344_v13  ;;  %v6404_v12 = vld [vmem:[%s8577_s5 + $0x910] ss:$28 sps:$4 sm:$0xff]   ;;  %v6401_v13 = vld [vmem:[%s8577_s5 + $0x3c8] ss:$28 sps:$4 sm:$0xff]  }
 0x30d   :  { %4686 = vmatpush1.bf16.msra.mxu1 %v6341_v15  ;;  %v6405_v15 = vld [vmem:[%s8577_s5 + $0x750] ss:$28 sps:$4 sm:$0xff]  }
 0x30e   :  { %5716 = vmatpush3.bf16.msra.mxu0 %v6345_v17  ;;  %4687 = vmatprep.subr.bf16.mxu1 %v6348_v14  ;;  %v6409_v17 = vld [vmem:[%s8577_s5 + $0x948] ss:$28 sps:$4 sm:$0xff]  }
 0x30f   :  { %5717 = vmatprep.subr.bf16.mxu0 %v6349_v18  ;;  %v6410_v14 = vld [vmem:[%s8577_s5 + $0x788] ss:$28 sps:$4 sm:$0xff]   ;;  %v6413_v18 = vld [vmem:[%s8577_s5 + $0x43c] ss:$28 sps:$4 sm:$0xff]  }
 0x311   :  { %4688 = vmatpush1.bf16.msra.mxu1 %v6346_v59  ;;  %v6414_v59 = vld [vmem:[%s8577_s5 + $0x980] ss:$28 sps:$4 sm:$0xff]  }
 0x312   :  { %5718 = vmatpush3.bf16.msra.mxu0 %v6350_v19  ;;  %4689 = vmatprep.subr.bf16.mxu1 %v6353_v20  ;;  %v6411_v19 = vld [vmem:[%s8577_s5 + $0x438] ss:$28 sps:$4 sm:$0xff]   ;;  %v6415_v20 = vld [vmem:[%s8577_s5 + $0x7c0] ss:$28 sps:$4 sm:$0xff]  }
 0x313   :  { %5719 = vmatprep.subr.bf16.mxu0 %v6354_v21  ;;  %v6418_v21 = vld [vmem:[%s8577_s5 + $0x474] ss:$28 sps:$4 sm:$0xff]  }
 0x315   :  { %4690 = vmatpush1.bf16.msra.mxu1 %v6351_v62  ;;  %v6419_v62 = vld [vmem:[%s8577_s5 + $0x9b8] ss:$28 sps:$4 sm:$0xff]  }
 0x316   :  { %5720 = vmatpush3.bf16.msra.mxu0 %v6355_v22  ;;  %4691 = vmatprep.subr.bf16.mxu1 %v6358_v23  ;;  %v6416_v22 = vld [vmem:[%s8577_s5 + $0x470] ss:$28 sps:$4 sm:$0xff]   ;;  %v6420_v23 = vld [vmem:[%s8577_s5 + $0x7f8] ss:$28 sps:$4 sm:$0xff]  }
 0x317   :  { %5727 = vmatprep.subr.bf16.mxu0 %v6359_v26  ;;  %v6423_v26 = vld [vmem:[%s8577_s5 + $0x4ac] ss:$28 sps:$4 sm:$0xff]  }
 0x319   :  { %4872 = vmatmul.mubr.bf16.vlgmr.msra.gmra.mrb[28].mxu0 %v7295_v31  ;;  %4692 = vmatpush1.bf16.msra.mxu1 %v6356_v29  ;;  %v6424_v29 = vld [vmem:[%s8577_s5 + $0x9f0] ss:$28 sps:$4 sm:$0xff]  }
 0x31a   :  { %5728 = vmatpush3.bf16.msra.mxu0 %v6360_v30  ;;  %4911 = vmatprep.mubr.bf16.mxu0 %v7305_v34  ;;  %v6421_v30 = vld [vmem:[%s8577_s5 + $0x4a8] ss:$28 sps:$4 sm:$0xff]  }
 0x31b   :  { %4693 = vmatprep.subr.bf16.mxu1 %v6363_v32  ;;  %5729 = vmatprep.subr.bf16.mxu0 %v6364_v35  ;;  %v6425_v32 = vld [vmem:[%s8577_s5 + $0x830] ss:$28 sps:$4 sm:$0xff]   ;;  %v6428_v35 = vld [vmem:[%s8577_s5 + $0x4e4] ss:$28 sps:$4 sm:$0xff]  }
 0x31d   :  { %4694 = vmatpush1.bf16.msra.mxu1 %v6361_v36  ;;  %v6429_v36 = vld [vmem:[%s8577_s5 + $0xa28] ss:$28 sps:$4 sm:$0xff]  }
 0x31e   :  { %5730 = vmatpush3.bf16.msra.mxu0 %v6365_v38  ;;  %4695 = vmatprep.subr.bf16.mxu1 %v6368_v39  ;;  %v6426_v38 = vld [vmem:[%s8577_s5 + $0x4e0] ss:$28 sps:$4 sm:$0xff]   ;;  %v6430_v39 = vld [vmem:[%s8577_s5 + $0x868] ss:$28 sps:$4 sm:$0xff]  }
 0x31f   :  { %5731 = vmatprep.subr.bf16.mxu0 %v6369_v7  ;;  %v6433_v7 = vld [vmem:[%s8577_s5 + $0x51c] ss:$28 sps:$4 sm:$0xff]  }
 0x321   :  { %4696 = vmatpush1.bf16.msra.mxu1 %v6366_v40  ;;  %v6434_v40 = vld [vmem:[%s8577_s5 + $0xa60] ss:$28 sps:$4 sm:$0xff]  }
 0x322   :  { %5732 = vmatpush3.bf16.msra.mxu0 %v6370_v41  ;;  %4697 = vmatprep.subr.bf16.mxu1 %v6373_v42  ;;  %v6431_v41 = vld [vmem:[%s8577_s5 + $0x518] ss:$28 sps:$4 sm:$0xff]   ;;  %v6435_v42 = vld [vmem:[%s8577_s5 + $0x8a0] ss:$28 sps:$4 sm:$0xff]  }
 0x323   :  { %5733 = vmatprep.subr.bf16.mxu0 %v6374_v43  ;;  %v6438_v43 = vld [vmem:[%s8577_s5 + $0x554] ss:$28 sps:$4 sm:$0xff]  }
 0x325   :  { %4698 = vmatpush1.bf16.msra.mxu1 %v6371_v60  ;;  %v6439_v60 = vld [vmem:[%s8577_s5 + $0xc58] ss:$28 sps:$4 sm:$0xff]  }
 0x326   :  { %5734 = vmatpush3.bf16.msra.mxu0 %v6375_v44  ;;  %4699 = vmatprep.subr.bf16.mxu1 %v6378_v45  ;;  %v6436_v44 = vld [vmem:[%s8577_s5 + $0x550] ss:$28 sps:$4 sm:$0xff]   ;;  %v6440_v45 = vld [vmem:[%s8577_s5 + $0xa98] ss:$28 sps:$4 sm:$0xff]  }
 0x327   :  { %5735 = vmatprep.subr.bf16.mxu0 %v6379_v46  ;;  %v6443_v46 = vld [vmem:[%s8577_s5 + $0x58c] ss:$28 sps:$4 sm:$0xff]  }
 0x329   :  { %4700 = vmatpush1.bf16.msra.mxu1 %v6376_v47  ;;  %v6444_v47 = vld [vmem:[%s8577_s5 + $0xc90] ss:$28 sps:$4 sm:$0xff]  }
 0x32a   :  { %5736 = vmatpush3.bf16.msra.mxu0 %v6380_v48  ;;  %4701 = vmatprep.subr.bf16.mxu1 %v6383_v50  ;;  %v6441_v48 = vld [vmem:[%s8577_s5 + $0x588] ss:$28 sps:$4 sm:$0xff]   ;;  %v6445_v50 = vld [vmem:[%s8577_s5 + $0xad0] ss:$28 sps:$4 sm:$0xff]  }
 0x32b   :  { %5737 = vmatprep.subr.bf16.mxu0 %v6384_v16  ;;  %v6448_v16 = vld [vmem:[%s8577_s5 + $0x5c4] ss:$28 sps:$4 sm:$0xff]  }
 0x32d   :  { %4702 = vmatpush1.bf16.msra.mxu1 %v6381_v51  ;;  %v6449_v51 = vld [vmem:[%s8577_s5 + $0xcc8] ss:$28 sps:$4 sm:$0xff]  }
 0x32e   :  { %5738 = vmatpush3.bf16.msra.mxu0 %v6385_v52  ;;  %4703 = vmatprep.subr.bf16.mxu1 %v6388_v53  ;;  %v6446_v52 = vld [vmem:[%s8577_s5 + $0x5c0] ss:$28 sps:$4 sm:$0xff]   ;;  %v6450_v53 = vld [vmem:[%s8577_s5 + $0xb08] ss:$28 sps:$4 sm:$0xff]  }
 0x32f   :  { %5739 = vmatprep.subr.bf16.mxu0 %v6389_v54  ;;  %v6453_v54 = vld [vmem:[%s8577_s5 + $0x5fc] ss:$28 sps:$4 sm:$0xff]  }
 0x331   :  { %4704 = vmatpush1.bf16.msra.mxu1 %v6386_v57  ;;  %v6454_v57 = vld [vmem:[%s8577_s5 + $0xd00] ss:$28 sps:$4 sm:$0xff]  }
 0x332   :  { %5740 = vmatpush3.bf16.msra.mxu0 %v6390_v61  ;;  %4705 = vmatprep.subr.bf16.mxu1 %v6393_v63  ;;  %v6451_v61 = vld [vmem:[%s8577_s5 + $0x5f8] ss:$28 sps:$4 sm:$0xff]   ;;  %v6455_v63 = vld [vmem:[%s8577_s5 + $0xb40] ss:$28 sps:$4 sm:$0xff]  }
 0x333   :  { %5741 = vmatprep.subr.bf16.mxu0 %v6394_v28  ;;  %v6458_v28 = vld [vmem:[%s8577_s5 + $0x634] ss:$28 sps:$4 sm:$0xff]  }
 0x335   :  { %4706 = vmatpush1.bf16.msra.mxu1 %v6391_v0  ;;  %v6459_v0 = vld [vmem:[%s8577_s5 + $0xd38] ss:$28 sps:$4 sm:$0xff]  }
 0x336   :  { %5742 = vmatpush3.bf16.msra.mxu0 %v6395_v1  ;;  %4716 = vmatprep.subr.bf16.mxu1 %v6398_v2  ;;  %v6456_v1 = vld [vmem:[%s8577_s5 + $0x630] ss:$28 sps:$4 sm:$0xff]   ;;  %v6460_v2 = vld [vmem:[%s8577_s5 + $0xb78] ss:$28 sps:$4 sm:$0xff]  }
 0x337   :  { %5749 = vmatprep.subr.bf16.mxu0 %v6399_v3  ;;  %v6463_v3 = vld [vmem:[%s8577_s5 + $0x66c] ss:$28 sps:$4 sm:$0xff]  }
 0x338   :  { %4708 = vmatmul.mubr.bf16.vlgmr.msra.gmra.mrb[16].mxu1 %v7295_v31  ;;  %v6408_v31 = vld [vmem:[%s8577_s5 + $0x404] ss:$28 sps:$4 sm:$0xff]  }
 0x339   :  { %4912 = vmatmul.mubr.bf16.vlgmr.msra.gmra.mrb[32].mxu0 %v7512_v56  ;;  %4717 = vmatpush1.bf16.msra.mxu1 %v6396_v4  ;;  %v6464_v4 = vld [vmem:[%s8577_s5 + $0xd70] ss:$28 sps:$4 sm:$0xff]  }
 0x33a   :  { %4748 = vmatprep.mubr.bf16.mxu1 %v7305_v34  ;;  %5750 = vmatpush3.bf16.msra.mxu0 %v6400_v5  ;;  %v6406_v34 = vld [vmem:[%s8577_s5 + $0x400] ss:$28 sps:$4 sm:$0xff]   ;;  %v6461_v5 = vld [vmem:[%s8577_s5 + $0x668] ss:$28 sps:$4 sm:$0xff]  }
 0x33b   :  { %4951 = vmatprep.mubr.bf16.mxu0 %v7517_v58  ;;  %4718 = vmatprep.subr.bf16.mxu1 %v6403_v10  ;;  %v6465_v10 = vld [vmem:[%s8577_s5 + $0xbb0] ss:$28 sps:$4 sm:$0xff]  }
 0x33c   :  { %5751 = vmatprep.subr.bf16.mxu0 %v6404_v12  ;;  %v6468_v12 = vld [vmem:[%s8577_s5 + $0x6a4] ss:$28 sps:$4 sm:$0xff]  }
 0x33d   :  { %4719 = vmatpush1.bf16.msra.mxu1 %v6401_v13  ;;  %v6469_v13 = vld [vmem:[%s8577_s5 + $0xda8] ss:$28 sps:$4 sm:$0xff]  }
 0x33e   :  { %5752 = vmatpush3.bf16.msra.mxu0 %v6405_v15  ;;  %4720 = vmatprep.subr.bf16.mxu1 %v6408_v31  ;;  %v6466_v15 = vld [vmem:[%s8577_s5 + $0x6a0] ss:$28 sps:$4 sm:$0xff]   ;;  %v6470_v31 = vld [vmem:[%s8577_s5 + $0xbe8] ss:$28 sps:$4 sm:$0xff]  }
 0x33f   :  { %5753 = vmatprep.subr.bf16.mxu0 %v6409_v17  ;;  %v6473_v17 = vld [vmem:[%s8577_s5 + $0x6dc] ss:$28 sps:$4 sm:$0xff]  }
 0x341   :  { %4721 = vmatpush1.bf16.msra.mxu1 %v6406_v34  ;;  %v6474_v34 = vld [vmem:[%s8577_s5 + $0xde0] ss:$28 sps:$4 sm:$0xff]  }
 0x342   :  { %5754 = vmatpush3.bf16.msra.mxu0 %v6410_v14  ;;  %4722 = vmatprep.subr.bf16.mxu1 %v6413_v18  ;;  %v6471_v14 = vld [vmem:[%s8577_s5 + $0x6d8] ss:$28 sps:$4 sm:$0xff]   ;;  %v6475_v18 = vld [vmem:[%s8577_s5 + $0xc20] ss:$28 sps:$4 sm:$0xff]  }
 0x343   :  { %5755 = vmatprep.subr.bf16.mxu0 %v6414_v59  ;;  %v6478_v59 = vld [vmem:[%s8577_s5 + $0x714] ss:$28 sps:$4 sm:$0xff]  }
 0x345   :  { %4723 = vmatpush1.bf16.msra.mxu1 %v6411_v19  ;;  %v6476_v19 = vld [vmem:[%s8577_s5 + $0x710] ss:$28 sps:$4 sm:$0xff]  }
 0x346   :  { %5756 = vmatpush3.bf16.msra.mxu0 %v6415_v20  ;;  %4724 = vmatprep.subr.bf16.mxu1 %v6418_v21  ;;  %v6481_v20 = vld [vmem:[%s8577_s5 + $0x74c] ss:$28 sps:$4 sm:$0xff]  }
 0x347   :  { %5757 = vmatprep.subr.bf16.mxu0 %v6419_v62  ;;  %v6479_v21 = vld [vmem:[%s8577_s5 + $0x748] ss:$28 sps:$4 sm:$0xff]  }
 0x348   :  { %v6484_v62 = vld [vmem:[%s8577_s5 + $0x784] ss:$28 sps:$4 sm:$0xff]  }
 0x349   :  { %4725 = vmatpush1.bf16.msra.mxu1 %v6416_v22  ;;  %v6482_v22 = vld [vmem:[%s8577_s5 + $0x780] ss:$28 sps:$4 sm:$0xff]  }
 0x34a   :  { %5758 = vmatpush3.bf16.msra.mxu0 %v6420_v23  ;;  %4726 = vmatprep.subr.bf16.mxu1 %v6423_v26  ;;  %v6490_v23 = vld [vmem:[%s8577_s5 + $0x7f4] ss:$28 sps:$4 sm:$0xff]  }
 0x34b   :  { %5759 = vmatprep.subr.bf16.mxu0 %v6424_v29  ;;  %v6488_v26 = vld [vmem:[%s8577_s5 + $0x7f0] ss:$28 sps:$4 sm:$0xff]  }
 0x34c   :  { %v6493_v29 = vld [vmem:[%s8577_s5 + $0x82c] ss:$28 sps:$4 sm:$0xff]  }
 0x34d   :  { %4727 = vmatpush1.bf16.msra.mxu1 %v6421_v30  ;;  %v6491_v30 = vld [vmem:[%s8577_s5 + $0x828] ss:$28 sps:$4 sm:$0xff]  }
 0x34e   :  { %5760 = vmatpush3.bf16.msra.mxu0 %v6425_v32  ;;  %4728 = vmatprep.subr.bf16.mxu1 %v6428_v35  ;;  %v6496_v32 = vld [vmem:[%s8577_s5 + $0x864] ss:$28 sps:$4 sm:$0xff]  }
 0x34f   :  { %5761 = vmatprep.subr.bf16.mxu0 %v6429_v36  ;;  %v6494_v35 = vld [vmem:[%s8577_s5 + $0x860] ss:$28 sps:$4 sm:$0xff]  }
 0x350   :  { %v6499_v36 = vld [vmem:[%s8577_s5 + $0x89c] ss:$28 sps:$4 sm:$0xff]  }
 0x351   :  { %4729 = vmatpush1.bf16.msra.mxu1 %v6426_v38  ;;  %v6497_v38 = vld [vmem:[%s8577_s5 + $0x898] ss:$28 sps:$4 sm:$0xff]  }
 0x352   :  { %5762 = vmatpush3.bf16.msra.mxu0 %v6430_v39  ;;  %4730 = vmatprep.subr.bf16.mxu1 %v6433_v7  ;;  %v6502_v39 = vld [vmem:[%s8577_s5 + $0x8d4] ss:$28 sps:$4 sm:$0xff]  }
 0x353   :  { %5763 = vmatprep.subr.bf16.mxu0 %v6434_v40  ;;  %v6500_v7 = vld [vmem:[%s8577_s5 + $0x8d0] ss:$28 sps:$4 sm:$0xff]  }
 0x354   :  { %v6505_v40 = vld [vmem:[%s8577_s5 + $0x90c] ss:$28 sps:$4 sm:$0xff]  }
 0x355   :  { %4731 = vmatpush1.bf16.msra.mxu1 %v6431_v41  ;;  %v6503_v41 = vld [vmem:[%s8577_s5 + $0x908] ss:$28 sps:$4 sm:$0xff]  }
 0x356   :  { %5764 = vmatpush3.bf16.msra.mxu0 %v6435_v42  ;;  %4732 = vmatprep.subr.bf16.mxu1 %v6438_v43  ;;  %v6508_v42 = vld [vmem:[%s8577_s5 + $0x944] ss:$28 sps:$4 sm:$0xff]  }
 0x357   :  { %5771 = vmatprep.subr.bf16.mxu0 %v6439_v60  ;;  %v6506_v43 = vld [vmem:[%s8577_s5 + $0x940] ss:$28 sps:$4 sm:$0xff]  }
 0x358   :  { %v6511_v60 = vld [vmem:[%s8577_s5 + $0x97c] ss:$28 sps:$4 sm:$0xff]  }
 0x359   :  { %4952 = vmatmul.mubr.bf16.vlgmr.msra.gmra.mrb[36].mxu0 %v7720_v24  ;;  %4733 = vmatpush1.bf16.msra.mxu1 %v6436_v44  ;;  %v6509_v44 = vld [vmem:[%s8577_s5 + $0x978] ss:$28 sps:$4 sm:$0xff]  }
 0x35a   :  { %5772 = vmatpush3.bf16.msra.mxu0 %v6440_v45  ;;  %4991 = vmatprep.mubr.bf16.mxu0 %v7728_v27  ;;  %v6514_v45 = vld [vmem:[%s8577_s5 + $0x9b4] ss:$28 sps:$4 sm:$0xff]  }
 0x35b   :  { %4734 = vmatprep.subr.bf16.mxu1 %v6443_v46  ;;  %5773 = vmatprep.subr.bf16.mxu0 %v6444_v47  ;;  %v6512_v46 = vld [vmem:[%s8577_s5 + $0x9b0] ss:$28 sps:$4 sm:$0xff]  }
 0x35c   :  { %v6517_v47 = vld [vmem:[%s8577_s5 + $0x9ec] ss:$28 sps:$4 sm:$0xff]  }
 0x35d   :  { %4735 = vmatpush1.bf16.msra.mxu1 %v6441_v48  ;;  %v6515_v48 = vld [vmem:[%s8577_s5 + $0x9e8] ss:$28 sps:$4 sm:$0xff]  }
 0x35e   :  { %5774 = vmatpush3.bf16.msra.mxu0 %v6445_v50  ;;  %4736 = vmatprep.subr.bf16.mxu1 %v6448_v16  ;;  %v6520_v50 = vld [vmem:[%s8577_s5 + $0xa24] ss:$28 sps:$4 sm:$0xff]  }
 0x35f   :  { %5775 = vmatprep.subr.bf16.mxu0 %v6449_v51  ;;  %v6518_v16 = vld [vmem:[%s8577_s5 + $0xa20] ss:$28 sps:$4 sm:$0xff]  }
 0x360   :  { %v6523_v51 = vld [vmem:[%s8577_s5 + $0xa5c] ss:$28 sps:$4 sm:$0xff]  }
 0x361   :  { %4737 = vmatpush1.bf16.msra.mxu1 %v6446_v52  ;;  %v6521_v52 = vld [vmem:[%s8577_s5 + $0xa58] ss:$28 sps:$4 sm:$0xff]  }
 0x362   :  { %5776 = vmatpush3.bf16.msra.mxu0 %v6450_v53  ;;  %4738 = vmatprep.subr.bf16.mxu1 %v6453_v54  ;;  %v6526_v53 = vld [vmem:[%s8577_s5 + $0xa94] ss:$28 sps:$4 sm:$0xff]  }
 0x363   :  { %5777 = vmatprep.subr.bf16.mxu0 %v6454_v57  ;;  %v6524_v54 = vld [vmem:[%s8577_s5 + $0xa90] ss:$28 sps:$4 sm:$0xff]  }
 0x364   :  { %v6529_v57 = vld [vmem:[%s8577_s5 + $0xacc] ss:$28 sps:$4 sm:$0xff]  }
 0x365   :  { %4739 = vmatpush1.bf16.msra.mxu1 %v6451_v61  ;;  %v6527_v61 = vld [vmem:[%s8577_s5 + $0xac8] ss:$28 sps:$4 sm:$0xff]  }
 0x366   :  { %5778 = vmatpush3.bf16.msra.mxu0 %v6455_v63  ;;  %4740 = vmatprep.subr.bf16.mxu1 %v6458_v28  ;;  %v6532_v63 = vld [vmem:[%s8577_s5 + $0xb04] ss:$28 sps:$4 sm:$0xff]  }
 0x367   :  { %5779 = vmatprep.subr.bf16.mxu0 %v6459_v0  ;;  %v6530_v28 = vld [vmem:[%s8577_s5 + $0xb00] ss:$28 sps:$4 sm:$0xff]   ;;  %v6538_v0 = vld [vmem:[%s8577_s5 + $0xb74] ss:$28 sps:$4 sm:$0xff]  }
 0x369   :  { %4741 = vmatpush1.bf16.msra.mxu1 %v6456_v1  ;;  %v6536_v1 = vld [vmem:[%s8577_s5 + $0xb70] ss:$28 sps:$4 sm:$0xff]  }
 0x36a   :  { %5780 = vmatpush3.bf16.msra.mxu0 %v6460_v2  ;;  %4742 = vmatprep.subr.bf16.mxu1 %v6463_v3  ;;  %v8448_v2 = vld [vmem:[%s8580_s6] sm:$0xff]  ;;  %v6541_v3 = vld [vmem:[%s8577_s5 + $0xbac] ss:$28 sps:$4 sm:$0xff]  }
 0x36b   :  { %5781 = vmatprep.subr.bf16.mxu0 %v6464_v4  ;;  %v2019_v4 = vrot.slane %v8448_v2, %v964_v33 }
 0x36d   :  { %4743 = vmatpush1.bf16.msra.mxu1 %v6461_v5  ;;  %v2015_v5 = vrot.slane %v8448_v2, %v960_v8 }
 0x36e   :  { %5782 = vmatpush3.bf16.msra.mxu0 %v6465_v10  ;;  %4744 = vmatprep.subr.bf16.mxu1 %v6468_v12  ;;  %v6539_v10 = vld [vmem:[%s8577_s5 + $0xba8] ss:$28 sps:$4 sm:$0xff]  }
 0x36f   :  { %5783 = vmatprep.subr.bf16.mxu0 %v6469_v13  ;;  %v6544_v12 = vld [vmem:[%s8577_s5 + $0xbe4] ss:$28 sps:$4 sm:$0xff]  }
 0x371   :  { %4745 = vmatpush1.bf16.msra.mxu1 %v6466_v15  ;;  %v2023_v15 = vrot.slane %v8448_v2, %v968_v9  ;;  %v6547_v9 = vld [vmem:[%s8577_s5 + $0xc1c] ss:$28 sps:$4 sm:$0xff]  }
 0x372   :  { %5784 = vmatpush3.bf16.msra.mxu0 %v6470_v31  ;;  %4746 = vmatprep.subr.bf16.mxu1 %v6473_v17 }
 0x373   :  { %5785 = vmatprep.subr.bf16.mxu0 %v6474_v34 }
 0x375   :  { %4747 = vmatpush1.bf16.msra.mxu1 %v6471_v14 }
 0x376   :  { %5786 = vmatpush3.bf16.msra.mxu0 %v6475_v18  ;;  %4757 = vmatprep.subr.bf16.mxu1 %v6478_v59  ;;  %v6542_v18 = vld [vmem:[%s8577_s5 + $0xbe0] ss:$28 sps:$4 sm:$0xff]  }
 0x378   :  { %4749 = vmatmul.mubr.bf16.vlgmr.msra.gmra.mrb[16].mxu1 %v7512_v56  ;;  %v6487_v56 = vld [vmem:[%s8577_s5 + $0x7bc] ss:$28 sps:$4 sm:$0xff]  }
 0x379   :  { %4992 = vmatmul.mubr.bf16.vlgmr.msra.gmra.mrb[40].mxu0 %v7925_v49  ;;  %4758 = vmatpush1.bf16.msra.mxu1 %v6476_v19 }
 0x37a   :  { %4789 = vmatprep.mubr.bf16.mxu1 %v7517_v58  ;;  %4759 = vmatprep.subr.bf16.mxu1 %v6481_v20  ;;  %v6485_v58 = vld [vmem:[%s8577_s5 + $0x7b8] ss:$28 sps:$4 sm:$0xff]  }
 0x37d   :  { %4760 = vmatpush1.bf16.msra.mxu1 %v6479_v21 }
 0x37e   :  { %4761 = vmatprep.subr.bf16.mxu1 %v6484_v62 }
 0x381   :  { %4762 = vmatpush1.bf16.msra.mxu1 %v6482_v22 }
 0x382   :  { %4763 = vmatprep.subr.bf16.mxu1 %v6487_v56  ;;  %v6545_v56 = vld [vmem:[%s8577_s5 + $0xc18] ss:$28 sps:$4 sm:$0xff]  }
 0x385   :  { %4764 = vmatpush1.bf16.msra.mxu1 %v6485_v58  ;;  %v6550_v58 = vld [vmem:[%s8577_s5 + $0xc54] ss:$28 sps:$4 sm:$0xff]  }
 0x386   :  { %4765 = vmatprep.subr.bf16.mxu1 %v6490_v23  ;;  %v6548_v23 = vld [vmem:[%s8577_s5 + $0xc50] ss:$28 sps:$4 sm:$0xff]  }
 0x389   :  { %4766 = vmatpush1.bf16.msra.mxu1 %v6488_v26  ;;  %v6553_v26 = vld [vmem:[%s8577_s5 + $0xc8c] ss:$28 sps:$4 sm:$0xff]  }
 0x38a   :  { %4767 = vmatprep.subr.bf16.mxu1 %v6493_v29  ;;  %v6551_v29 = vld [vmem:[%s8577_s5 + $0xc88] ss:$28 sps:$4 sm:$0xff]  }
 0x38d   :  { %4768 = vmatpush1.bf16.msra.mxu1 %v6491_v30  ;;  %v6556_v30 = vld [vmem:[%s8577_s5 + $0xcc4] ss:$28 sps:$4 sm:$0xff]  }
 0x38e   :  { %4769 = vmatprep.subr.bf16.mxu1 %v6496_v32  ;;  %v6554_v32 = vld [vmem:[%s8577_s5 + $0xcc0] ss:$28 sps:$4 sm:$0xff]  }
 0x391   :  { %4770 = vmatpush1.bf16.msra.mxu1 %v6494_v35  ;;  %v6559_v35 = vld [vmem:[%s8577_s5 + $0xcfc] ss:$28 sps:$4 sm:$0xff]  }
 0x392   :  { %4771 = vmatprep.subr.bf16.mxu1 %v6499_v36  ;;  %v6557_v36 = vld [vmem:[%s8577_s5 + $0xcf8] ss:$28 sps:$4 sm:$0xff]  }
 0x395   :  { %4772 = vmatpush1.bf16.msra.mxu1 %v6497_v38  ;;  %v6562_v38 = vld [vmem:[%s8577_s5 + $0xd34] ss:$28 sps:$4 sm:$0xff]  }
 0x396   :  { %4773 = vmatprep.subr.bf16.mxu1 %v6502_v39  ;;  %v6560_v39 = vld [vmem:[%s8577_s5 + $0xd30] ss:$28 sps:$4 sm:$0xff]  }
 0x399   :  { %4774 = vmatpush1.bf16.msra.mxu1 %v6500_v7  ;;  %v6565_v7 = vld [vmem:[%s8577_s5 + $0xd6c] ss:$28 sps:$4 sm:$0xff]  }
 0x39a   :  { %4775 = vmatprep.subr.bf16.mxu1 %v6505_v40  ;;  %v6563_v40 = vld [vmem:[%s8577_s5 + $0xd68] ss:$28 sps:$4 sm:$0xff]  }
 0x39d   :  { %4776 = vmatpush1.bf16.msra.mxu1 %v6503_v41  ;;  %v6568_v41 = vld [vmem:[%s8577_s5 + $0xda4] ss:$28 sps:$4 sm:$0xff]  }
 0x39e   :  { %4777 = vmatprep.subr.bf16.mxu1 %v6508_v42 }
 0x3a1   :  { %4778 = vmatpush1.bf16.msra.mxu1 %v6506_v43 }
 0x3a2   :  { %4779 = vmatprep.subr.bf16.mxu1 %v6511_v60  ;;  %v6566_v60 = vld [vmem:[%s8577_s5 + $0xda0] ss:$28 sps:$4 sm:$0xff]  }
 0x3a5   :  { %4780 = vmatpush1.bf16.msra.mxu1 %v6509_v44 }
 0x3a6   :  { %4781 = vmatprep.subr.bf16.mxu1 %v6514_v45 }
 0x3a9   :  { %4782 = vmatpush1.bf16.msra.mxu1 %v6512_v46  ;;  %v6571_v46 = vld [vmem:[%s8577_s5 + $0xddc] ss:$28 sps:$4 sm:$0xff]  }
 0x3aa   :  { %4783 = vmatprep.subr.bf16.mxu1 %v6517_v47 }
 0x3ad   :  { %4784 = vmatpush1.bf16.msra.mxu1 %v6515_v48  ;;  %v6569_v48 = vld [vmem:[%s8577_s5 + $0xdd8] ss:$28 sps:$4 sm:$0xff]  }
 0x3ae   :  { %4785 = vmatprep.subr.bf16.mxu1 %v6520_v50  ;;  %v2035_v50 = vrot.slane %v8448_v2, %v980_v25  ;;  %v2027_v25 = vrot.slane %v8448_v2, %v972_v55 }
 0x3b1   :  { %4786 = vmatpush1.bf16.msra.mxu1 %v6518_v16 }
 0x3b2   :  { %4787 = vmatprep.subr.bf16.mxu1 %v6523_v51 }
 0x3b5   :  { %4788 = vmatpush1.bf16.msra.mxu1 %v6521_v52 }
 0x3b6   :  { %4798 = vmatprep.subr.bf16.mxu1 %v6526_v53 }
 0x3b8   :  { %4790 = vmatmul.mubr.bf16.vlgmr.msra.gmra.mrb[16].mxu1 %v7720_v24  ;;  %v6535_v24 = vld [vmem:[%s8577_s5 + $0xb3c] ss:$28 sps:$4 sm:$0xff]  }
 0x3b9   :  { %4799 = vmatpush1.bf16.msra.mxu1 %v6524_v54  ;;  %4830 = vmatprep.mubr.bf16.mxu1 %v7728_v27  ;;  %v6533_v27 = vld [vmem:[%s8577_s5 + $0xb38] ss:$28 sps:$4 sm:$0xff]  }
 0x3ba   :  { %4800 = vmatprep.subr.bf16.mxu1 %v6529_v57 }
 0x3bd   :  { %4801 = vmatpush1.bf16.msra.mxu1 %v6527_v61 }
 0x3be   :  { %4802 = vmatprep.subr.bf16.mxu1 %v6532_v63 }
 0x3c1   :  { %4803 = vmatpush1.bf16.msra.mxu1 %v6530_v28 }
 0x3c2   :  { %4804 = vmatprep.subr.bf16.mxu1 %v6535_v24 }
 0x3c5   :  { %4805 = vmatpush1.bf16.msra.mxu1 %v6533_v27 }
 0x3c6   :  { %4806 = vmatprep.subr.bf16.mxu1 %v6538_v0 }
 0x3c9   :  { %4807 = vmatpush1.bf16.msra.mxu1 %v6536_v1 }
 0x3ca   :  { %4808 = vmatprep.subr.bf16.mxu1 %v6541_v3 }
 0x3cb   :  { %v8465_v13 = vpop.f32.mrb[12].mxu1 }
 0x3cc   :  { %v4668_v33 = vpop.f32.mrb[24].mxu0  ;;  %v4506_v31 = vpop.f32.mrb[13].mxu1 }
 0x3cd   :  { %v8470_v17 = vadd.f32 %v4668_v33, %v2019_v4  ;;  %v8472_v8 = vadd.f32 %v4506_v31, %v2015_v5  ;;  %v4670_v34 = vpop.f32.mrb[25].mxu0  ;;  %v4508_v14 = vpop.f32.mrb[14].mxu1  ;;  %4809 = vmatpush1.bf16.msra.mxu1 %v6539_v10 }
 0x3ce   :  { %v4672_v59 = vpop.f32.mrb[26].mxu0  ;;  %v4509_v19 = vpop.f32.mrb[15].mxu1  ;;  %4810 = vmatprep.subr.bf16.mxu1 %v6544_v12  ;;  %v8482_v21 = vadd.f32 %v4670_v34, %v2023_v15  ;;  %v2031_v15 = vrot.slane %v8448_v2, %v976_v37 }
 0x3cf   :  { %v4999_v20 = vadd.f32 %v8470_v17, %v8472_v8  ;;  %v4673_v62 = vpop.f32.mrb[27].mxu0 }
 0x3d1   :  { %v8485_v22 = vadd.f32 %v8482_v21, %v4999_v20  ;;  %4811 = vmatpush1.bf16.msra.mxu1 %v6542_v18 }
 0x3d2   :  { %4812 = vmatprep.subr.bf16.mxu1 %v6547_v9  ;;  %v2011_v9 = vrot.slane %v8448_v2, %v956_v6 }
 0x3d4   :  { %v5813_v55 = vadd.f32 %v8465_v13, %v2011_v9 }
 0x3d5   :  { %4813 = vmatpush1.bf16.msra.mxu1 %v6545_v56 }
 0x3d6   :  { %4814 = vmatprep.subr.bf16.mxu1 %v6550_v58 }
 0x3d9   :  { %4815 = vmatpush1.bf16.msra.mxu1 %v6548_v23 }
 0x3da   :  { %4816 = vmatprep.subr.bf16.mxu1 %v6553_v26 }
 0x3dd   :  { %4817 = vmatpush1.bf16.msra.mxu1 %v6551_v29 }
 0x3de   :  { %4818 = vmatprep.subr.bf16.mxu1 %v6556_v30 }
 0x3e1   :  { %4819 = vmatpush1.bf16.msra.mxu1 %v6554_v32 }
 0x3e2   :  { %4820 = vmatprep.subr.bf16.mxu1 %v6559_v35 }
 0x3e5   :  { %4821 = vmatpush1.bf16.msra.mxu1 %v6557_v36 }
 0x3e6   :  { %4822 = vmatprep.subr.bf16.mxu1 %v6562_v38 }
 0x3e9   :  { %4823 = vmatpush1.bf16.msra.mxu1 %v6560_v39 }
 0x3ea   :  { %4824 = vmatprep.subr.bf16.mxu1 %v6565_v7 }
 0x3ec   :  { %v5721_v42 = vpop.f32.mrb[28].mxu0 }
 0x3ed   :  { %v5722_v43 = vpop.f32.mrb[29].mxu0  ;;  %4825 = vmatpush1.bf16.msra.mxu1 %v6563_v40 }
 0x3ee   :  { %v5723_v44 = vadd.f32 %v5722_v43, %v5721_v42  ;;  %v5724_v45 = vpop.f32.mrb[30].mxu0  ;;  %4826 = vmatprep.subr.bf16.mxu1 %v6568_v41 }
 0x3ef   :  { %v5725_v47 = vpop.f32.mrb[31].mxu0 }
 0x3f0   :  { %v4874_v52 = vadd.f32 %v5723_v44, %v2035_v50 }
 0x3f1   :  { %4827 = vmatpush1.bf16.msra.mxu1 %v6566_v60 }
 0x3f2   :  { %4828 = vmatprep.subr.bf16.mxu1 %v6571_v46 }
 0x3f5   :  { %4829 = vmatpush1.bf16.msra.mxu1 %v6569_v48 }
 0x3f8   :  { %4831 = vmatmul.mubr.bf16.vlgmr.msra.gmra.mrb[16].mxu1 %v7925_v49 }
 0x40c   :  { %v5743_v16 = vpop.f32.mrb[32].mxu0 }
 0x40d   :  { %v5744_v51 = vpop.f32.mrb[33].mxu0 }
 0x40e   :  { %v5745_v53 = vadd.f32 %v5744_v51, %v5743_v16  ;;  %v5746_v54 = vpop.f32.mrb[34].mxu0 }
 0x40f   :  { %v5747_v57 = vpop.f32.mrb[35].mxu0 }
 0x410   :  { %v4914_v61 = vadd.f32 %v5745_v53, %v4874_v52 }
 0x42c   :  { %v5765_v63 = vpop.f32.mrb[36].mxu0 }
 0x42d   :  { %v5766_v28 = vpop.f32.mrb[37].mxu0 }
 0x42e   :  { %v5767_v24 = vadd.f32 %v5766_v28, %v5765_v63  ;;  %v5768_v27 = vpop.f32.mrb[38].mxu0 }
 0x42f   :  { %v5769_v0 = vpop.f32.mrb[39].mxu0 }
 0x430   :  { %v4954_v1 = vadd.f32 %v5767_v24, %v4914_v61 }
 0x44c   :  { %v5787_v3 = vpop.f32.mrb[40].mxu0 }
 0x44d   :  { %v5788_v4 = vpop.f32.mrb[41].mxu0 }
 0x44e   :  { %v5789_v49 = vadd.f32 %v5788_v4, %v5787_v3  ;;  %v5790_v5 = vpop.f32.mrb[42].mxu0 }
 0x44f   :  { %v5791_v10 = vpop.f32.mrb[43].mxu0 }
 0x450   :  { %v4994_v12 = vadd.f32 %v5789_v49, %v4954_v1 }
 0x4cb   :  { %v4832_v33 = vpop.f32.mrb[16].mxu1 }
 0x4cc   :  { %v5817_v31 = vadd.f32 %v4832_v33, %v2027_v25  ;;  %v4834_v34 = vpop.f32.mrb[17].mxu1 }
 0x4cd   :  { %v5818_v14 = vadd.f32 %v4834_v34, %v2031_v15  ;;  %v4836_v18 = vpop.f32.mrb[18].mxu1 }
 0x4ce   :  { %v5001_v59 = vadd.f32 %v5817_v31, %v8485_v22  ;;  %v4837_v19 = vpop.f32.mrb[19].mxu1 }
 0x4d0   :  { %v5002_v20 = vadd.f32 %v5818_v14, %v5001_v59 }
 0x4d2   :  { %v5003_v62 = vadd.f32 %v5002_v20, %v4994_v12 }
 0x4d4   :  { %v5004_v56 = vmul.f32 0.16666667, %v5003_v62 }
 0x4d6   :  { %v5005_v58 = vsub.f32 %v5813_v55, %v5004_v56 }
 0x4d8   :  { %v5006_v37 = vadd.f32 %v8472_v8, %v5005_v58  ;;  %v5008_v23 = vadd.f32 %v8470_v17, %v5005_v58  ;;  %v5010_v26 = vadd.f32 %v8482_v21, %v5005_v58  ;;  %v5012_v29 = vadd.f32 %v5817_v31, %v5005_v58 }
 0x4d9   :  { %v5014_v30 = vadd.f32 %v5818_v14, %v5005_v58  ;;  %v5016_v22 = vadd.f32 %v5005_v58, %v4994_v12 }
 0x4da   :  { %5007 = vst [vmem:[%s8581_s7] sm:$0x3] %v5006_v37  ;;  %5009 = vst [vmem:[%s8581_s7 + $0x2] sm:$0x3] %v5008_v23 }
 0x4db   :  { %5011 = vst [vmem:[%s8581_s7 + $0x4] sm:$0x3] %v5010_v26  ;;  %5013 = vst [vmem:[%s8581_s7 + $0x6] sm:$0x3] %v5012_v29 }
 0x4dc   :  { %5015 = vst [vmem:[%s8581_s7 + $0x8] sm:$0x3] %v5014_v30  ;;  %5017 = vst [vmem:[%s8581_s7 + $0xa] sm:$0x3] %v5016_v22 }

</bundles_post_ra>
